<compile_context>
chip_gen: v7x
topology: tpu7x:2x2x1
jax: 0.10.0
libtpu: 0.0.40
codegen_flags: <defaults>
</compile_context>

<pallas_src>
import functools
import math

import jax
import jax.numpy as jnp
from jax import lax
from jax.experimental import pallas as pl
from jax.experimental.pallas import tpu as pltpu

# Set to jnp.bfloat16 on v6e/v7x for ~2x MXU throughput (f32 keeps reference numerics).
MXU_DTYPE = jnp.float32
_VMEM_LIMIT = 48 * 1024 * 1024  # headroom-safe on v7x (64 MiB physical) and v5e/v6e


def _pick_tile(dim, target, align):
    """Largest tile <= target that is a multiple of `align` and divides `dim`;
    falls back to the full dim (full dims are always legal block extents)."""
    if dim <= target:
        return dim
    t = (target // align) * align
    while t >= align:
        if dim % t == 0:
            return t
        t -= align
    return dim


# ----------------------------------------------------------------------------
# Tiled matmul kernel:  y = x @ w  (+bias) (ReLU) (+residual)
# Output block is f32 and resident across the K grid axis -> accumulate in place.
# ----------------------------------------------------------------------------
def _linear_kernel(*refs, has_bias, has_resid, relu, single_k):
    x_ref, w_ref = refs[0], refs[1]
    idx = 2
    bias_ref = refs[idx] if has_bias else None
    if has_bias:
        idx += 1
    resid_ref = refs[idx] if has_resid else None
    if has_resid:
        idx += 1
    o_ref = refs[idx]

    partial = jnp.dot(x_ref[...].astype(MXU_DTYPE),
                      w_ref[...].astype(MXU_DTYPE),
                      preferred_element_type=jnp.float32)

    def epilogue(r):
        if has_bias:
            r = r + bias_ref[...]
        if relu:
            r = jnp.maximum(r, 0.0)
        if has_resid:
            r = r + resid_ref[...]
        return r

    if single_k:
        # K fits in one tile: store the finished tile directly (no init / RMW).
        o_ref[...] = epilogue(partial).astype(o_ref.dtype)
    else:
        @pl.when(pl.program_id(2) == 0)
        def _():
            o_ref[...] = jnp.zeros_like(o_ref)

        o_ref[...] += partial

        if has_bias or relu or has_resid:
            @pl.when(pl.program_id(2) == pl.num_programs(2) - 1)
            def _():
                o_ref[...] = epilogue(o_ref[...]).astype(o_ref.dtype)


def linear(x, w, bias=None, residual=None, relu=False):
    """x: [B, L, K] (or [M, K]) @ w: [K, N]; optional fused bias / ReLU / residual."""
    is3d = x.ndim == 3
    if is3d:
        B, L, K = x.shape
        M = B * L
        x2 = x.reshape(M, K)
    else:
        M, K = x.shape
        x2 = x
    N = w.shape[1]

    tm = _pick_tile(M, 256, 8)
    tn = _pick_tile(N, 512, 128)
    tk = _pick_tile(K, 512, 128)
    grid = (M // tm, N // tn, K // tk)

    in_specs = [
        pl.BlockSpec((tm, tk), lambda i, j, k: (i, k)),
        pl.BlockSpec((tk, tn), lambda i, j, k: (k, j)),
    ]
    args = [x2, w]
    if bias is not None:
        in_specs.append(pl.BlockSpec((1, tn), lambda i, j, k: (0, j)))
        args.append(bias.reshape(1, N))
    if residual is not None:
        in_specs.append(pl.BlockSpec((tm, tn), lambda i, j, k: (i, j)))
        args.append(residual.reshape(M, N))

    out = pl.pallas_call(
        functools.partial(_linear_kernel, has_bias=bias is not None,
                          has_resid=residual is not None, relu=relu,
                          single_k=(grid[2] == 1)),
        out_shape=jax.ShapeDtypeStruct((M, N), jnp.float32),
        grid=grid,
        in_specs=in_specs,
        out_specs=pl.BlockSpec((tm, tn), lambda i, j, k: (i, j)),
        compiler_params=pltpu.CompilerParams(
            dimension_semantics=("parallel", "parallel", "arbitrary"),
            vmem_limit_bytes=_VMEM_LIMIT),
    )(*args)
    return out.reshape(B, L, N) if is3d else out


# ----------------------------------------------------------------------------
# Fused LayerNorm + matmul:  y = LN(x) @ w  (+bias) (ReLU)
# (K is kept whole so the per-row normalization can be computed in-kernel.)
# ----------------------------------------------------------------------------
def _ln_linear_kernel(*refs, has_bias, relu, eps, feat):
    x_ref, g_ref, beta_ref, w_ref = refs[0], refs[1], refs[2], refs[3]
    idx = 4
    bias_ref = refs[idx] if has_bias else None
    if has_bias:
        idx += 1
    o_ref = refs[idx]

    x = x_ref[...]
    mean = jnp.mean(x, axis=-1, keepdims=True)
    d = x - mean
    # torch.Tensor.std() is unbiased (N-1); reference LayerNorm adds eps to the std.
    var = jnp.sum(d * d, axis=-1, keepdims=True) * (1.0 / (feat - 1))
    inv = pl.reciprocal(jnp.sqrt(var) + eps, approx=True)
    xn = g_ref[...] * d * inv + beta_ref[...]

    acc = jnp.dot(xn.astype(MXU_DTYPE), w_ref[...].astype(MXU_DTYPE),
                  preferred_element_type=jnp.float32)
    if has_bias:
        acc = acc + bias_ref[...]
    if relu:
        acc = jnp.maximum(acc, 0.0)
    o_ref[...] = acc


def ln_linear(x, gamma, beta, w, bias=None, relu=False, eps=1e-6):
    B, L, K = x.shape
    M = B * L
    N = w.shape[1]
    tm = _pick_tile(M, 256, 8)
    tn = _pick_tile(N, 512, 128)
    grid = (M // tm, N // tn)

    in_specs = [
        pl.BlockSpec((tm, K), lambda i, j: (i, 0)),
        pl.BlockSpec((1, K), lambda i, j: (0, 0)),
        pl.BlockSpec((1, K), lambda i, j: (0, 0)),
        pl.BlockSpec((K, tn), lambda i, j: (0, j)),
    ]
    args = [x.reshape(M, K), gamma.reshape(1, K), beta.reshape(1, K), w]
    if bias is not None:
        in_specs.append(pl.BlockSpec((1, tn), lambda i, j: (0, j)))
        args.append(bias.reshape(1, N))

    out = pl.pallas_call(
        functools.partial(_ln_linear_kernel, has_bias=bias is not None,
                          relu=relu, eps=eps, feat=K),
        out_shape=jax.ShapeDtypeStruct((M, N), jnp.float32),
        grid=grid,
        in_specs=in_specs,
        out_specs=pl.BlockSpec((tm, tn), lambda i, j: (i, j)),
        compiler_params=pltpu.CompilerParams(
            dimension_semantics=("parallel", "parallel"),
            vmem_limit_bytes=_VMEM_LIMIT),
    )(*args)
    return out.reshape(B, L, N)


# ----------------------------------------------------------------------------
# Standalone LayerNorm (final norm)
# ----------------------------------------------------------------------------
def _ln_kernel(x_ref, g_ref, b_ref, o_ref, *, eps, feat):
    x = x_ref[...]
    mean = jnp.mean(x, axis=-1, keepdims=True)
    d = x - mean
    var = jnp.sum(d * d, axis=-1, keepdims=True) * (1.0 / (feat - 1))
    inv = pl.reciprocal(jnp.sqrt(var) + eps, approx=True)
    o_ref[...] = g_ref[...] * d * inv + b_ref[...]


def layer_norm(x, gamma, beta, eps=1e-6):
    B, L, D = x.shape
    M = B * L
    tm = _pick_tile(M, 512, 8)
    out = pl.pallas_call(
        functools.partial(_ln_kernel, eps=eps, feat=D),
        out_shape=jax.ShapeDtypeStruct((M, D), jnp.float32),
        grid=(M // tm,),
        in_specs=[
            pl.BlockSpec((tm, D), lambda i: (i, 0)),
            pl.BlockSpec((1, D), lambda i: (0, 0)),
            pl.BlockSpec((1, D), lambda i: (0, 0)),
        ],
        out_specs=pl.BlockSpec((tm, D), lambda i: (i, 0)),
        compiler_params=pltpu.CompilerParams(dimension_semantics=("parallel",)),
    )(x.reshape(M, D), gamma.reshape(1, D), beta.reshape(1, D))
    return out.reshape(B, L, D)


# ----------------------------------------------------------------------------
# Multi-head attention: all heads of one batch row per grid step, q tiled over Lq.
# Causal mask generated in-kernel; only a [B,1,Lk] padding mask is streamed in.
# ----------------------------------------------------------------------------
def _attention_kernel(*refs, scale, causal, need_attn):
    q_ref, k_ref, v_ref, m_ref = refs[0], refs[1], refs[2], refs[3]
    ctx_ref = refs[4]
    attn_ref = refs[5] if need_attn else None

    q = q_ref[0].astype(jnp.float32) * scale      # (tq, H, dk)
    k = k_ref[0]                                  # (Lk, H, dk)
    v = v_ref[0]                                  # (Lk, H, dv)
    tq = q.shape[0]
    Lk = k.shape[0]
    H = k.shape[1]

    logits = jnp.einsum('qhd,khd->hqk', q.astype(MXU_DTYPE), k.astype(MXU_DTYPE),
                        preferred_element_type=jnp.float32)          # (H, tq, Lk)

    pad = m_ref[0] > 0                            # (1, Lk) bool; True == masked
    if causal:
        row = pl.program_id(1) * tq + lax.broadcasted_iota(jnp.int32, (tq, Lk), 0)
        col = lax.broadcasted_iota(jnp.int32, (tq, Lk), 1)
        mask2d = jnp.logical_or(pad, col > row)   # (tq, Lk)
    else:
        mask2d = pad                              # (1, Lk), broadcasts over rows
    logits = jnp.where(mask2d[None, :, :], jnp.float32(-1e18), logits)

    if need_attn:
        # head-mean of masked pre-softmax logits (reference semantics)
        attn_ref[0] = jnp.sum(logits, axis=0) * (1.0 / H)

    lmax = jnp.max(logits, axis=-1, keepdims=True)
    e = jnp.exp(logits - lmax)
    wgt = e * pl.reciprocal(jnp.sum(e, axis=-1, keepdims=True), approx=True)
    ctx = jnp.einsum('hqk,khd->qhd', wgt.astype(MXU_DTYPE), v.astype(MXU_DTYPE),
                     preferred_element_type=jnp.float32)              # (tq, H, dv)
    ctx_ref[0] = ctx


def multi_head_attention(q, k, v, pad_mask, *, causal, need_attn):
    """q: [B,Lq,H,dk], k: [B,Lk,H,dk], v: [B,Lk,H,dv], pad_mask: [B,1,Lk] int (1=masked)."""
    B, Lq, H, dk = q.shape
    Lk = k.shape[1]
    dv = v.shape[3]
    scale = float(dk ** -0.5)
    tq = _pick_tile(Lq, 256, 8)
    grid = (B, Lq // tq)

    in_specs = [
        pl.BlockSpec((1, tq, H, dk), lambda b, i: (b, i, 0, 0)),
        pl.BlockSpec((1, Lk, H, dk), lambda b, i: (b, 0, 0, 0)),
        pl.BlockSpec((1, Lk, H, dv), lambda b, i: (b, 0, 0, 0)),
        pl.BlockSpec((1, 1, Lk), lambda b, i: (b, 0, 0)),
    ]
    ctx_shape = jax.ShapeDtypeStruct((B, Lq, H, dv), jnp.float32)
    ctx_spec = pl.BlockSpec((1, tq, H, dv), lambda b, i: (b, i, 0, 0))
    if need_attn:
        out_shape = (ctx_shape, jax.ShapeDtypeStruct((B, Lq, Lk), jnp.float32))
        out_specs = (ctx_spec, pl.BlockSpec((1, tq, Lk), lambda b, i: (b, i, 0)))
    else:
        out_shape = ctx_shape
        out_specs = ctx_spec

    result = pl.pallas_call(
        functools.partial(_attention_kernel, scale=scale, causal=causal,
                          need_attn=need_attn),
        out_shape=out_shape,
        grid=grid,
        in_specs=in_specs,
        out_specs=out_specs,
        compiler_params=pltpu.CompilerParams(
            dimension_semantics=("parallel", "parallel"),
            vmem_limit_bytes=_VMEM_LIMIT),
    )(q, k, v, pad_mask)

    if need_attn:
        ctx, attn = result
    else:
        ctx, attn = result, None
    return ctx.reshape(B, Lq, H * dv), attn


# ----------------------------------------------------------------------------
# Decoder (plain-JAX orchestration around the Pallas kernels)
# ----------------------------------------------------------------------------
def get_timing_signal(length, channels, min_timescale=1.0, max_timescale=1.0e4):
    position = jnp.arange(length, dtype=jnp.float32)
    num_timescales = channels // 2
    log_inc = math.log(float(max_timescale) / float(min_timescale)) / max(num_timescales - 1, 1)
    inv_timescales = min_timescale * jnp.exp(
        jnp.arange(num_timescales, dtype=jnp.float32) * -log_inc)
    scaled_time = position[:, None] * inv_timescales[None, :]
    signal = jnp.concatenate([jnp.sin(scaled_time), jnp.cos(scaled_time)], axis=1)
    if channels % 2:
        signal = jnp.pad(signal, ((0, 0), (0, channels % 2)))
    return signal.reshape(1, length, channels)


def decoder_layer_forward(x, enc_out, src_pad, trg_pad, p,
                          num_heads, key_depth, value_depth, need_attn):
    B, L, _ = x.shape
    Ls = enc_out.shape[1]
    kd, vd = key_depth, value_depth
    dk, dv = kd // num_heads, vd // num_heads

    # --- masked multi-head self-attention (pre-LN fused into the QKV matmul) ---
    qkv = ln_linear(x, p["ln1_g"], p["ln1_b"], p["self_wqkv"])        # [B, L, 2kd+vd]
    q = qkv[..., :kd].reshape(B, L, num_heads, dk)
    k = qkv[..., kd:2 * kd].reshape(B, L, num_heads, dk)
    v = qkv[..., 2 * kd:].reshape(B, L, num_heads, dv)
    ctx, _ = multi_head_attention(q, k, v, trg_pad, causal=True, need_attn=False)
    x = linear(ctx, p["self_wo"], residual=x)                          # fused residual

    # --- encoder-decoder cross attention (pre-LN on queries only) ---
    q = ln_linear(x, p["ln2_g"], p["ln2_b"], p["cross_wq"]).reshape(B, L, num_heads, dk)
    kv = linear(enc_out, p["cross_wkv"])                               # [B, Ls, kd+vd]
    k = kv[..., :kd].reshape(B, Ls, num_heads, dk)
    v = kv[..., kd:].reshape(B, Ls, num_heads, dv)
    ctx, attn = multi_head_attention(q, k, v, src_pad, causal=False, need_attn=need_attn)
    x = linear(ctx, p["cross_wo"], residual=x)                         # fused residual

    # --- position-wise feed-forward (pre-LN + ReLU fused into matmul 1) ---
    h = ln_linear(x, p["ln3_g"], p["ln3_b"], p["ffn_w1"], bias=p["ffn_b1"], relu=True)
    x = linear(h, p["ffn_w2"], bias=p["ffn_b2"], residual=x)           # fused bias+resid
    return x, attn


def decoder_forward(params, inputs, encoder_output, mask_src, mask_trg,
                    num_heads, key_depth, value_depth):
    B, L, _ = inputs.shape
    # tiny int padding masks (1 == masked); the causal mask is built in-kernel.
    trg_pad = mask_trg.astype(jnp.int32)          # [B, 1, L]
    src_pad = mask_src.astype(jnp.int32)          # [B, 1, Ls]

    # input dropout is 0.0 -> identity
    x = linear(inputs, params["proj_w"])          # embedding_proj (no bias)
    x = x + params["timing_signal"][:, :L, :]

    attn_dist = None
    n_layers = len(params["layers"])
    for li, p in enumerate(params["layers"]):
        x, a = decoder_layer_forward(x, encoder_output, src_pad, trg_pad, p,
                                     num_heads, key_depth, value_depth,
                                     need_attn=(li == n_layers - 1))
        if a is not None:
            attn_dist = a

    y = layer_norm(x, params["final_ln_g"], params["final_ln_b"])
    return y, attn_dist


def init_params(key, word_dim, hidden, filter_size, num_layers,
                key_depth, value_depth, max_length):
    def nrm(k, shape):
        return 0.02 * jax.random.normal(k, shape, jnp.float32)

    keys = jax.random.split(key, 1 + num_layers)
    params = {
        "proj_w": nrm(keys[0], (word_dim, hidden)),
        "final_ln_g": jnp.ones((hidden,), jnp.float32),
        "final_ln_b": jnp.zeros((hidden,), jnp.float32),
        "timing_signal": get_timing_signal(max_length, hidden),
        "layers": [],
    }
    for li in range(num_layers):
        lk = jax.random.split(keys[1 + li], 10)
        params["layers"].append({
            "ln1_g": jnp.ones((hidden,), jnp.float32),
            "ln1_b": jnp.zeros((hidden,), jnp.float32),
            "self_wqkv": jnp.concatenate([nrm(lk[0], (hidden, key_depth)),
                                          nrm(lk[1], (hidden, key_depth)),
                                          nrm(lk[2], (hidden, value_depth))], axis=1),
            "self_wo": nrm(lk[3], (value_depth, hidden)),
            "ln2_g": jnp.ones((hidden,), jnp.float32),
            "ln2_b": jnp.zeros((hidden,), jnp.float32),
            "cross_wq": nrm(lk[4], (hidden, key_depth)),
            "cross_wkv": jnp.concatenate([nrm(lk[5], (hidden, key_depth)),
                                          nrm(lk[6], (hidden, value_depth))], axis=1),
            "cross_wo": nrm(lk[7], (value_depth, hidden)),
            "ln3_g": jnp.ones((hidden,), jnp.float32),
            "ln3_b": jnp.zeros((hidden,), jnp.float32),
            "ffn_w1": nrm(lk[8], (hidden, filter_size)),
            "ffn_b1": jnp.zeros((filter_size,), jnp.float32),
            "ffn_w2": nrm(lk[9], (filter_size, hidden)),
            "ffn_b2": jnp.zeros((hidden,), jnp.float32),
        })
    return params


if __name__ == "__main__":
    # small, module-consistent shapes
    B, L_trg, L_src = 2, 8, 8
    word_dim, hidden, filter_size = 16, 32, 64
    num_heads, num_layers = 4, 2          # dec_trans_size = (head_number, layer_number)
    key_depth = value_depth = 32
    max_length = 100

    key = jax.random.PRNGKey(0)
    k_in, k_enc, k_param = jax.random.split(key, 3)
    inputs = jax.random.normal(k_in, (B, L_trg, word_dim), jnp.float32)
    encoder_output = jax.random.normal(k_enc, (B, L_src, hidden), jnp.float32)
    # padding masks (True == padded/masked); batch 1 has one padded position each
    mask_src = jnp.zeros((B, 1, L_src), jnp.bool_).at[1, 0, L_src - 1].set(True)
    mask_trg = jnp.zeros((B, 1, L_trg), jnp.bool_).at[1, 0, L_trg - 1].set(True)

    params = init_params(k_param, word_dim, hidden, filter_size, num_layers,
                         key_depth, value_depth, max_length)

    fwd = jax.jit(functools.partial(decoder_forward,
                                    num_heads=num_heads, key_depth=key_depth,
                                    value_depth=value_depth))
    y, attn_dist = fwd(params, inputs, encoder_output, mask_src, mask_trg)
    jax.block_until_ready((y, attn_dist))

    assert y.shape == (B, L_trg, hidden) and y.dtype == jnp.float32
    assert attn_dist.shape == (B, L_trg, L_src)
    assert bool(jnp.all(jnp.isfinite(y)))
    print("KERNEL_OK")
</pallas_src>

<mosaic_0001>
module attributes {stable_mosaic.version = 11 : i64} {
  func.func @_linear_kernel(%arg0: i32, %arg1: i32, %arg2: i32, %arg3: memref<16x16xf32, #tpu.memory_space<vmem>>, %arg4: memref<16x32xf32, #tpu.memory_space<vmem>>, %arg5: memref<16x32xf32, #tpu.memory_space<vmem>>) attributes {dimension_semantics = [#tpu.dimension_semantics<parallel>, #tpu.dimension_semantics<parallel>, #tpu.dimension_semantics<arbitrary>], iteration_bounds = array<i64: 1, 1, 1>, scalar_prefetch = 0 : i64, scratch_operands = 0 : i64, tpu.core_type = #tpu.core_type<tc>, window_params = [{transform_indices = @transform_0, window_bounds = array<i64: 16, 16>}, {transform_indices = @transform_1, window_bounds = array<i64: 16, 32>}, {transform_indices = @transform_2, window_bounds = array<i64: 16, 32>}]} {
    %c0 = arith.constant 0 : index
    %c0_0 = arith.constant 0 : index
    %0 = vector.load %arg3[%c0, %c0_0] : memref<16x16xf32, #tpu.memory_space<vmem>>, vector<16x16xf32>
    %c0_1 = arith.constant 0 : index
    %c0_2 = arith.constant 0 : index
    %1 = vector.load %arg4[%c0_1, %c0_2] : memref<16x32xf32, #tpu.memory_space<vmem>>, vector<16x32xf32>
    %cst = arith.constant dense<0.000000e+00> : vector<16x32xf32>
    %2 = tpu.matmul %0, %1, %cst {dimension_numbers = #tpu.dot_dimension_numbers<[1], [0], [0], [1], [0, 0, 1, 1], [], []>} : vector<16x16xf32>, vector<16x32xf32>, vector<16x32xf32> -> vector<16x32xf32>
    %c0_3 = arith.constant 0 : index
    %c0_4 = arith.constant 0 : index
    %3 = vector.load %arg5[%c0_3, %c0_4] : memref<16x32xf32, #tpu.memory_space<vmem>>, vector<16x32xf32>
    tpu.vector_store %arg5[%c0_3, %c0_4], %2 {strides = array<i32>} : memref<16x32xf32, #tpu.memory_space<vmem>>, vector<16x32xf32>,
    return
  }
  func.func @transform_0(%arg0: i32, %arg1: i32, %arg2: i32) -> (i32, i32) {
    %c0_i32 = arith.constant 0 : i32
    return %arg0, %arg2 : i32, i32
  }
  func.func @transform_1(%arg0: i32, %arg1: i32, %arg2: i32) -> (i32, i32) {
    %c0_i32 = arith.constant 0 : i32
    return %arg2, %arg1 : i32, i32
  }
  func.func @transform_2(%arg0: i32, %arg1: i32, %arg2: i32) -> (i32, i32) {
    %c0_i32 = arith.constant 0 : i32
    return %arg0, %arg1 : i32, i32
  }
}

module attributes {stable_mosaic.version = 11 : i64} {
  func.func @_ln_linear_kernel(%arg0: i32, %arg1: i32, %arg2: memref<16x32xf32, #tpu.memory_space<vmem>>, %arg3: memref<1x32xf32, #tpu.memory_space<vmem>>, %arg4: memref<1x32xf32, #tpu.memory_space<vmem>>, %arg5: memref<32x96xf32, #tpu.memory_space<vmem>>, %arg6: memref<16x96xf32, #tpu.memory_space<vmem>>) attributes {dimension_semantics = [#tpu.dimension_semantics<parallel>, #tpu.dimension_semantics<parallel>], iteration_bounds = array<i64: 1, 1>, scalar_prefetch = 0 : i64, scratch_operands = 0 : i64, tpu.core_type = #tpu.core_type<tc>, window_params = [{transform_indices = @transform_0, window_bounds = array<i64: 16, 32>}, {pipeline_mode = #tpu.pipeline_mode<synchronous>, transform_indices = @transform_1, window_bounds = array<i64: 1, 32>}, {pipeline_mode = #tpu.pipeline_mode<synchronous>, transform_indices = @transform_2, window_bounds = array<i64: 1, 32>}, {transform_indices = @transform_3, window_bounds = array<i64: 32, 96>}, {transform_indices = @transform_4, window_bounds = array<i64: 16, 96>}]} {
    %c0 = arith.constant 0 : index
    %c0_0 = arith.constant 0 : index
    %0 = vector.load %arg2[%c0, %c0_0] : memref<16x32xf32, #tpu.memory_space<vmem>>, vector<16x32xf32>
    %cst = arith.constant dense<0.000000e+00> : vector<16xf32>
    %1 = vector.multi_reduction <add>, %0, %cst [1] : vector<16x32xf32> to vector<16xf32>
    %2 = vector.shape_cast %1 : vector<16xf32> to vector<16x1xf32>
    %cst_1 = arith.constant 3.200000e+01 : f32
    %3 = vector.broadcast %cst_1 : f32 to vector<16x1xf32>
    %4 = arith.divf %2, %3 : vector<16x1xf32>
    %5 = vector.broadcast %4 : vector<16x1xf32> to vector<16x32xf32>
    %6 = arith.subf %0, %5 : vector<16x32xf32>
    %7 = arith.mulf %6, %6 : vector<16x32xf32>
    %cst_2 = arith.constant dense<0.000000e+00> : vector<16xf32>
    %8 = vector.multi_reduction <add>, %7, %cst_2 [1] : vector<16x32xf32> to vector<16xf32>
    %9 = vector.shape_cast %8 : vector<16xf32> to vector<16x1xf32>
    %cst_3 = arith.constant 0.0322580636 : f32
    %10 = vector.broadcast %cst_3 : f32 to vector<16x1xf32>
    %11 = arith.mulf %9, %10 : vector<16x1xf32>
    %12 = math.sqrt %11 : vector<16x1xf32>
    %cst_4 = arith.constant 9.99999997E-7 : f32
    %13 = vector.broadcast %cst_4 : f32 to vector<16x1xf32>
    %14 = arith.addf %12, %13 : vector<16x1xf32>
    %15 = tpu.reciprocal %14 {approx = true} : vector<16x1xf32> -> vector<16x1xf32>
    %c0_5 = arith.constant 0 : index
    %c0_6 = arith.constant 0 : index
    %16 = vector.load %arg3[%c0_5, %c0_6] : memref<1x32xf32, #tpu.memory_space<vmem>>, vector<1x32xf32>
    %17 = vector.broadcast %16 : vector<1x32xf32> to vector<16x32xf32>
    %18 = arith.mulf %17, %6 : vector<16x32xf32>
    %19 = vector.broadcast %15 : vector<16x1xf32> to vector<16x32xf32>
    %20 = arith.mulf %18, %19 : vector<16x32xf32>
    %c0_7 = arith.constant 0 : index
    %c0_8 = arith.constant 0 : index
    %21 = vector.load %arg4[%c0_7, %c0_8] : memref<1x32xf32, #tpu.memory_space<vmem>>, vector<1x32xf32>
    %22 = vector.broadcast %21 : vector<1x32xf32> to vector<16x32xf32>
    %23 = arith.addf %20, %22 : vector<16x32xf32>
    %c0_9 = arith.constant 0 : index
    %c0_10 = arith.constant 0 : index
    %24 = vector.load %arg5[%c0_9, %c0_10] : memref<32x96xf32, #tpu.memory_space<vmem>>, vector<32x96xf32>
    %cst_11 = arith.constant dense<0.000000e+00> : vector<16x96xf32>
    %25 = tpu.matmul %23, %24, %cst_11 {dimension_numbers = #tpu.dot_dimension_numbers<[1], [0], [0], [1], [0, 0, 1, 1], [], []>} : vector<16x32xf32>, vector<32x96xf32>, vector<16x96xf32> -> vector<16x96xf32>
    %c0_12 = arith.constant 0 : index
    %c0_13 = arith.constant 0 : index
    %26 = vector.load %arg6[%c0_12, %c0_13] : memref<16x96xf32, #tpu.memory_space<vmem>>, vector<16x96xf32>
    tpu.vector_store %arg6[%c0_12, %c0_13], %25 {strides = array<i32>} : memref<16x96xf32, #tpu.memory_space<vmem>>, vector<16x96xf32>,
    return
  }
  func.func @transform_0(%arg0: i32, %arg1: i32) -> (i32, i32) {
    %c0_i32 = arith.constant 0 : i32
    %c0_i32_0 = arith.constant 0 : i32
    return %arg0, %c0_i32 : i32, i32
  }
  func.func @transform_1(%arg0: i32, %arg1: i32) -> (i32, i32) {
    %c0_i32 = arith.constant 0 : i32
    %c0_i32_0 = arith.constant 0 : i32
    %c0_i32_1 = arith.constant 0 : i32
    return %c0_i32, %c0_i32_0 : i32, i32
  }
  func.func @transform_2(%arg0: i32, %arg1: i32) -> (i32, i32) {
    %c0_i32 = arith.constant 0 : i32
    %c0_i32_0 = arith.constant 0 : i32
    %c0_i32_1 = arith.constant 0 : i32
    return %c0_i32, %c0_i32_0 : i32, i32
  }
  func.func @transform_3(%arg0: i32, %arg1: i32) -> (i32, i32) {
    %c0_i32 = arith.constant 0 : i32
    %c0_i32_0 = arith.constant 0 : i32
    return %c0_i32, %arg1 : i32, i32
  }
  func.func @transform_4(%arg0: i32, %arg1: i32) -> (i32, i32) {
    %c0_i32 = arith.constant 0 : i32
    return %arg0, %arg1 : i32, i32
  }
}

module attributes {stable_mosaic.version = 11 : i64} {
  func.func @_attention_kernel(%arg0: i32, %arg1: i32, %arg2: memref<1x8x4x8xf32, #tpu.memory_space<vmem>>, %arg3: memref<1x8x4x8xf32, #tpu.memory_space<vmem>>, %arg4: memref<1x8x4x8xf32, #tpu.memory_space<vmem>>, %arg5: memref<1x1x8xi32, #tpu.memory_space<vmem>>, %arg6: memref<1x8x4x8xf32, #tpu.memory_space<vmem>>) attributes {dimension_semantics = [#tpu.dimension_semantics<parallel>, #tpu.dimension_semantics<parallel>], iteration_bounds = array<i64: 2, 1>, scalar_prefetch = 0 : i64, scratch_operands = 0 : i64, tpu.core_type = #tpu.core_type<tc>, window_params = [{transform_indices = @transform_0, window_bounds = array<i64: 1, 8, 4, 8>}, {transform_indices = @transform_1, window_bounds = array<i64: 1, 8, 4, 8>}, {transform_indices = @transform_2, window_bounds = array<i64: 1, 8, 4, 8>}, {transform_indices = @transform_3, window_bounds = array<i64: 1, 1, 8>}, {transform_indices = @transform_4, window_bounds = array<i64: 1, 8, 4, 8>}]} {
    %c0 = arith.constant 0 : index
    %c0_0 = arith.constant 0 : index
    %c0_1 = arith.constant 0 : index
    %c0_2 = arith.constant 0 : index
    %0 = vector.load %arg2[%c0, %c0_0, %c0_1, %c0_2] : memref<1x8x4x8xf32, #tpu.memory_space<vmem>>, vector<1x8x4x8xf32>
    %1 = vector.shape_cast %0 : vector<1x8x4x8xf32> to vector<8x4x8xf32>
    %cst = arith.constant 0.353553385 : f32
    %2 = vector.broadcast %cst : f32 to vector<8x4x8xf32>
    %3 = arith.mulf %1, %2 : vector<8x4x8xf32>
    %c0_3 = arith.constant 0 : index
    %c0_4 = arith.constant 0 : index
    %c0_5 = arith.constant 0 : index
    %c0_6 = arith.constant 0 : index
    %4 = vector.load %arg3[%c0_3, %c0_4, %c0_5, %c0_6] : memref<1x8x4x8xf32, #tpu.memory_space<vmem>>, vector<1x8x4x8xf32>
    %5 = vector.shape_cast %4 : vector<1x8x4x8xf32> to vector<8x4x8xf32>
    %c0_7 = arith.constant 0 : index
    %c0_8 = arith.constant 0 : index
    %c0_9 = arith.constant 0 : index
    %c0_10 = arith.constant 0 : index
    %6 = vector.load %arg4[%c0_7, %c0_8, %c0_9, %c0_10] : memref<1x8x4x8xf32, #tpu.memory_space<vmem>>, vector<1x8x4x8xf32>
    %7 = vector.shape_cast %6 : vector<1x8x4x8xf32> to vector<8x4x8xf32>
    "tpu.trace_start"() <{level = 10 : i32, message = "qhd,khd->hqk"}> : () -> ()
    %cst_11 = arith.constant dense<0.000000e+00> : vector<4x8x8xf32>
    %8 = tpu.matmul %3, %5, %cst_11 {dimension_numbers = #tpu.dot_dimension_numbers<[2], [2], [0], [0], [0, 1, 0, 0, 1, 0], [1], [1]>} : vector<8x4x8xf32>, vector<8x4x8xf32>, vector<4x8x8xf32> -> vector<4x8x8xf32>
    "tpu.trace_stop"() : () -> ()
    %c0_12 = arith.constant 0 : index
    %c0_13 = arith.constant 0 : index
    %c0_14 = arith.constant 0 : index
    %9 = vector.load %arg5[%c0_12, %c0_13, %c0_14] : memref<1x1x8xi32, #tpu.memory_space<vmem>>, vector<1x1x8xi32>
    %10 = vector.shape_cast %9 : vector<1x1x8xi32> to vector<1x8xi32>
    %c0_i32 = arith.constant 0 : i32
    %11 = vector.broadcast %c0_i32 : i32 to vector<1x8xi32>
    %12 = arith.cmpi sgt, %10, %11 : vector<1x8xi32>
    %c8_i32 = arith.constant 8 : i32
    %13 = arith.muli %arg1, %c8_i32 : i32
    %14 = tpu.iota {dimensions = array<i32: 0>} : vector<8x8xi32>
    %15 = vector.broadcast %13 : i32 to vector<8x8xi32>
    %16 = arith.addi %15, %14 : vector<8x8xi32>
    %17 = tpu.iota {dimensions = array<i32: 1>} : vector<8x8xi32>
    %18 = arith.cmpi sgt, %17, %16 : vector<8x8xi32>
    %19 = vector.broadcast %12 : vector<1x8xi1> to vector<8x8xi1>
    %20 = arith.ori %19, %18 : vector<8x8xi1>
    %21 = vector.shape_cast %20 : vector<8x8xi1> to vector<1x8x8xi1>
    %cst_15 = arith.constant -9.99999984E+17 : f32
    %22 = vector.shape_cast %21 : vector<1x8x8xi1> to vector<1x8x8xi1>
    %23 = vector.broadcast %22 : vector<1x8x8xi1> to vector<4x8x8xi1>
    %24 = vector.broadcast %cst_15 : f32 to vector<4x8x8xf32>
    %25 = arith.select %23, %24, %8 : vector<4x8x8xi1>, vector<4x8x8xf32>
    %cst_16 = arith.constant dense<0xFF800000> : vector<4x8xf32>
    %26 = vector.multi_reduction <maximumf>, %25, %cst_16 [2] : vector<4x8x8xf32> to vector<4x8xf32>
    %27 = vector.shape_cast %26 : vector<4x8xf32> to vector<4x8x1xf32>
    %28 = vector.broadcast %27 : vector<4x8x1xf32> to vector<4x8x8xf32>
    %29 = arith.subf %25, %28 : vector<4x8x8xf32>
    %30 = math.exp %29 : vector<4x8x8xf32>
    %cst_17 = arith.constant dense<0.000000e+00> : vector<4x8xf32>
    %31 = vector.multi_reduction <add>, %30, %cst_17 [2] : vector<4x8x8xf32> to vector<4x8xf32>
    %32 = vector.shape_cast %31 : vector<4x8xf32> to vector<4x8x1xf32>
    %33 = tpu.reciprocal %32 {approx = true} : vector<4x8x1xf32> -> vector<4x8x1xf32>
    %34 = vector.broadcast %33 : vector<4x8x1xf32> to vector<4x8x8xf32>
    %35 = arith.mulf %30, %34 : vector<4x8x8xf32>
    "tpu.trace_start"() <{level = 10 : i32, message = "hqk,khd->qhd"}> : () -> ()
    %cst_18 = arith.constant dense<0.000000e+00> : vector<4x8x8xf32>
    %36 = tpu.matmul %7, %35, %cst_18 {dimension_numbers = #tpu.dot_dimension_numbers<[0], [2], [2], [1], [0, 1, 0, 2, 1, 1], [1], [0]>} : vector<8x4x8xf32>, vector<4x8x8xf32>, vector<4x8x8xf32> -> vector<4x8x8xf32>
    %37 = tpu.transpose %36, [2, 0, 1] : vector<4x8x8xf32> -> vector<8x4x8xf32>
    "tpu.trace_stop"() : () -> ()
    %c0_19 = arith.constant 0 : index
    %c0_20 = arith.constant 0 : index
    %c0_21 = arith.constant 0 : index
    %c0_22 = arith.constant 0 : index
    %38 = vector.load %arg6[%c0_19, %c0_20, %c0_21, %c0_22] : memref<1x8x4x8xf32, #tpu.memory_space<vmem>>, vector<1x8x4x8xf32>
    %39 = vector.shape_cast %38 : vector<1x8x4x8xf32> to vector<8x4x8xf32>
    %40 = vector.shape_cast %37 : vector<8x4x8xf32> to vector<1x8x4x8xf32>
    tpu.vector_store %arg6[%c0_19, %c0_20, %c0_21, %c0_22], %40 {strides = array<i32>} : memref<1x8x4x8xf32, #tpu.memory_space<vmem>>, vector<1x8x4x8xf32>,
    return
  }
  func.func @transform_0(%arg0: i32, %arg1: i32) -> (i32, i32, i32, i32) {
    %c0_i32 = arith.constant 0 : i32
    %c0_i32_0 = arith.constant 0 : i32
    %c0_i32_1 = arith.constant 0 : i32
    return %arg0, %arg1, %c0_i32, %c0_i32_0 : i32, i32, i32, i32
  }
  func.func @transform_1(%arg0: i32, %arg1: i32) -> (i32, i32, i32, i32) {
    %c0_i32 = arith.constant 0 : i32
    %c0_i32_0 = arith.constant 0 : i32
    %c0_i32_1 = arith.constant 0 : i32
    %c0_i32_2 = arith.constant 0 : i32
    return %arg0, %c0_i32, %c0_i32_0, %c0_i32_1 : i32, i32, i32, i32
  }
  func.func @transform_2(%arg0: i32, %arg1: i32) -> (i32, i32, i32, i32) {
    %c0_i32 = arith.constant 0 : i32
    %c0_i32_0 = arith.constant 0 : i32
    %c0_i32_1 = arith.constant 0 : i32
    %c0_i32_2 = arith.constant 0 : i32
    return %arg0, %c0_i32, %c0_i32_0, %c0_i32_1 : i32, i32, i32, i32
  }
  func.func @transform_3(%arg0: i32, %arg1: i32) -> (i32, i32, i32) {
    %c0_i32 = arith.constant 0 : i32
    %c0_i32_0 = arith.constant 0 : i32
    %c0_i32_1 = arith.constant 0 : i32
    return %arg0, %c0_i32, %c0_i32_0 : i32, i32, i32
  }
  func.func @transform_4(%arg0: i32, %arg1: i32) -> (i32, i32, i32, i32) {
    %c0_i32 = arith.constant 0 : i32
    %c0_i32_0 = arith.constant 0 : i32
    %c0_i32_1 = arith.constant 0 : i32
    return %arg0, %arg1, %c0_i32, %c0_i32_0 : i32, i32, i32, i32
  }
}

module attributes {stable_mosaic.version = 11 : i64} {
  func.func @_linear_kernel(%arg0: i32, %arg1: i32, %arg2: i32, %arg3: memref<16x32xf32, #tpu.memory_space<vmem>>, %arg4: memref<32x32xf32, #tpu.memory_space<vmem>>, %arg5: memref<16x32xf32, #tpu.memory_space<vmem>>, %arg6: memref<16x32xf32, #tpu.memory_space<vmem>>) attributes {dimension_semantics = [#tpu.dimension_semantics<parallel>, #tpu.dimension_semantics<parallel>, #tpu.dimension_semantics<arbitrary>], iteration_bounds = array<i64: 1, 1, 1>, scalar_prefetch = 0 : i64, scratch_operands = 0 : i64, tpu.core_type = #tpu.core_type<tc>, window_params = [{transform_indices = @transform_0, window_bounds = array<i64: 16, 32>}, {transform_indices = @transform_1, window_bounds = array<i64: 32, 32>}, {transform_indices = @transform_2, window_bounds = array<i64: 16, 32>}, {transform_indices = @transform_3, window_bounds = array<i64: 16, 32>}]} {
    %c0 = arith.constant 0 : index
    %c0_0 = arith.constant 0 : index
    %0 = vector.load %arg3[%c0, %c0_0] : memref<16x32xf32, #tpu.memory_space<vmem>>, vector<16x32xf32>
    %c0_1 = arith.constant 0 : index
    %c0_2 = arith.constant 0 : index
    %1 = vector.load %arg4[%c0_1, %c0_2] : memref<32x32xf32, #tpu.memory_space<vmem>>, vector<32x32xf32>
    %cst = arith.constant dense<0.000000e+00> : vector<16x32xf32>
    %2 = tpu.matmul %0, %1, %cst {dimension_numbers = #tpu.dot_dimension_numbers<[1], [0], [0], [1], [0, 0, 1, 1], [], []>} : vector<16x32xf32>, vector<32x32xf32>, vector<16x32xf32> -> vector<16x32xf32>
    %c0_3 = arith.constant 0 : index
    %c0_4 = arith.constant 0 : index
    %3 = vector.load %arg5[%c0_3, %c0_4] : memref<16x32xf32, #tpu.memory_space<vmem>>, vector<16x32xf32>
    %4 = arith.addf %2, %3 : vector<16x32xf32>
    %c0_5 = arith.constant 0 : index
    %c0_6 = arith.constant 0 : index
    %5 = vector.load %arg6[%c0_5, %c0_6] : memref<16x32xf32, #tpu.memory_space<vmem>>, vector<16x32xf32>
    tpu.vector_store %arg6[%c0_5, %c0_6], %4 {strides = array<i32>} : memref<16x32xf32, #tpu.memory_space<vmem>>, vector<16x32xf32>,
    return
  }
  func.func @transform_0(%arg0: i32, %arg1: i32, %arg2: i32) -> (i32, i32) {
    %c0_i32 = arith.constant 0 : i32
    return %arg0, %arg2 : i32, i32
  }
  func.func @transform_1(%arg0: i32, %arg1: i32, %arg2: i32) -> (i32, i32) {
    %c0_i32 = arith.constant 0 : i32
    return %arg2, %arg1 : i32, i32
  }
  func.func @transform_2(%arg0: i32, %arg1: i32, %arg2: i32) -> (i32, i32) {
    %c0_i32 = arith.constant 0 : i32
    return %arg0, %arg1 : i32, i32
  }
  func.func @transform_3(%arg0: i32, %arg1: i32, %arg2: i32) -> (i32, i32) {
    %c0_i32 = arith.constant 0 : i32
    return %arg0, %arg1 : i32, i32
  }
}

module attributes {stable_mosaic.version = 11 : i64} {
  func.func @_linear_kernel(%arg0: i32, %arg1: i32, %arg2: i32, %arg3: memref<16x32xf32, #tpu.memory_space<vmem>>, %arg4: memref<32x64xf32, #tpu.memory_space<vmem>>, %arg5: memref<16x64xf32, #tpu.memory_space<vmem>>) attributes {dimension_semantics = [#tpu.dimension_semantics<parallel>, #tpu.dimension_semantics<parallel>, #tpu.dimension_semantics<arbitrary>], iteration_bounds = array<i64: 1, 1, 1>, scalar_prefetch = 0 : i64, scratch_operands = 0 : i64, tpu.core_type = #tpu.core_type<tc>, window_params = [{transform_indices = @transform_0, window_bounds = array<i64: 16, 32>}, {transform_indices = @transform_1, window_bounds = array<i64: 32, 64>}, {transform_indices = @transform_2, window_bounds = array<i64: 16, 64>}]} {
    %c0 = arith.constant 0 : index
    %c0_0 = arith.constant 0 : index
    %0 = vector.load %arg3[%c0, %c0_0] : memref<16x32xf32, #tpu.memory_space<vmem>>, vector<16x32xf32>
    %c0_1 = arith.constant 0 : index
    %c0_2 = arith.constant 0 : index
    %1 = vector.load %arg4[%c0_1, %c0_2] : memref<32x64xf32, #tpu.memory_space<vmem>>, vector<32x64xf32>
    %cst = arith.constant dense<0.000000e+00> : vector<16x64xf32>
    %2 = tpu.matmul %0, %1, %cst {dimension_numbers = #tpu.dot_dimension_numbers<[1], [0], [0], [1], [0, 0, 1, 1], [], []>} : vector<16x32xf32>, vector<32x64xf32>, vector<16x64xf32> -> vector<16x64xf32>
    %c0_3 = arith.constant 0 : index
    %c0_4 = arith.constant 0 : index
    %3 = vector.load %arg5[%c0_3, %c0_4] : memref<16x64xf32, #tpu.memory_space<vmem>>, vector<16x64xf32>
    tpu.vector_store %arg5[%c0_3, %c0_4], %2 {strides = array<i32>} : memref<16x64xf32, #tpu.memory_space<vmem>>, vector<16x64xf32>,
    return
  }
  func.func @transform_0(%arg0: i32, %arg1: i32, %arg2: i32) -> (i32, i32) {
    %c0_i32 = arith.constant 0 : i32
    return %arg0, %arg2 : i32, i32
  }
  func.func @transform_1(%arg0: i32, %arg1: i32, %arg2: i32) -> (i32, i32) {
    %c0_i32 = arith.constant 0 : i32
    return %arg2, %arg1 : i32, i32
  }
  func.func @transform_2(%arg0: i32, %arg1: i32, %arg2: i32) -> (i32, i32) {
    %c0_i32 = arith.constant 0 : i32
    return %arg0, %arg1 : i32, i32
  }
}

module attributes {stable_mosaic.version = 11 : i64} {
  func.func @_ln_linear_kernel(%arg0: i32, %arg1: i32, %arg2: memref<16x32xf32, #tpu.memory_space<vmem>>, %arg3: memref<1x32xf32, #tpu.memory_space<vmem>>, %arg4: memref<1x32xf32, #tpu.memory_space<vmem>>, %arg5: memref<32x32xf32, #tpu.memory_space<vmem>>, %arg6: memref<16x32xf32, #tpu.memory_space<vmem>>) attributes {dimension_semantics = [#tpu.dimension_semantics<parallel>, #tpu.dimension_semantics<parallel>], iteration_bounds = array<i64: 1, 1>, scalar_prefetch = 0 : i64, scratch_operands = 0 : i64, tpu.core_type = #tpu.core_type<tc>, window_params = [{transform_indices = @transform_0, window_bounds = array<i64: 16, 32>}, {pipeline_mode = #tpu.pipeline_mode<synchronous>, transform_indices = @transform_1, window_bounds = array<i64: 1, 32>}, {pipeline_mode = #tpu.pipeline_mode<synchronous>, transform_indices = @transform_2, window_bounds = array<i64: 1, 32>}, {transform_indices = @transform_3, window_bounds = array<i64: 32, 32>}, {transform_indices = @transform_4, window_bounds = array<i64: 16, 32>}]} {
    %c0 = arith.constant 0 : index
    %c0_0 = arith.constant 0 : index
    %0 = vector.load %arg2[%c0, %c0_0] : memref<16x32xf32, #tpu.memory_space<vmem>>, vector<16x32xf32>
    %cst = arith.constant dense<0.000000e+00> : vector<16xf32>
    %1 = vector.multi_reduction <add>, %0, %cst [1] : vector<16x32xf32> to vector<16xf32>
    %2 = vector.shape_cast %1 : vector<16xf32> to vector<16x1xf32>
    %cst_1 = arith.constant 3.200000e+01 : f32
    %3 = vector.broadcast %cst_1 : f32 to vector<16x1xf32>
    %4 = arith.divf %2, %3 : vector<16x1xf32>
    %5 = vector.broadcast %4 : vector<16x1xf32> to vector<16x32xf32>
    %6 = arith.subf %0, %5 : vector<16x32xf32>
    %7 = arith.mulf %6, %6 : vector<16x32xf32>
    %cst_2 = arith.constant dense<0.000000e+00> : vector<16xf32>
    %8 = vector.multi_reduction <add>, %7, %cst_2 [1] : vector<16x32xf32> to vector<16xf32>
    %9 = vector.shape_cast %8 : vector<16xf32> to vector<16x1xf32>
    %cst_3 = arith.constant 0.0322580636 : f32
    %10 = vector.broadcast %cst_3 : f32 to vector<16x1xf32>
    %11 = arith.mulf %9, %10 : vector<16x1xf32>
    %12 = math.sqrt %11 : vector<16x1xf32>
    %cst_4 = arith.constant 9.99999997E-7 : f32
    %13 = vector.broadcast %cst_4 : f32 to vector<16x1xf32>
    %14 = arith.addf %12, %13 : vector<16x1xf32>
    %15 = tpu.reciprocal %14 {approx = true} : vector<16x1xf32> -> vector<16x1xf32>
    %c0_5 = arith.constant 0 : index
    %c0_6 = arith.constant 0 : index
    %16 = vector.load %arg3[%c0_5, %c0_6] : memref<1x32xf32, #tpu.memory_space<vmem>>, vector<1x32xf32>
    %17 = vector.broadcast %16 : vector<1x32xf32> to vector<16x32xf32>
    %18 = arith.mulf %17, %6 : vector<16x32xf32>
    %19 = vector.broadcast %15 : vector<16x1xf32> to vector<16x32xf32>
    %20 = arith.mulf %18, %19 : vector<16x32xf32>
    %c0_7 = arith.constant 0 : index
    %c0_8 = arith.constant 0 : index
    %21 = vector.load %arg4[%c0_7, %c0_8] : memref<1x32xf32, #tpu.memory_space<vmem>>, vector<1x32xf32>
    %22 = vector.broadcast %21 : vector<1x32xf32> to vector<16x32xf32>
    %23 = arith.addf %20, %22 : vector<16x32xf32>
    %c0_9 = arith.constant 0 : index
    %c0_10 = arith.constant 0 : index
    %24 = vector.load %arg5[%c0_9, %c0_10] : memref<32x32xf32, #tpu.memory_space<vmem>>, vector<32x32xf32>
    %cst_11 = arith.constant dense<0.000000e+00> : vector<16x32xf32>
    %25 = tpu.matmul %23, %24, %cst_11 {dimension_numbers = #tpu.dot_dimension_numbers<[1], [0], [0], [1], [0, 0, 1, 1], [], []>} : vector<16x32xf32>, vector<32x32xf32>, vector<16x32xf32> -> vector<16x32xf32>
    %c0_12 = arith.constant 0 : index
    %c0_13 = arith.constant 0 : index
    %26 = vector.load %arg6[%c0_12, %c0_13] : memref<16x32xf32, #tpu.memory_space<vmem>>, vector<16x32xf32>
    tpu.vector_store %arg6[%c0_12, %c0_13], %25 {strides = array<i32>} : memref<16x32xf32, #tpu.memory_space<vmem>>, vector<16x32xf32>,
    return
  }
  func.func @transform_0(%arg0: i32, %arg1: i32) -> (i32, i32) {
    %c0_i32 = arith.constant 0 : i32
    %c0_i32_0 = arith.constant 0 : i32
    return %arg0, %c0_i32 : i32, i32
  }
  func.func @transform_1(%arg0: i32, %arg1: i32) -> (i32, i32) {
    %c0_i32 = arith.constant 0 : i32
    %c0_i32_0 = arith.constant 0 : i32
    %c0_i32_1 = arith.constant 0 : i32
    return %c0_i32, %c0_i32_0 : i32, i32
  }
  func.func @transform_2(%arg0: i32, %arg1: i32) -> (i32, i32) {
    %c0_i32 = arith.constant 0 : i32
    %c0_i32_0 = arith.constant 0 : i32
    %c0_i32_1 = arith.constant 0 : i32
    return %c0_i32, %c0_i32_0 : i32, i32
  }
  func.func @transform_3(%arg0: i32, %arg1: i32) -> (i32, i32) {
    %c0_i32 = arith.constant 0 : i32
    %c0_i32_0 = arith.constant 0 : i32
    return %c0_i32, %arg1 : i32, i32
  }
  func.func @transform_4(%arg0: i32, %arg1: i32) -> (i32, i32) {
    %c0_i32 = arith.constant 0 : i32
    return %arg0, %arg1 : i32, i32
  }
}

module attributes {stable_mosaic.version = 11 : i64} {
  func.func @_attention_kernel(%arg0: i32, %arg1: i32, %arg2: memref<1x8x4x8xf32, #tpu.memory_space<vmem>>, %arg3: memref<1x8x4x8xf32, #tpu.memory_space<vmem>>, %arg4: memref<1x8x4x8xf32, #tpu.memory_space<vmem>>, %arg5: memref<1x1x8xi32, #tpu.memory_space<vmem>>, %arg6: memref<1x8x4x8xf32, #tpu.memory_space<vmem>>) attributes {dimension_semantics = [#tpu.dimension_semantics<parallel>, #tpu.dimension_semantics<parallel>], iteration_bounds = array<i64: 2, 1>, scalar_prefetch = 0 : i64, scratch_operands = 0 : i64, tpu.core_type = #tpu.core_type<tc>, window_params = [{transform_indices = @transform_0, window_bounds = array<i64: 1, 8, 4, 8>}, {transform_indices = @transform_1, window_bounds = array<i64: 1, 8, 4, 8>}, {transform_indices = @transform_2, window_bounds = array<i64: 1, 8, 4, 8>}, {transform_indices = @transform_3, window_bounds = array<i64: 1, 1, 8>}, {transform_indices = @transform_4, window_bounds = array<i64: 1, 8, 4, 8>}]} {
    %c0 = arith.constant 0 : index
    %c0_0 = arith.constant 0 : index
    %c0_1 = arith.constant 0 : index
    %c0_2 = arith.constant 0 : index
    %0 = vector.load %arg2[%c0, %c0_0, %c0_1, %c0_2] : memref<1x8x4x8xf32, #tpu.memory_space<vmem>>, vector<1x8x4x8xf32>
    %1 = vector.shape_cast %0 : vector<1x8x4x8xf32> to vector<8x4x8xf32>
    %cst = arith.constant 0.353553385 : f32
    %2 = vector.broadcast %cst : f32 to vector<8x4x8xf32>
    %3 = arith.mulf %1, %2 : vector<8x4x8xf32>
    %c0_3 = arith.constant 0 : index
    %c0_4 = arith.constant 0 : index
    %c0_5 = arith.constant 0 : index
    %c0_6 = arith.constant 0 : index
    %4 = vector.load %arg3[%c0_3, %c0_4, %c0_5, %c0_6] : memref<1x8x4x8xf32, #tpu.memory_space<vmem>>, vector<1x8x4x8xf32>
    %5 = vector.shape_cast %4 : vector<1x8x4x8xf32> to vector<8x4x8xf32>
    %c0_7 = arith.constant 0 : index
    %c0_8 = arith.constant 0 : index
    %c0_9 = arith.constant 0 : index
    %c0_10 = arith.constant 0 : index
    %6 = vector.load %arg4[%c0_7, %c0_8, %c0_9, %c0_10] : memref<1x8x4x8xf32, #tpu.memory_space<vmem>>, vector<1x8x4x8xf32>
    %7 = vector.shape_cast %6 : vector<1x8x4x8xf32> to vector<8x4x8xf32>
    "tpu.trace_start"() <{level = 10 : i32, message = "qhd,khd->hqk"}> : () -> ()
    %cst_11 = arith.constant dense<0.000000e+00> : vector<4x8x8xf32>
    %8 = tpu.matmul %3, %5, %cst_11 {dimension_numbers = #tpu.dot_dimension_numbers<[2], [2], [0], [0], [0, 1, 0, 0, 1, 0], [1], [1]>} : vector<8x4x8xf32>, vector<8x4x8xf32>, vector<4x8x8xf32> -> vector<4x8x8xf32>
    "tpu.trace_stop"() : () -> ()
    %c0_12 = arith.constant 0 : index
    %c0_13 = arith.constant 0 : index
    %c0_14 = arith.constant 0 : index
    %9 = vector.load %arg5[%c0_12, %c0_13, %c0_14] : memref<1x1x8xi32, #tpu.memory_space<vmem>>, vector<1x1x8xi32>
    %10 = vector.shape_cast %9 : vector<1x1x8xi32> to vector<1x8xi32>
    %c0_i32 = arith.constant 0 : i32
    %11 = vector.broadcast %c0_i32 : i32 to vector<1x8xi32>
    %12 = arith.cmpi sgt, %10, %11 : vector<1x8xi32>
    %13 = vector.shape_cast %12 : vector<1x8xi1> to vector<1x1x8xi1>
    %cst_15 = arith.constant -9.99999984E+17 : f32
    %14 = vector.shape_cast %13 : vector<1x1x8xi1> to vector<1x1x8xi1>
    %15 = vector.broadcast %14 : vector<1x1x8xi1> to vector<4x8x8xi1>
    %16 = vector.broadcast %cst_15 : f32 to vector<4x8x8xf32>
    %17 = arith.select %15, %16, %8 : vector<4x8x8xi1>, vector<4x8x8xf32>
    %cst_16 = arith.constant dense<0xFF800000> : vector<4x8xf32>
    %18 = vector.multi_reduction <maximumf>, %17, %cst_16 [2] : vector<4x8x8xf32> to vector<4x8xf32>
    %19 = vector.shape_cast %18 : vector<4x8xf32> to vector<4x8x1xf32>
    %20 = vector.broadcast %19 : vector<4x8x1xf32> to vector<4x8x8xf32>
    %21 = arith.subf %17, %20 : vector<4x8x8xf32>
    %22 = math.exp %21 : vector<4x8x8xf32>
    %cst_17 = arith.constant dense<0.000000e+00> : vector<4x8xf32>
    %23 = vector.multi_reduction <add>, %22, %cst_17 [2] : vector<4x8x8xf32> to vector<4x8xf32>
    %24 = vector.shape_cast %23 : vector<4x8xf32> to vector<4x8x1xf32>
    %25 = tpu.reciprocal %24 {approx = true} : vector<4x8x1xf32> -> vector<4x8x1xf32>
    %26 = vector.broadcast %25 : vector<4x8x1xf32> to vector<4x8x8xf32>
    %27 = arith.mulf %22, %26 : vector<4x8x8xf32>
    "tpu.trace_start"() <{level = 10 : i32, message = "hqk,khd->qhd"}> : () -> ()
    %cst_18 = arith.constant dense<0.000000e+00> : vector<4x8x8xf32>
    %28 = tpu.matmul %7, %27, %cst_18 {dimension_numbers = #tpu.dot_dimension_numbers<[0], [2], [2], [1], [0, 1, 0, 2, 1, 1], [1], [0]>} : vector<8x4x8xf32>, vector<4x8x8xf32>, vector<4x8x8xf32> -> vector<4x8x8xf32>
    %29 = tpu.transpose %28, [2, 0, 1] : vector<4x8x8xf32> -> vector<8x4x8xf32>
    "tpu.trace_stop"() : () -> ()
    %c0_19 = arith.constant 0 : index
    %c0_20 = arith.constant 0 : index
    %c0_21 = arith.constant 0 : index
    %c0_22 = arith.constant 0 : index
    %30 = vector.load %arg6[%c0_19, %c0_20, %c0_21, %c0_22] : memref<1x8x4x8xf32, #tpu.memory_space<vmem>>, vector<1x8x4x8xf32>
    %31 = vector.shape_cast %30 : vector<1x8x4x8xf32> to vector<8x4x8xf32>
    %32 = vector.shape_cast %29 : vector<8x4x8xf32> to vector<1x8x4x8xf32>
    tpu.vector_store %arg6[%c0_19, %c0_20, %c0_21, %c0_22], %32 {strides = array<i32>} : memref<1x8x4x8xf32, #tpu.memory_space<vmem>>, vector<1x8x4x8xf32>,
    return
  }
  func.func @transform_0(%arg0: i32, %arg1: i32) -> (i32, i32, i32, i32) {
    %c0_i32 = arith.constant 0 : i32
    %c0_i32_0 = arith.constant 0 : i32
    %c0_i32_1 = arith.constant 0 : i32
    return %arg0, %arg1, %c0_i32, %c0_i32_0 : i32, i32, i32, i32
  }
  func.func @transform_1(%arg0: i32, %arg1: i32) -> (i32, i32, i32, i32) {
    %c0_i32 = arith.constant 0 : i32
    %c0_i32_0 = arith.constant 0 : i32
    %c0_i32_1 = arith.constant 0 : i32
    %c0_i32_2 = arith.constant 0 : i32
    return %arg0, %c0_i32, %c0_i32_0, %c0_i32_1 : i32, i32, i32, i32
  }
  func.func @transform_2(%arg0: i32, %arg1: i32) -> (i32, i32, i32, i32) {
    %c0_i32 = arith.constant 0 : i32
    %c0_i32_0 = arith.constant 0 : i32
    %c0_i32_1 = arith.constant 0 : i32
    %c0_i32_2 = arith.constant 0 : i32
    return %arg0, %c0_i32, %c0_i32_0, %c0_i32_1 : i32, i32, i32, i32
  }
  func.func @transform_3(%arg0: i32, %arg1: i32) -> (i32, i32, i32) {
    %c0_i32 = arith.constant 0 : i32
    %c0_i32_0 = arith.constant 0 : i32
    %c0_i32_1 = arith.constant 0 : i32
    return %arg0, %c0_i32, %c0_i32_0 : i32, i32, i32
  }
  func.func @transform_4(%arg0: i32, %arg1: i32) -> (i32, i32, i32, i32) {
    %c0_i32 = arith.constant 0 : i32
    %c0_i32_0 = arith.constant 0 : i32
    %c0_i32_1 = arith.constant 0 : i32
    return %arg0, %arg1, %c0_i32, %c0_i32_0 : i32, i32, i32, i32
  }
}

module attributes {stable_mosaic.version = 11 : i64} {
  func.func @_ln_linear_kernel(%arg0: i32, %arg1: i32, %arg2: memref<16x32xf32, #tpu.memory_space<vmem>>, %arg3: memref<1x32xf32, #tpu.memory_space<vmem>>, %arg4: memref<1x32xf32, #tpu.memory_space<vmem>>, %arg5: memref<32x64xf32, #tpu.memory_space<vmem>>, %arg6: memref<1x64xf32, #tpu.memory_space<vmem>>, %arg7: memref<16x64xf32, #tpu.memory_space<vmem>>) attributes {dimension_semantics = [#tpu.dimension_semantics<parallel>, #tpu.dimension_semantics<parallel>], iteration_bounds = array<i64: 1, 1>, scalar_prefetch = 0 : i64, scratch_operands = 0 : i64, tpu.core_type = #tpu.core_type<tc>, window_params = [{transform_indices = @transform_0, window_bounds = array<i64: 16, 32>}, {pipeline_mode = #tpu.pipeline_mode<synchronous>, transform_indices = @transform_1, window_bounds = array<i64: 1, 32>}, {pipeline_mode = #tpu.pipeline_mode<synchronous>, transform_indices = @transform_2, window_bounds = array<i64: 1, 32>}, {transform_indices = @transform_3, window_bounds = array<i64: 32, 64>}, {transform_indices = @transform_4, window_bounds = array<i64: 1, 64>}, {transform_indices = @transform_5, window_bounds = array<i64: 16, 64>}]} {
    %c0 = arith.constant 0 : index
    %c0_0 = arith.constant 0 : index
    %0 = vector.load %arg2[%c0, %c0_0] : memref<16x32xf32, #tpu.memory_space<vmem>>, vector<16x32xf32>
    %cst = arith.constant dense<0.000000e+00> : vector<16xf32>
    %1 = vector.multi_reduction <add>, %0, %cst [1] : vector<16x32xf32> to vector<16xf32>
    %2 = vector.shape_cast %1 : vector<16xf32> to vector<16x1xf32>
    %cst_1 = arith.constant 3.200000e+01 : f32
    %3 = vector.broadcast %cst_1 : f32 to vector<16x1xf32>
    %4 = arith.divf %2, %3 : vector<16x1xf32>
    %5 = vector.broadcast %4 : vector<16x1xf32> to vector<16x32xf32>
    %6 = arith.subf %0, %5 : vector<16x32xf32>
    %7 = arith.mulf %6, %6 : vector<16x32xf32>
    %cst_2 = arith.constant dense<0.000000e+00> : vector<16xf32>
    %8 = vector.multi_reduction <add>, %7, %cst_2 [1] : vector<16x32xf32> to vector<16xf32>
    %9 = vector.shape_cast %8 : vector<16xf32> to vector<16x1xf32>
    %cst_3 = arith.constant 0.0322580636 : f32
    %10 = vector.broadcast %cst_3 : f32 to vector<16x1xf32>
    %11 = arith.mulf %9, %10 : vector<16x1xf32>
    %12 = math.sqrt %11 : vector<16x1xf32>
    %cst_4 = arith.constant 9.99999997E-7 : f32
    %13 = vector.broadcast %cst_4 : f32 to vector<16x1xf32>
    %14 = arith.addf %12, %13 : vector<16x1xf32>
    %15 = tpu.reciprocal %14 {approx = true} : vector<16x1xf32> -> vector<16x1xf32>
    %c0_5 = arith.constant 0 : index
    %c0_6 = arith.constant 0 : index
    %16 = vector.load %arg3[%c0_5, %c0_6] : memref<1x32xf32, #tpu.memory_space<vmem>>, vector<1x32xf32>
    %17 = vector.broadcast %16 : vector<1x32xf32> to vector<16x32xf32>
    %18 = arith.mulf %17, %6 : vector<16x32xf32>
    %19 = vector.broadcast %15 : vector<16x1xf32> to vector<16x32xf32>
    %20 = arith.mulf %18, %19 : vector<16x32xf32>
    %c0_7 = arith.constant 0 : index
    %c0_8 = arith.constant 0 : index
    %21 = vector.load %arg4[%c0_7, %c0_8] : memref<1x32xf32, #tpu.memory_space<vmem>>, vector<1x32xf32>
    %22 = vector.broadcast %21 : vector<1x32xf32> to vector<16x32xf32>
    %23 = arith.addf %20, %22 : vector<16x32xf32>
    %c0_9 = arith.constant 0 : index
    %c0_10 = arith.constant 0 : index
    %24 = vector.load %arg5[%c0_9, %c0_10] : memref<32x64xf32, #tpu.memory_space<vmem>>, vector<32x64xf32>
    %cst_11 = arith.constant dense<0.000000e+00> : vector<16x64xf32>
    %25 = tpu.matmul %23, %24, %cst_11 {dimension_numbers = #tpu.dot_dimension_numbers<[1], [0], [0], [1], [0, 0, 1, 1], [], []>} : vector<16x32xf32>, vector<32x64xf32>, vector<16x64xf32> -> vector<16x64xf32>
    %c0_12 = arith.constant 0 : index
    %c0_13 = arith.constant 0 : index
    %26 = vector.load %arg6[%c0_12, %c0_13] : memref<1x64xf32, #tpu.memory_space<vmem>>, vector<1x64xf32>
    %27 = vector.broadcast %26 : vector<1x64xf32> to vector<16x64xf32>
    %28 = arith.addf %25, %27 : vector<16x64xf32>
    %cst_14 = arith.constant 0.000000e+00 : f32
    %29 = vector.broadcast %cst_14 : f32 to vector<16x64xf32>
    %30 = arith.maximumf %28, %29 : vector<16x64xf32>
    %c0_15 = arith.constant 0 : index
    %c0_16 = arith.constant 0 : index
    %31 = vector.load %arg7[%c0_15, %c0_16] : memref<16x64xf32, #tpu.memory_space<vmem>>, vector<16x64xf32>
    tpu.vector_store %arg7[%c0_15, %c0_16], %30 {strides = array<i32>} : memref<16x64xf32, #tpu.memory_space<vmem>>, vector<16x64xf32>,
    return
  }
  func.func @transform_0(%arg0: i32, %arg1: i32) -> (i32, i32) {
    %c0_i32 = arith.constant 0 : i32
    %c0_i32_0 = arith.constant 0 : i32
    return %arg0, %c0_i32 : i32, i32
  }
  func.func @transform_1(%arg0: i32, %arg1: i32) -> (i32, i32) {
    %c0_i32 = arith.constant 0 : i32
    %c0_i32_0 = arith.constant 0 : i32
    %c0_i32_1 = arith.constant 0 : i32
    return %c0_i32, %c0_i32_0 : i32, i32
  }
  func.func @transform_2(%arg0: i32, %arg1: i32) -> (i32, i32) {
    %c0_i32 = arith.constant 0 : i32
    %c0_i32_0 = arith.constant 0 : i32
    %c0_i32_1 = arith.constant 0 : i32
    return %c0_i32, %c0_i32_0 : i32, i32
  }
  func.func @transform_3(%arg0: i32, %arg1: i32) -> (i32, i32) {
    %c0_i32 = arith.constant 0 : i32
    %c0_i32_0 = arith.constant 0 : i32
    return %c0_i32, %arg1 : i32, i32
  }
  func.func @transform_4(%arg0: i32, %arg1: i32) -> (i32, i32) {
    %c0_i32 = arith.constant 0 : i32
    %c0_i32_0 = arith.constant 0 : i32
    return %c0_i32, %arg1 : i32, i32
  }
  func.func @transform_5(%arg0: i32, %arg1: i32) -> (i32, i32) {
    %c0_i32 = arith.constant 0 : i32
    return %arg0, %arg1 : i32, i32
  }
}

module attributes {stable_mosaic.version = 11 : i64} {
  func.func @_linear_kernel(%arg0: i32, %arg1: i32, %arg2: i32, %arg3: memref<16x64xf32, #tpu.memory_space<vmem>>, %arg4: memref<64x32xf32, #tpu.memory_space<vmem>>, %arg5: memref<1x32xf32, #tpu.memory_space<vmem>>, %arg6: memref<16x32xf32, #tpu.memory_space<vmem>>, %arg7: memref<16x32xf32, #tpu.memory_space<vmem>>) attributes {dimension_semantics = [#tpu.dimension_semantics<parallel>, #tpu.dimension_semantics<parallel>, #tpu.dimension_semantics<arbitrary>], iteration_bounds = array<i64: 1, 1, 1>, scalar_prefetch = 0 : i64, scratch_operands = 0 : i64, tpu.core_type = #tpu.core_type<tc>, window_params = [{transform_indices = @transform_0, window_bounds = array<i64: 16, 64>}, {transform_indices = @transform_1, window_bounds = array<i64: 64, 32>}, {transform_indices = @transform_2, window_bounds = array<i64: 1, 32>}, {transform_indices = @transform_3, window_bounds = array<i64: 16, 32>}, {transform_indices = @transform_4, window_bounds = array<i64: 16, 32>}]} {
    %c0 = arith.constant 0 : index
    %c0_0 = arith.constant 0 : index
    %0 = vector.load %arg3[%c0, %c0_0] : memref<16x64xf32, #tpu.memory_space<vmem>>, vector<16x64xf32>
    %c0_1 = arith.constant 0 : index
    %c0_2 = arith.constant 0 : index
    %1 = vector.load %arg4[%c0_1, %c0_2] : memref<64x32xf32, #tpu.memory_space<vmem>>, vector<64x32xf32>
    %cst = arith.constant dense<0.000000e+00> : vector<16x32xf32>
    %2 = tpu.matmul %0, %1, %cst {dimension_numbers = #tpu.dot_dimension_numbers<[1], [0], [0], [1], [0, 0, 1, 1], [], []>} : vector<16x64xf32>, vector<64x32xf32>, vector<16x32xf32> -> vector<16x32xf32>
    %c0_3 = arith.constant 0 : index
    %c0_4 = arith.constant 0 : index
    %3 = vector.load %arg5[%c0_3, %c0_4] : memref<1x32xf32, #tpu.memory_space<vmem>>, vector<1x32xf32>
    %4 = vector.broadcast %3 : vector<1x32xf32> to vector<16x32xf32>
    %5 = arith.addf %2, %4 : vector<16x32xf32>
    %c0_5 = arith.constant 0 : index
    %c0_6 = arith.constant 0 : index
    %6 = vector.load %arg6[%c0_5, %c0_6] : memref<16x32xf32, #tpu.memory_space<vmem>>, vector<16x32xf32>
    %7 = arith.addf %5, %6 : vector<16x32xf32>
    %c0_7 = arith.constant 0 : index
    %c0_8 = arith.constant 0 : index
    %8 = vector.load %arg7[%c0_7, %c0_8] : memref<16x32xf32, #tpu.memory_space<vmem>>, vector<16x32xf32>
    tpu.vector_store %arg7[%c0_7, %c0_8], %7 {strides = array<i32>} : memref<16x32xf32, #tpu.memory_space<vmem>>, vector<16x32xf32>,
    return
  }
  func.func @transform_0(%arg0: i32, %arg1: i32, %arg2: i32) -> (i32, i32) {
    %c0_i32 = arith.constant 0 : i32
    return %arg0, %arg2 : i32, i32
  }
  func.func @transform_1(%arg0: i32, %arg1: i32, %arg2: i32) -> (i32, i32) {
    %c0_i32 = arith.constant 0 : i32
    return %arg2, %arg1 : i32, i32
  }
  func.func @transform_2(%arg0: i32, %arg1: i32, %arg2: i32) -> (i32, i32) {
    %c0_i32 = arith.constant 0 : i32
    %c0_i32_0 = arith.constant 0 : i32
    return %c0_i32, %arg1 : i32, i32
  }
  func.func @transform_3(%arg0: i32, %arg1: i32, %arg2: i32) -> (i32, i32) {
    %c0_i32 = arith.constant 0 : i32
    return %arg0, %arg1 : i32, i32
  }
  func.func @transform_4(%arg0: i32, %arg1: i32, %arg2: i32) -> (i32, i32) {
    %c0_i32 = arith.constant 0 : i32
    return %arg0, %arg1 : i32, i32
  }
}

module attributes {stable_mosaic.version = 11 : i64} {
  func.func @_ln_kernel(%arg0: i32, %arg1: memref<16x32xf32, #tpu.memory_space<vmem>>, %arg2: memref<1x32xf32, #tpu.memory_space<vmem>>, %arg3: memref<1x32xf32, #tpu.memory_space<vmem>>, %arg4: memref<16x32xf32, #tpu.memory_space<vmem>>) attributes {dimension_semantics = [#tpu.dimension_semantics<parallel>], iteration_bounds = array<i64: 1>, scalar_prefetch = 0 : i64, scratch_operands = 0 : i64, tpu.core_type = #tpu.core_type<tc>, window_params = [{transform_indices = @transform_0, window_bounds = array<i64: 16, 32>}, {pipeline_mode = #tpu.pipeline_mode<synchronous>, transform_indices = @transform_1, window_bounds = array<i64: 1, 32>}, {pipeline_mode = #tpu.pipeline_mode<synchronous>, transform_indices = @transform_2, window_bounds = array<i64: 1, 32>}, {transform_indices = @transform_3, window_bounds = array<i64: 16, 32>}]} {
    %c0 = arith.constant 0 : index
    %c0_0 = arith.constant 0 : index
    %0 = vector.load %arg1[%c0, %c0_0] : memref<16x32xf32, #tpu.memory_space<vmem>>, vector<16x32xf32>
    %cst = arith.constant dense<0.000000e+00> : vector<16xf32>
    %1 = vector.multi_reduction <add>, %0, %cst [1] : vector<16x32xf32> to vector<16xf32>
    %2 = vector.shape_cast %1 : vector<16xf32> to vector<16x1xf32>
    %cst_1 = arith.constant 3.200000e+01 : f32
    %3 = vector.broadcast %cst_1 : f32 to vector<16x1xf32>
    %4 = arith.divf %2, %3 : vector<16x1xf32>
    %5 = vector.broadcast %4 : vector<16x1xf32> to vector<16x32xf32>
    %6 = arith.subf %0, %5 : vector<16x32xf32>
    %7 = arith.mulf %6, %6 : vector<16x32xf32>
    %cst_2 = arith.constant dense<0.000000e+00> : vector<16xf32>
    %8 = vector.multi_reduction <add>, %7, %cst_2 [1] : vector<16x32xf32> to vector<16xf32>
    %9 = vector.shape_cast %8 : vector<16xf32> to vector<16x1xf32>
    %cst_3 = arith.constant 0.0322580636 : f32
    %10 = vector.broadcast %cst_3 : f32 to vector<16x1xf32>
    %11 = arith.mulf %9, %10 : vector<16x1xf32>
    %12 = math.sqrt %11 : vector<16x1xf32>
    %cst_4 = arith.constant 9.99999997E-7 : f32
    %13 = vector.broadcast %cst_4 : f32 to vector<16x1xf32>
    %14 = arith.addf %12, %13 : vector<16x1xf32>
    %15 = tpu.reciprocal %14 {approx = true} : vector<16x1xf32> -> vector<16x1xf32>
    %c0_5 = arith.constant 0 : index
    %c0_6 = arith.constant 0 : index
    %16 = vector.load %arg2[%c0_5, %c0_6] : memref<1x32xf32, #tpu.memory_space<vmem>>, vector<1x32xf32>
    %17 = vector.broadcast %16 : vector<1x32xf32> to vector<16x32xf32>
    %18 = arith.mulf %17, %6 : vector<16x32xf32>
    %19 = vector.broadcast %15 : vector<16x1xf32> to vector<16x32xf32>
    %20 = arith.mulf %18, %19 : vector<16x32xf32>
    %c0_7 = arith.constant 0 : index
    %c0_8 = arith.constant 0 : index
    %21 = vector.load %arg3[%c0_7, %c0_8] : memref<1x32xf32, #tpu.memory_space<vmem>>, vector<1x32xf32>
    %22 = vector.broadcast %21 : vector<1x32xf32> to vector<16x32xf32>
    %23 = arith.addf %20, %22 : vector<16x32xf32>
    %c0_9 = arith.constant 0 : index
    %c0_10 = arith.constant 0 : index
    %24 = vector.load %arg4[%c0_9, %c0_10] : memref<16x32xf32, #tpu.memory_space<vmem>>, vector<16x32xf32>
    tpu.vector_store %arg4[%c0_9, %c0_10], %23 {strides = array<i32>} : memref<16x32xf32, #tpu.memory_space<vmem>>, vector<16x32xf32>,
    return
  }
  func.func @transform_0(%arg0: i32) -> (i32, i32) {
    %c0_i32 = arith.constant 0 : i32
    %c0_i32_0 = arith.constant 0 : i32
    return %arg0, %c0_i32 : i32, i32
  }
  func.func @transform_1(%arg0: i32) -> (i32, i32) {
    %c0_i32 = arith.constant 0 : i32
    %c0_i32_0 = arith.constant 0 : i32
    %c0_i32_1 = arith.constant 0 : i32
    return %c0_i32, %c0_i32_0 : i32, i32
  }
  func.func @transform_2(%arg0: i32) -> (i32, i32) {
    %c0_i32 = arith.constant 0 : i32
    %c0_i32_0 = arith.constant 0 : i32
    %c0_i32_1 = arith.constant 0 : i32
    return %c0_i32, %c0_i32_0 : i32, i32
  }
  func.func @transform_3(%arg0: i32) -> (i32, i32) {
    %c0_i32 = arith.constant 0 : i32
    %c0_i32_0 = arith.constant 0 : i32
    return %arg0, %c0_i32 : i32, i32
  }
}

module attributes {stable_mosaic.version = 11 : i64} {
  func.func @_attention_kernel(%arg0: i32, %arg1: i32, %arg2: memref<1x8x4x8xf32, #tpu.memory_space<vmem>>, %arg3: memref<1x8x4x8xf32, #tpu.memory_space<vmem>>, %arg4: memref<1x8x4x8xf32, #tpu.memory_space<vmem>>, %arg5: memref<1x1x8xi32, #tpu.memory_space<vmem>>, %arg6: memref<1x8x4x8xf32, #tpu.memory_space<vmem>>, %arg7: memref<1x8x8xf32, #tpu.memory_space<vmem>>) attributes {dimension_semantics = [#tpu.dimension_semantics<parallel>, #tpu.dimension_semantics<parallel>], iteration_bounds = array<i64: 2, 1>, scalar_prefetch = 0 : i64, scratch_operands = 0 : i64, tpu.core_type = #tpu.core_type<tc>, window_params = [{transform_indices = @transform_0, window_bounds = array<i64: 1, 8, 4, 8>}, {transform_indices = @transform_1, window_bounds = array<i64: 1, 8, 4, 8>}, {transform_indices = @transform_2, window_bounds = array<i64: 1, 8, 4, 8>}, {transform_indices = @transform_3, window_bounds = array<i64: 1, 1, 8>}, {transform_indices = @transform_4, window_bounds = array<i64: 1, 8, 4, 8>}, {transform_indices = @transform_5, window_bounds = array<i64: 1, 8, 8>}]} {
    %c0 = arith.constant 0 : index
    %c0_0 = arith.constant 0 : index
    %c0_1 = arith.constant 0 : index
    %c0_2 = arith.constant 0 : index
    %0 = vector.load %arg2[%c0, %c0_0, %c0_1, %c0_2] : memref<1x8x4x8xf32, #tpu.memory_space<vmem>>, vector<1x8x4x8xf32>
    %1 = vector.shape_cast %0 : vector<1x8x4x8xf32> to vector<8x4x8xf32>
    %cst = arith.constant 0.353553385 : f32
    %2 = vector.broadcast %cst : f32 to vector<8x4x8xf32>
    %3 = arith.mulf %1, %2 : vector<8x4x8xf32>
    %c0_3 = arith.constant 0 : index
    %c0_4 = arith.constant 0 : index
    %c0_5 = arith.constant 0 : index
    %c0_6 = arith.constant 0 : index
    %4 = vector.load %arg3[%c0_3, %c0_4, %c0_5, %c0_6] : memref<1x8x4x8xf32, #tpu.memory_space<vmem>>, vector<1x8x4x8xf32>
    %5 = vector.shape_cast %4 : vector<1x8x4x8xf32> to vector<8x4x8xf32>
    %c0_7 = arith.constant 0 : index
    %c0_8 = arith.constant 0 : index
    %c0_9 = arith.constant 0 : index
    %c0_10 = arith.constant 0 : index
    %6 = vector.load %arg4[%c0_7, %c0_8, %c0_9, %c0_10] : memref<1x8x4x8xf32, #tpu.memory_space<vmem>>, vector<1x8x4x8xf32>
    %7 = vector.shape_cast %6 : vector<1x8x4x8xf32> to vector<8x4x8xf32>
    "tpu.trace_start"() <{level = 10 : i32, message = "qhd,khd->hqk"}> : () -> ()
    %cst_11 = arith.constant dense<0.000000e+00> : vector<4x8x8xf32>
    %8 = tpu.matmul %3, %5, %cst_11 {dimension_numbers = #tpu.dot_dimension_numbers<[2], [2], [0], [0], [0, 1, 0, 0, 1, 0], [1], [1]>} : vector<8x4x8xf32>, vector<8x4x8xf32>, vector<4x8x8xf32> -> vector<4x8x8xf32>
    "tpu.trace_stop"() : () -> ()
    %c0_12 = arith.constant 0 : index
    %c0_13 = arith.constant 0 : index
    %c0_14 = arith.constant 0 : index
    %9 = vector.load %arg5[%c0_12, %c0_13, %c0_14] : memref<1x1x8xi32, #tpu.memory_space<vmem>>, vector<1x1x8xi32>
    %10 = vector.shape_cast %9 : vector<1x1x8xi32> to vector<1x8xi32>
    %c0_i32 = arith.constant 0 : i32
    %11 = vector.broadcast %c0_i32 : i32 to vector<1x8xi32>
    %12 = arith.cmpi sgt, %10, %11 : vector<1x8xi32>
    %13 = vector.shape_cast %12 : vector<1x8xi1> to vector<1x1x8xi1>
    %cst_15 = arith.constant -9.99999984E+17 : f32
    %14 = vector.shape_cast %13 : vector<1x1x8xi1> to vector<1x1x8xi1>
    %15 = vector.broadcast %14 : vector<1x1x8xi1> to vector<4x8x8xi1>
    %16 = vector.broadcast %cst_15 : f32 to vector<4x8x8xf32>
    %17 = arith.select %15, %16, %8 : vector<4x8x8xi1>, vector<4x8x8xf32>
    %cst_16 = arith.constant dense<0.000000e+00> : vector<8x8xf32>
    %18 = vector.multi_reduction <add>, %17, %cst_16 [0] : vector<4x8x8xf32> to vector<8x8xf32>
    %cst_17 = arith.constant 2.500000e-01 : f32
    %19 = vector.broadcast %cst_17 : f32 to vector<8x8xf32>
    %20 = arith.mulf %18, %19 : vector<8x8xf32>
    %c0_18 = arith.constant 0 : index
    %c0_19 = arith.constant 0 : index
    %c0_20 = arith.constant 0 : index
    %21 = vector.load %arg7[%c0_18, %c0_19, %c0_20] : memref<1x8x8xf32, #tpu.memory_space<vmem>>, vector<1x8x8xf32>
    %22 = vector.shape_cast %21 : vector<1x8x8xf32> to vector<8x8xf32>
    %23 = vector.shape_cast %20 : vector<8x8xf32> to vector<1x8x8xf32>
    tpu.vector_store %arg7[%c0_18, %c0_19, %c0_20], %23 {strides = array<i32>} : memref<1x8x8xf32, #tpu.memory_space<vmem>>, vector<1x8x8xf32>,
    %cst_21 = arith.constant dense<0xFF800000> : vector<4x8xf32>
    %24 = vector.multi_reduction <maximumf>, %17, %cst_21 [2] : vector<4x8x8xf32> to vector<4x8xf32>
    %25 = vector.shape_cast %24 : vector<4x8xf32> to vector<4x8x1xf32>
    %26 = vector.broadcast %25 : vector<4x8x1xf32> to vector<4x8x8xf32>
    %27 = arith.subf %17, %26 : vector<4x8x8xf32>
    %28 = math.exp %27 : vector<4x8x8xf32>
    %cst_22 = arith.constant dense<0.000000e+00> : vector<4x8xf32>
    %29 = vector.multi_reduction <add>, %28, %cst_22 [2] : vector<4x8x8xf32> to vector<4x8xf32>
    %30 = vector.shape_cast %29 : vector<4x8xf32> to vector<4x8x1xf32>
    %31 = tpu.reciprocal %30 {approx = true} : vector<4x8x1xf32> -> vector<4x8x1xf32>
    %32 = vector.broadcast %31 : vector<4x8x1xf32> to vector<4x8x8xf32>
    %33 = arith.mulf %28, %32 : vector<4x8x8xf32>
    "tpu.trace_start"() <{level = 10 : i32, message = "hqk,khd->qhd"}> : () -> ()
    %cst_23 = arith.constant dense<0.000000e+00> : vector<4x8x8xf32>
    %34 = tpu.matmul %7, %33, %cst_23 {dimension_numbers = #tpu.dot_dimension_numbers<[0], [2], [2], [1], [0, 1, 0, 2, 1, 1], [1], [0]>} : vector<8x4x8xf32>, vector<4x8x8xf32>, vector<4x8x8xf32> -> vector<4x8x8xf32>
    %35 = tpu.transpose %34, [2, 0, 1] : vector<4x8x8xf32> -> vector<8x4x8xf32>
    "tpu.trace_stop"() : () -> ()
    %c0_24 = arith.constant 0 : index
    %c0_25 = arith.constant 0 : index
    %c0_26 = arith.constant 0 : index
    %c0_27 = arith.constant 0 : index
    %36 = vector.load %arg6[%c0_24, %c0_25, %c0_26, %c0_27] : memref<1x8x4x8xf32, #tpu.memory_space<vmem>>, vector<1x8x4x8xf32>
    %37 = vector.shape_cast %36 : vector<1x8x4x8xf32> to vector<8x4x8xf32>
    %38 = vector.shape_cast %35 : vector<8x4x8xf32> to vector<1x8x4x8xf32>
    tpu.vector_store %arg6[%c0_24, %c0_25, %c0_26, %c0_27], %38 {strides = array<i32>} : memref<1x8x4x8xf32, #tpu.memory_space<vmem>>, vector<1x8x4x8xf32>,
    return
  }
  func.func @transform_0(%arg0: i32, %arg1: i32) -> (i32, i32, i32, i32) {
    %c0_i32 = arith.constant 0 : i32
    %c0_i32_0 = arith.constant 0 : i32
    %c0_i32_1 = arith.constant 0 : i32
    return %arg0, %arg1, %c0_i32, %c0_i32_0 : i32, i32, i32, i32
  }
  func.func @transform_1(%arg0: i32, %arg1: i32) -> (i32, i32, i32, i32) {
    %c0_i32 = arith.constant 0 : i32
    %c0_i32_0 = arith.constant 0 : i32
    %c0_i32_1 = arith.constant 0 : i32
    %c0_i32_2 = arith.constant 0 : i32
    return %arg0, %c0_i32, %c0_i32_0, %c0_i32_1 : i32, i32, i32, i32
  }
  func.func @transform_2(%arg0: i32, %arg1: i32) -> (i32, i32, i32, i32) {
    %c0_i32 = arith.constant 0 : i32
    %c0_i32_0 = arith.constant 0 : i32
    %c0_i32_1 = arith.constant 0 : i32
    %c0_i32_2 = arith.constant 0 : i32
    return %arg0, %c0_i32, %c0_i32_0, %c0_i32_1 : i32, i32, i32, i32
  }
  func.func @transform_3(%arg0: i32, %arg1: i32) -> (i32, i32, i32) {
    %c0_i32 = arith.constant 0 : i32
    %c0_i32_0 = arith.constant 0 : i32
    %c0_i32_1 = arith.constant 0 : i32
    return %arg0, %c0_i32, %c0_i32_0 : i32, i32, i32
  }
  func.func @transform_4(%arg0: i32, %arg1: i32) -> (i32, i32, i32, i32) {
    %c0_i32 = arith.constant 0 : i32
    %c0_i32_0 = arith.constant 0 : i32
    %c0_i32_1 = arith.constant 0 : i32
    return %arg0, %arg1, %c0_i32, %c0_i32_0 : i32, i32, i32, i32
  }
  func.func @transform_5(%arg0: i32, %arg1: i32) -> (i32, i32, i32) {
    %c0_i32 = arith.constant 0 : i32
    %c0_i32_0 = arith.constant 0 : i32
    return %arg0, %arg1, %c0_i32 : i32, i32, i32
  }
}

</mosaic_0001>

<bundles_post_ra>
// kernel: decoder_forward.20
= control target key start
LH: loop header
LB: loop body
LE: loop exit
PB: predicated region body
PF: predicated region fallthrough
CT: control target
= control target key end

     0   :  { %vm15_vm0 = vcmask 130048   ;;  %vm97_vm1 = vcmask 261120   ;;  %s154_s1 = inlined_call_operand.vmem [shape: f32[16,32], index: 1, kind: input, shape index: {}]   ;;  %s155_s0 = inlined_call_operand.vmem [shape: f32[16,16], index: 0, kind: input, shape index: {}]   ;;  %s156_s2 = inlined_call_operand.vmem [shape: f32[16,32], index: 2, kind: output, shape index: {}]  }
   0x1   :  { %v13_v0 = vld [vmem:[%s154_s1] sm:$0xff]  ;;  %v14_v1 = vld [vmem:[%s154_s1 + $0x8] sm:$0xff] }
   0x2   :  { %v11_v2 = vld [vmem:[%s155_s0] sm:$0xff]  ;;  %v117_v3 = vpack.c.bf16 %v14_v1, %v13_v0  ;;  %v12_v4 = vld [vmem:[%s155_s0 + $0x8] sm:$0xff] }
   0x3   :  { %114 = vmatprep.mubr.msk.f32.mxu0 %vm15_vm0, %v11_v2 }
   0x4   :  { %118 = vmatprep.subr.bf16.mxu0 %v117_v3 }
   0x5   :  { %120 = vmatpush3.bf16.msra.mxu0 %v117_v3 }
   0x8   :  { %115 = vmatmul.mubr.msk.f32.vlgmr.msra.gmra.mrb[0].mxu0 %vm15_vm0, %v12_v4 }
  0xdb   :  { %v116_v5 = vpop.f32.mrb[0].mxu0 }
  0xdc   :  { %99 = vst.msk [vmem:[%s156_s2 + $0x8] sm:$0xff] %vm97_vm1, %v116_v5  ;;  %v88_v6 = vpop.f32.mrb[1].mxu0 }
  0xdd   :  { %98 = vst.msk [vmem:[%s156_s2] sm:$0xff] %vm97_vm1, %v88_v6 }

// kernel: decoder_forward.21
= control target key start
LH: loop header
LB: loop body
LE: loop exit
PB: predicated region body
PF: predicated region fallthrough
CT: control target
= control target key end

     0   :  { %vm19_vm0 = vcmask 261120   ;;  %vm164_vm5 = vcmask 785408   ;;  %s269_s0 = inlined_call_operand.vmem [shape: f32[16,32], index: 0, kind: input, shape index: {}]   ;;  %s270_s3 = inlined_call_operand.vmem [shape: f32[32,96], index: 3, kind: input, shape index: {}]   ;;  %s271_s1 = inlined_call_operand.vmem [shape: f32[1,32], index: 1, kind: input, shape index: {}]   ;;  %s272_s2 = inlined_call_operand.vmem [shape: f32[1,32], index: 2, kind: input, shape index: {}]   ;;  %s273_s4 = inlined_call_operand.vmem [shape: f32[16,96], index: 4, kind: output, shape index: {}]  }
   0x1   :  { %v17_v0 = vld [vmem:[%s269_s0] sm:$0xff]  ;;  %v18_v1 = vld [vmem:[%s269_s0 + $0x8] sm:$0xff]  ;;  %v81_v16 = vld [vmem:[%s270_s3 + $0x10] sm:$0xff] }
   0x2   :  { %v20_v2 = vsel %vm19_vm0, %v17_v0, 0.0  ;;  %v23_v3 = vsel %vm19_vm0, %v18_v1, 0.0  ;;  %v79_v14 = vld [vmem:[%s270_s3] sm:$0xff]  ;;  %v80_v15 = vld [vmem:[%s270_s3 + $0x8] sm:$0xff]  ;;  %v82_v18 = vld [vmem:[%s270_s3 + $0x18] sm:$0xff] }
   0x3   :  { %21 = vadd.xlane.f32.xlu0 %v20_v2  ;;  %v192_v17 = vpack.c.bf16 %v80_v15, %v79_v14  ;;  %v196_v19 = vpack.c.bf16 %v82_v18, %v81_v16  ;;  %v171_v36 = vld [vmem:[%s271_s1] ss:$0 sm:$0xff] }
   0x4   :  { %v172_v39 = vld [vmem:[%s272_s2] ss:$0 sm:$0xff] }
   0x5   :  { %193 = vmatprep.subr.bf16.mxu0 %v192_v17 }
   0x6   :  { %195 = vmatpush3.bf16.msra.mxu0 %v192_v17 }
   0x7   :  { %24 = vadd.xlane.f32.xlu0 %v23_v3  ;;  %197 = vmatprep.subr.bf16.mxu0 %v196_v19 }
   0xa   :  { %199 = vmatpush3.bf16.msra.mxu0 %v196_v19 }
  0x90   :  { %v22_v4 = vpop.xlane.xlu0 %21 }
  0x91   :  { %v27_v5 = vmul.f32 0.03125, %v22_v4 }
  0x93   :  { %v29_v6 = vsub.f32 %v17_v0, %v27_v5 }
  0x94   :  { %v25_v7 = vpop.xlane.xlu0 %24 }
  0x95   :  { %v28_v8 = vmul.f32 0.03125, %v25_v7  ;;  %v31_v9 = vmul.f32 %v29_v6, %v29_v6  ;;  %v66_v37 = vmul.f32 %v171_v36, %v29_v6 }
  0x97   :  { %v30_v10 = vsub.f32 %v18_v1, %v28_v8  ;;  %v33_v11 = vsel %vm19_vm0, %v31_v9, 0.0 }
  0x98   :  { %34 = vadd.xlane.f32.xlu1 %v33_v11 }
  0x99   :  { %v32_v12 = vmul.f32 %v30_v10, %v30_v10  ;;  %v67_v41 = vmul.f32 %v171_v36, %v30_v10 }
  0x9b   :  { %v36_v13 = vsel %vm19_vm0, %v32_v12, 0.0 }
  0x9c   :  { %37 = vadd.xlane.f32.xlu1 %v36_v13 }
 0x125   :  { %v35_v20 = vpop.xlane.xlu1 %34 }
 0x126   :  { %v39_v21 = vmul.f32 0.032258064, %v35_v20 }
 0x128   :  { %200 = vrsqrt.f32 %v39_v21  ;;  %vm43_vm1 = vcmp.eq.f32.partialorder %v39_v21, inf  ;;  %v46_v26 = vand.u32 2147483648, %v39_v21  ;;  %vm45_vm2 = vcmp.eq.f32.partialorder %v39_v21, 0.0 }
 0x129   :  { %v38_v22 = vpop.xlane.xlu1 %37 }
 0x12a   :  { %v40_v23 = vmul.f32 0.032258064, %v38_v22 }
 0x12c   :  { %202 = vrsqrt.f32 %v40_v23  ;;  %vm50_vm3 = vcmp.eq.f32.partialorder %v40_v23, inf  ;;  %v53_v32 = vand.u32 2147483648, %v40_v23  ;;  %vm52_vm4 = vcmp.eq.f32.partialorder %v40_v23, 0.0 }
 0x132   :  { %v201_v24 = vpop.eup %200 }
 0x133   :  { %v42_v25 = vmul.f32 %v201_v24, %v39_v21 }
 0x135   :  { %v44_v27 = vsel %vm43_vm1, %v39_v21, %v42_v25 }
 0x136   :  { %v203_v28 = vpop.eup %202  ;;  %v47_v29 = vsel %vm45_vm2, %v46_v26, %v44_v27 }
 0x137   :  { %v49_v30 = vmul.f32 %v203_v28, %v40_v23  ;;  %v55_v31 = vadd.f32 1e-06, %v47_v29 }
 0x139   :  { %v51_v33 = vsel %vm50_vm3, %v40_v23, %v49_v30  ;;  %204 = vrcp.f32 %v55_v31 }
 0x13a   :  { %v54_v34 = vsel %vm52_vm4, %v53_v32, %v51_v33 }
 0x13b   :  { %v56_v35 = vadd.f32 1e-06, %v54_v34 }
 0x13d   :  { %206 = vrcp.f32 %v56_v35 }
 0x143   :  { %v205_v38 = vpop.eup %204 }
 0x144   :  { %v68_v40 = vmul.f32 %v205_v38, %v66_v37 }
 0x146   :  { %v77_v42 = vadd.f32 %v172_v39, %v68_v40 }
 0x147   :  { %v207_v43 = vpop.eup %206 }
 0x148   :  { %v69_v44 = vmul.f32 %v207_v43, %v67_v41  ;;  %189 = vmatprep.mubr.msk.f32.mxu0 %vm19_vm0, %v77_v42 }
 0x14a   :  { %v78_v45 = vadd.f32 %v172_v39, %v69_v44 }
 0x14c   :  { %190 = vmatmul.mubr.msk.f32.vlgmr.msra.gmra.mrb[0].mxu0 %vm19_vm0, %v78_v45 }
 0x21f   :  { %v191_v46 = vpop.f32.mrb[0].mxu0 }
 0x220   :  { %166 = vst.msk [vmem:[%s273_s4 + $0x8] sm:$0xff] %vm164_vm5, %v191_v46  ;;  %v155_v47 = vpop.f32.mrb[1].mxu0 }
 0x221   :  { %165 = vst.msk [vmem:[%s273_s4] sm:$0xff] %vm164_vm5, %v155_v47 }

// kernel: decoder_forward.23
= control target key start
LH: loop header
LB: loop body
LE: loop exit
PB: predicated region body
PF: predicated region fallthrough
CT: control target
= control target key end

     0   :  { %vm22_vm0 = vcmask 261120   ;;  %s191_s1 = inlined_call_operand.vmem [shape: f32[32,32], index: 1, kind: input, shape index: {}]   ;;  %s192_s0 = inlined_call_operand.vmem [shape: f32[16,32], index: 0, kind: input, shape index: {}]   ;;  %s193_s2 = inlined_call_operand.vmem [shape: f32[16,32], index: 2, kind: input, shape index: {}]   ;;  %s194_s3 = inlined_call_operand.vmem [shape: f32[16,32], index: 3, kind: output, shape index: {}]  }
   0x1   :  { %v16_v0 = vld [vmem:[%s191_s1] sm:$0xff]  ;;  %v17_v1 = vld [vmem:[%s191_s1 + $0x8] sm:$0xff]  ;;  %v18_v2 = vld [vmem:[%s191_s1 + $0x10] sm:$0xff] }
   0x2   :  { %v129_v3 = vpack.c.bf16 %v17_v1, %v16_v0  ;;  %v19_v4 = vld [vmem:[%s191_s1 + $0x18] sm:$0xff]  ;;  %v14_v5 = vld [vmem:[%s192_s0] sm:$0xff]  ;;  %v15_v7 = vld [vmem:[%s192_s0 + $0x8] sm:$0xff] }
   0x3   :  { %v133_v6 = vpack.c.bf16 %v19_v4, %v18_v2  ;;  %126 = vmatprep.mubr.msk.f32.mxu0 %vm22_vm0, %v14_v5  ;;  %v21_v8 = vld [vmem:[%s193_s2 + $0x8] sm:$0xff]  ;;  %v20_v9 = vld [vmem:[%s193_s2] sm:$0xff] }
   0x4   :  { %130 = vmatprep.subr.bf16.mxu0 %v129_v3 }
   0x5   :  { %132 = vmatpush3.bf16.msra.mxu0 %v129_v3 }
   0x6   :  { %134 = vmatprep.subr.bf16.mxu0 %v133_v6 }
   0x9   :  { %136 = vmatpush3.bf16.msra.mxu0 %v133_v6 }
   0xc   :  { %127 = vmatmul.mubr.msk.f32.vlgmr.msra.gmra.mrb[0].mxu0 %vm22_vm0, %v15_v7 }
  0xdf   :  { %v128_v10 = vpop.f32.mrb[0].mxu0 }
  0xe0   :  { %v101_v11 = vadd.f32 %v128_v10, %v21_v8  ;;  %v95_v12 = vpop.f32.mrb[1].mxu0 }
  0xe1   :  { %v96_v13 = vadd.f32 %v95_v12, %v20_v9 }
  0xe2   :  { %105 = vst.msk [vmem:[%s194_s3 + $0x8] sm:$0xff] %vm22_vm0, %v101_v11 }
  0xe3   :  { %104 = vst.msk [vmem:[%s194_s3] sm:$0xff] %vm22_vm0, %v96_v13 }

// kernel: decoder_forward.25
= control target key start
LH: loop header
LB: loop body
LE: loop exit
PB: predicated region body
PF: predicated region fallthrough
CT: control target
= control target key end

     0   :  { %vm17_vm0 = vcmask 261120   ;;  %vm99_vm1 = vcmask 523264   ;;  %s172_s1 = inlined_call_operand.vmem [shape: f32[32,64], index: 1, kind: input, shape index: {}]   ;;  %s173_s0 = inlined_call_operand.vmem [shape: f32[16,32], index: 0, kind: input, shape index: {}]   ;;  %s174_s2 = inlined_call_operand.vmem [shape: f32[16,64], index: 2, kind: output, shape index: {}]  }
   0x1   :  { %v13_v0 = vld [vmem:[%s172_s1] sm:$0xff]  ;;  %v14_v1 = vld [vmem:[%s172_s1 + $0x8] sm:$0xff]  ;;  %v15_v2 = vld [vmem:[%s172_s1 + $0x10] sm:$0xff] }
   0x2   :  { %v125_v3 = vpack.c.bf16 %v14_v1, %v13_v0  ;;  %v16_v4 = vld [vmem:[%s172_s1 + $0x18] sm:$0xff]  ;;  %v11_v5 = vld [vmem:[%s173_s0] sm:$0xff]  ;;  %v12_v7 = vld [vmem:[%s173_s0 + $0x8] sm:$0xff] }
   0x3   :  { %v129_v6 = vpack.c.bf16 %v16_v4, %v15_v2  ;;  %122 = vmatprep.mubr.msk.f32.mxu0 %vm17_vm0, %v11_v5 }
   0x4   :  { %126 = vmatprep.subr.bf16.mxu0 %v125_v3 }
   0x5   :  { %128 = vmatpush3.bf16.msra.mxu0 %v125_v3 }
   0x6   :  { %130 = vmatprep.subr.bf16.mxu0 %v129_v6 }
   0x9   :  { %132 = vmatpush3.bf16.msra.mxu0 %v129_v6 }
   0xc   :  { %123 = vmatmul.mubr.msk.f32.vlgmr.msra.gmra.mrb[0].mxu0 %vm17_vm0, %v12_v7 }
  0xdf   :  { %v124_v8 = vpop.f32.mrb[0].mxu0 }
  0xe0   :  { %101 = vst.msk [vmem:[%s174_s2 + $0x8] sm:$0xff] %vm99_vm1, %v124_v8  ;;  %v90_v9 = vpop.f32.mrb[1].mxu0 }
  0xe1   :  { %100 = vst.msk [vmem:[%s174_s2] sm:$0xff] %vm99_vm1, %v90_v9 }

// kernel: decoder_forward.24
= control target key start
LH: loop header
LB: loop body
LE: loop exit
PB: predicated region body
PF: predicated region fallthrough
CT: control target
= control target key end

     0   :  { %vm19_vm0 = vcmask 261120   ;;  %s270_s0 = inlined_call_operand.vmem [shape: f32[16,32], index: 0, kind: input, shape index: {}]   ;;  %s271_s3 = inlined_call_operand.vmem [shape: f32[32,32], index: 3, kind: input, shape index: {}]   ;;  %s272_s1 = inlined_call_operand.vmem [shape: f32[1,32], index: 1, kind: input, shape index: {}]   ;;  %s273_s2 = inlined_call_operand.vmem [shape: f32[1,32], index: 2, kind: input, shape index: {}]   ;;  %s274_s4 = inlined_call_operand.vmem [shape: f32[16,32], index: 4, kind: output, shape index: {}]  }
   0x1   :  { %v17_v0 = vld [vmem:[%s270_s0] sm:$0xff]  ;;  %v18_v1 = vld [vmem:[%s270_s0 + $0x8] sm:$0xff]  ;;  %v81_v16 = vld [vmem:[%s271_s3 + $0x10] sm:$0xff] }
   0x2   :  { %v20_v2 = vsel %vm19_vm0, %v17_v0, 0.0  ;;  %v23_v3 = vsel %vm19_vm0, %v18_v1, 0.0  ;;  %v79_v14 = vld [vmem:[%s271_s3] sm:$0xff]  ;;  %v80_v15 = vld [vmem:[%s271_s3 + $0x8] sm:$0xff]  ;;  %v82_v18 = vld [vmem:[%s271_s3 + $0x18] sm:$0xff] }
   0x3   :  { %21 = vadd.xlane.f32.xlu0 %v20_v2  ;;  %v191_v17 = vpack.c.bf16 %v80_v15, %v79_v14  ;;  %v195_v19 = vpack.c.bf16 %v82_v18, %v81_v16  ;;  %v170_v36 = vld [vmem:[%s272_s1] ss:$0 sm:$0xff] }
   0x4   :  { %v171_v39 = vld [vmem:[%s273_s2] ss:$0 sm:$0xff] }
   0x5   :  { %192 = vmatprep.subr.bf16.mxu0 %v191_v17 }
   0x6   :  { %194 = vmatpush3.bf16.msra.mxu0 %v191_v17 }
   0x7   :  { %24 = vadd.xlane.f32.xlu0 %v23_v3  ;;  %196 = vmatprep.subr.bf16.mxu0 %v195_v19 }
   0xa   :  { %198 = vmatpush3.bf16.msra.mxu0 %v195_v19 }
  0x90   :  { %v22_v4 = vpop.xlane.xlu0 %21 }
  0x91   :  { %v27_v5 = vmul.f32 0.03125, %v22_v4 }
  0x93   :  { %v29_v6 = vsub.f32 %v17_v0, %v27_v5 }
  0x94   :  { %v25_v7 = vpop.xlane.xlu0 %24 }
  0x95   :  { %v28_v8 = vmul.f32 0.03125, %v25_v7  ;;  %v31_v9 = vmul.f32 %v29_v6, %v29_v6  ;;  %v66_v37 = vmul.f32 %v170_v36, %v29_v6 }
  0x97   :  { %v30_v10 = vsub.f32 %v18_v1, %v28_v8  ;;  %v33_v11 = vsel %vm19_vm0, %v31_v9, 0.0 }
  0x98   :  { %34 = vadd.xlane.f32.xlu1 %v33_v11 }
  0x99   :  { %v32_v12 = vmul.f32 %v30_v10, %v30_v10  ;;  %v67_v41 = vmul.f32 %v170_v36, %v30_v10 }
  0x9b   :  { %v36_v13 = vsel %vm19_vm0, %v32_v12, 0.0 }
  0x9c   :  { %37 = vadd.xlane.f32.xlu1 %v36_v13 }
 0x125   :  { %v35_v20 = vpop.xlane.xlu1 %34 }
 0x126   :  { %v39_v21 = vmul.f32 0.032258064, %v35_v20 }
 0x128   :  { %199 = vrsqrt.f32 %v39_v21  ;;  %vm43_vm1 = vcmp.eq.f32.partialorder %v39_v21, inf  ;;  %v46_v26 = vand.u32 2147483648, %v39_v21  ;;  %vm45_vm2 = vcmp.eq.f32.partialorder %v39_v21, 0.0 }
 0x129   :  { %v38_v22 = vpop.xlane.xlu1 %37 }
 0x12a   :  { %v40_v23 = vmul.f32 0.032258064, %v38_v22 }
 0x12c   :  { %201 = vrsqrt.f32 %v40_v23  ;;  %vm50_vm3 = vcmp.eq.f32.partialorder %v40_v23, inf  ;;  %v53_v32 = vand.u32 2147483648, %v40_v23  ;;  %vm52_vm4 = vcmp.eq.f32.partialorder %v40_v23, 0.0 }
 0x132   :  { %v200_v24 = vpop.eup %199 }
 0x133   :  { %v42_v25 = vmul.f32 %v200_v24, %v39_v21 }
 0x135   :  { %v44_v27 = vsel %vm43_vm1, %v39_v21, %v42_v25 }
 0x136   :  { %v202_v28 = vpop.eup %201  ;;  %v47_v29 = vsel %vm45_vm2, %v46_v26, %v44_v27 }
 0x137   :  { %v49_v30 = vmul.f32 %v202_v28, %v40_v23  ;;  %v55_v31 = vadd.f32 1e-06, %v47_v29 }
 0x139   :  { %v51_v33 = vsel %vm50_vm3, %v40_v23, %v49_v30  ;;  %203 = vrcp.f32 %v55_v31 }
 0x13a   :  { %v54_v34 = vsel %vm52_vm4, %v53_v32, %v51_v33 }
 0x13b   :  { %v56_v35 = vadd.f32 1e-06, %v54_v34 }
 0x13d   :  { %205 = vrcp.f32 %v56_v35 }
 0x143   :  { %v204_v38 = vpop.eup %203 }
 0x144   :  { %v68_v40 = vmul.f32 %v204_v38, %v66_v37 }
 0x146   :  { %v77_v42 = vadd.f32 %v171_v39, %v68_v40 }
 0x147   :  { %v206_v43 = vpop.eup %205 }
 0x148   :  { %v69_v44 = vmul.f32 %v206_v43, %v67_v41  ;;  %188 = vmatprep.mubr.msk.f32.mxu0 %vm19_vm0, %v77_v42 }
 0x14a   :  { %v78_v45 = vadd.f32 %v171_v39, %v69_v44 }
 0x14c   :  { %189 = vmatmul.mubr.msk.f32.vlgmr.msra.gmra.mrb[0].mxu0 %vm19_vm0, %v78_v45 }
 0x21f   :  { %v190_v46 = vpop.f32.mrb[0].mxu0 }
 0x220   :  { %165 = vst.msk [vmem:[%s274_s4 + $0x8] sm:$0xff] %vm19_vm0, %v190_v46  ;;  %v155_v47 = vpop.f32.mrb[1].mxu0 }
 0x221   :  { %164 = vst.msk [vmem:[%s274_s4] sm:$0xff] %vm19_vm0, %v155_v47 }

// kernel: decoder_forward.22
= control target key start
LH: loop header
LB: loop body
LE: loop exit
PB: predicated region body
PF: predicated region fallthrough
CT: control target
= control target key end

     0   :  { %s2998_s15 = smov 0   ;;  %s3000_s16 = smov 0   ;;  %s3205_s0 = inlined_call_operand.vmem [shape: f32[2,8,4,8], index: 0, kind: input, shape index: {}]   ;;  %s3206_s1 = inlined_call_operand.vmem [shape: f32[2,8,4,8], index: 1, kind: input, shape index: {}]   ;;  %s3207_s2 = inlined_call_operand.vmem [shape: f32[2,8,4,8], index: 2, kind: input, shape index: {}]   ;;  %s3208_s3 = inlined_call_operand.vmem [shape: s32[2,1,8], index: 3, kind: input, shape index: {}]   ;;  %s3209_s4 = inlined_call_operand.vmem [shape: f32[2,8,4,8], index: 4, kind: output, shape index: {}]  }
   0x1   :  { %s3002_s17 = smov 0  }
   0x2 LB: > { %s26_s18 = sadd.s32 1, %s2962_s16  ;;  %p2816_p0 = scmp.ge.s32.totalorder %s2966_s17, 1  ;;  %s2966_s17 = sphi %s3002_s17, %s14_s17   ;;  %s2962_s16 = sphi %s3000_s16, %s3211_s16   ;;  %s2958_s15 = sphi %s2998_s15, %s3210_s15  }
   0x3   : > { %p28_p1 = scmp.ge.s32.totalorder %s26_s18, 2  ;;  %p211_p2 = scmp.lt.s32.totalorder %s2966_s17, 3 }
   0x5   : > { %s3213_s18 = smov (%p28_p1, %s26_s18), 0  ;;  %p212_p3 = pnand %p2816_p0, %p211_p2 }
   0x6   : > { %p259_p4 = scmp.lt.s32.totalorder (!%p212_p3), %s2958_s15, 1  ;;  %v2968_v9 = vmov (!%p212_p3), 1983009808   ;;  %v327_v11 = vlaneseq (!%p212_p3)  ;;  %v2969_v17 = vmov (!%p212_p3), 1934713408   ;;  %vm2971_vm0 = vmmov (!%p212_p3), 0  }
   0x7   : > { %215 = sbr.rel (%p212_p3) target bundleno = 1249 (0x4e1), region = 36  ;;  %v325_v10 = vunpack.c.l.s4 (!%p212_p3), %v2968_v9  ;;  %v358_v18 = vunpack.c.l.s4 (!%p212_p3), %v2969_v17  ;;  %vm1107_vm1 = vcmask (!%p212_p3), 64512   ;;  %vm2683_vm6 = vcmask (!%p212_p3), 60416  }
   0x8   : > { %v3026_v14 = vshrl.u32 (!%p212_p3), %v327_v11, 7 }
   0x9   : > { %v326_v13 = vunpack.c.0.s8 (!%p212_p3), %v325_v10  ;;  %v359_v24 = vunpack.c.0.s8 (!%p212_p3), %v358_v18 }
   0xb   : > { %v3029_v20 = vsub.s32 (!%p212_p3), %v326_v13, %v3026_v14  ;;  %v3034_v33 = vsub.s32 (!%p212_p3), %v359_v24, %v3026_v14 }
   0xe   : > { %s3215_s15 = smov (!%p259_p4, %s2958_s15), 1 }
   0xf   : > { %s3019_s19 = sshll.u32 %s3215_s15, 5  ;;  %s280_s5 = scalar_lea.vmem %s3208_s3, %s3215_s15 }
  0x10   : > { %s272_s22 = scalar_lea.vmem %s3206_s1, %s3019_s19  ;;  %s277_s25 = scalar_lea.vmem %s3207_s2, %s3019_s19 }
  0x11   : > { %v309_v0 = vld [vmem:[%s272_s22 + $0x8] sm:$0xf]  ;;  %v307_v1 = vld [vmem:[%s272_s22] sm:$0xf]  ;;  %v310_v2 = vld [vmem:[%s272_s22 + $0xc] sm:$0xf]  ;;  %s266_s28 = scalar_lea.vmem %s3205_s0, %s3019_s19  ;;  %s289_s8 = scalar_lea.vmem %s3209_s4, %s3019_s19 }
  0x12   : > { %455 = vxpose.xlu1.b32.start.end [1/1] (short) (narrow) %v309_v0, 8  ;;  %391 = vxpose.xlu0.b32.start.end [1/1] (short) (narrow) %v307_v1, 8  ;;  %v308_v3 = vld [vmem:[%s272_s22 + $0x4] sm:$0xf]  ;;  %v312_v4 = vld [vmem:[%s272_s22 + $0x14] sm:$0xf] }
  0x13   : > { %v311_v5 = vld [vmem:[%s272_s22 + $0x10] sm:$0xf]  ;;  %v314_v6 = vld [vmem:[%s272_s22 + $0x1c] sm:$0xf]  ;;  %v313_v7 = vld [vmem:[%s272_s22 + $0x18] sm:$0xf] }
  0x14   : > { %v322_v9 = vld [vmem:[%s277_s25 + $0x1c] sm:$0xf]  ;;  %v321_v10 = vld [vmem:[%s277_s25 + $0x18] sm:$0xf]  ;;  %v292_v13 = vld [vmem:[%s266_s28 + $0x4] sm:$0xf] }
  0x15   : > { %v295_v17 = vld [vmem:[%s266_s28 + $0x10] sm:$0xf]  ;;  %v296_v18 = vld [vmem:[%s266_s28 + $0x14] sm:$0xf] }
  0x16   : > { %487 = vxpose.xlu1.b32.start.end [1/1] (short) (narrow) %v310_v2, 8  ;;  %423 = vxpose.xlu0.b32.start.end [1/1] (short) (narrow) %v308_v3, 8  ;;  %v315_v2 = vld [vmem:[%s277_s25] sm:$0xf]  ;;  %v2970_v3 = vmov 0.0  }
  0x17   : > { %2859 = vmatprep.subr.mxu0 %v2970_v3  ;;  %2864 = vmatprep.subr.mxu1 %v2970_v3 }
  0x18   : > { %2861 = vmatprep.mubr.msk.f32.mxu0 %vm2971_vm0, %v2970_v3  ;;  %2866 = vmatprep.mubr.msk.f32.mxu1 %vm2971_vm0, %v2970_v3 }
  0x1a   : > { %551 = vxpose.xlu1.b32.start.end [1/1] (short) (narrow) %v312_v4, 8  ;;  %519 = vxpose.xlu0.b32.start.end [1/1] (short) (narrow) %v311_v5, 8  ;;  %v317_v4 = vld [vmem:[%s277_s25 + $0x8] sm:$0xf]  ;;  %v316_v5 = vld [vmem:[%s277_s25 + $0x4] sm:$0xf] }
  0x1e   : > { %615 = vxpose.xlu1.b32.start.end [1/1] (short) (narrow) %v314_v6, 8  ;;  %583 = vxpose.xlu0.b32.start.end [1/1] (short) (narrow) %v313_v7, 8  ;;  %v318_v6 = vld [vmem:[%s277_s25 + $0xc] sm:$0xf]  ;;  %v320_v7 = vld [vmem:[%s277_s25 + $0x14] sm:$0xf] }
  0x92   : > { %v471_v8 = vpop.trf.xlu1  ;;  %v407_v12 = vpop.trf.xlu0 }
  0x93   : > { %v647_v21 = vcombine.low %v407_v12, %v471_v8  ;;  %v648_v38 = vcombine.high %v407_v12, %v471_v8  ;;  %v319_v8 = vld [vmem:[%s277_s25 + $0x10] sm:$0xf]  ;;  %v291_v12 = vld [vmem:[%s266_s28] sm:$0xf] }
  0x95   : > { %v655_v26 = vrot.slane %v647_v21, %v3029_v20  ;;  %v662_v47 = vrot.slane %v648_v38, %v3029_v20  ;;  %v298_v21 = vld [vmem:[%s266_s28 + $0x1c] sm:$0xf] }
  0x96   : > { %v503_v15 = vpop.trf.xlu1  ;;  %v439_v16 = vpop.trf.xlu0 }
  0x97   : > { %v663_v19 = vcombine.low %v439_v16, %v503_v15  ;;  %v664_v34 = vcombine.high %v439_v16, %v503_v15  ;;  %v293_v15 = vld [vmem:[%s266_s28 + $0x8] sm:$0xf]  ;;  %v294_v16 = vld [vmem:[%s266_s28 + $0xc] sm:$0xf] }
  0x98   : > { %v301_v24 = vmul.f32 0.35355338, %v293_v15 }
  0x99   : > { %v671_v25 = vrot.slane %v663_v19, %v3029_v20  ;;  %v678_v43 = vrot.slane %v664_v34, %v3029_v20  ;;  %v297_v19 = vld [vmem:[%s266_s28 + $0x18] sm:$0xf] }
  0x9a   : > { %v567_v22 = vpop.trf.xlu1  ;;  %v535_v23 = vpop.trf.xlu0 }
  0x9b   : > { %v711_v37 = vcombine.low %v655_v26, %v671_v25  ;;  %v712_v46 = vcombine.high %v655_v26, %v671_v25  ;;  %v727_v53 = vcombine.low %v662_v47, %v678_v43  ;;  %v728_v59 = vcombine.high %v662_v47, %v678_v43 }
  0x9c   : > { %v302_v25 = vmul.f32 0.35355338, %v294_v16  ;;  %v303_v26 = vmul.f32 0.35355338, %v295_v17 }
  0x9d   : > { %v719_v44 = vrot.slane %v711_v37, %v3034_v33  ;;  %v726_v52 = vrot.slane %v712_v46, %v3034_v33  ;;  %v735_v58 = vrot.slane %v727_v53, %v3034_v33  ;;  %v742_v63 = vrot.slane %v728_v59, %v3034_v33 }
  0x9e   : > { %v631_v27 = vpop.trf.xlu1  ;;  %v599_v28 = vpop.trf.xlu0 }
  0x9f   : > { %v695_v29 = vcombine.low %v567_v22, %v631_v27  ;;  %v696_v30 = vcombine.high %v567_v22, %v631_v27  ;;  %v679_v31 = vcombine.low %v535_v23, %v599_v28  ;;  %v680_v32 = vcombine.high %v535_v23, %v599_v28 }
  0xa0   : > { %v299_v22 = vmul.f32 0.35355338, %v291_v12  ;;  %v300_v23 = vmul.f32 0.35355338, %v292_v13 }
  0xa1   : > { %v703_v35 = vrot.slane %v695_v29, %v3029_v20  ;;  %v687_v36 = vrot.slane %v679_v31, %v3029_v20  ;;  %v710_v39 = vrot.slane %v696_v30, %v3029_v20  ;;  %v694_v40 = vrot.slane %v680_v32, %v3029_v20 }
  0xa2   : > { %v304_v29 = vmul.f32 0.35355338, %v296_v18  ;;  %v305_v30 = vmul.f32 0.35355338, %v297_v19  ;;  %v306_v31 = vmul.f32 0.35355338, %v298_v21 }
  0xa3   : > { %v743_v41 = vcombine.low %v687_v36, %v703_v35  ;;  %v744_v42 = vcombine.high %v687_v36, %v703_v35  ;;  %v759_v51 = vcombine.low %v694_v40, %v710_v39  ;;  %v760_v57 = vcombine.high %v694_v40, %v710_v39 }
  0xa4   : > { %v323_v35 = vcombine.low %v299_v22, %v301_v24  ;;  %v331_v36 = vcombine.low %v300_v23, %v302_v25  ;;  %v339_v37 = vcombine.low %v303_v26, %v305_v30  ;;  %v347_v38 = vcombine.low %v304_v29, %v306_v31 }
  0xa5   : > { %v751_v45 = vrot.slane %v743_v41, %v3034_v33  ;;  %v758_v50 = vrot.slane %v744_v42, %v3034_v33  ;;  %v767_v56 = vrot.slane %v759_v51, %v3034_v33  ;;  %v774_v62 = vrot.slane %v760_v57, %v3034_v33 }
  0xa6   : > { %v330_v43 = vrot.slane %v323_v35, %v3029_v20  ;;  %v354_v46 = vrot.slane %v347_v38, %v3029_v20 }
  0xa7   : > { %v776_v48 = vcombine.high %v719_v44, %v751_v45  ;;  %v775_v49 = vcombine.low %v719_v44, %v751_v45  ;;  %v778_v54 = vcombine.high %v726_v52, %v758_v50  ;;  %v777_v55 = vcombine.low %v726_v52, %v758_v50 }
  0xa8   : > { %v780_v60 = vcombine.high %v735_v58, %v767_v56  ;;  %v779_v61 = vcombine.low %v735_v58, %v767_v56  ;;  %v782_v0 = vcombine.high %v742_v63, %v774_v62  ;;  %v781_v1 = vcombine.low %v742_v63, %v774_v62 }
  0xa9   : > { %815 = vxpose.xlu1.b32.start.end [1/1] (short) (narrow) %v776_v48, 8  ;;  %783 = vxpose.xlu0.b32.start.end [1/1] (short) (narrow) %v775_v49, 8  ;;  %v338_v44 = vrot.slane %v331_v36, %v3029_v20  ;;  %v346_v45 = vrot.slane %v339_v37, %v3029_v20 }
  0xab   : > { %v355_v51 = vcombine.low %v330_v43, %v338_v44  ;;  %v371_v52 = vcombine.low %v346_v45, %v354_v46  ;;  %v372_v59 = vcombine.high %v346_v45, %v354_v46 }
  0xad   : > { %879 = vxpose.xlu1.b32.start.end [1/1] (short) (narrow) %v778_v54, 8  ;;  %847 = vxpose.xlu0.b32.start.end [1/1] (short) (narrow) %v777_v55, 8  ;;  %v356_v55 = vcombine.high %v330_v43, %v338_v44 }
  0xb1   : > { %943 = vxpose.xlu1.b32.start.end [1/1] (short) (narrow) %v780_v60, 8  ;;  %911 = vxpose.xlu0.b32.start.end [1/1] (short) (narrow) %v779_v61, 8  ;;  %v363_v60 = vrot.slane %v355_v51, %v3034_v33  ;;  %v379_v61 = vrot.slane %v371_v52, %v3034_v33 }
  0xb5   : > { %1007 = vxpose.xlu1.b32.start.end [1/1] (short) (narrow) %v782_v0, 8  ;;  %975 = vxpose.xlu0.b32.start.end [1/1] (short) (narrow) %v781_v1, 8 }
  0xb9   : > { %1467 = vxpose.xlu0.b32.start.end [1/1] (short) (narrow) %v315_v2, 8  ;;  %1499 = vxpose.xlu1.b32.start.end [1/1] (short) (narrow) %v316_v5, 8  ;;  %v386_v5 = vrot.slane %v372_v59, %v3034_v33 }
  0xbd   : > { %1531 = vxpose.xlu0.b32.start.end [1/1] (short) (narrow) %v317_v4, 8  ;;  %1627 = vxpose.xlu1.b32.start.end [1/1] (short) (narrow) %v320_v7, 8  ;;  %v370_v4 = vrot.slane %v356_v55, %v3034_v33  ;;  %v387_v7 = vcombine.low %v363_v60, %v379_v61 }
  0xbf   : > { %v389_v15 = vcombine.low %v370_v4, %v386_v5  ;;  %v390_v18 = vcombine.high %v370_v4, %v386_v5 }
  0xc1   : > { %1563 = vxpose.xlu0.b32.start.end [1/1] (short) (narrow) %v318_v6, 8  ;;  %1691 = vxpose.xlu1.b32.start.end [1/1] (short) (narrow) %v322_v9, 8 }
  0xc5   : > { %1595 = vxpose.xlu0.b32.start.end [1/1] (short) (narrow) %v319_v8, 8  ;;  %v388_v8 = vcombine.high %v363_v60, %v379_v61 }
  0xc9   : > { %1659 = vxpose.xlu0.b32.start.end [1/1] (short) (narrow) %v321_v10, 8 }
 0x129   : > { %v831_v27 = vpop.trf.xlu1  ;;  %v799_v28 = vpop.trf.xlu0 }
 0x12d   : > { %v895_v32 = vpop.trf.xlu1  ;;  %v863_v34 = vpop.trf.xlu0 }
 0x12e   : > { %v1047_v39 = vcombine.low %v831_v27, %v895_v32  ;;  %v1039_v40 = vcombine.low %v799_v28, %v863_v34 }
 0x130   : > { %v1054_v47 = vrot.slane %v1047_v39, %v3029_v20  ;;  %v1046_v48 = vrot.slane %v1039_v40, %v3029_v20 }
 0x131   : > { %v959_v41 = vpop.trf.xlu1  ;;  %v927_v42 = vpop.trf.xlu0 }
 0x132   : > { %v1071_v56 = vcombine.low %v1046_v48, %v1054_v47  ;;  %v1072_v0 = vcombine.high %v1046_v48, %v1054_v47 }
 0x134   : > { %v1079_v1 = vrot.slane %v1071_v56, %v3034_v33  ;;  %v1086_v13 = vrot.slane %v1072_v0, %v3034_v33 }
 0x135   : > { %v1023_v49 = vpop.trf.xlu1  ;;  %v991_v50 = vpop.trf.xlu0 }
 0x136   : > { %v1063_v53 = vcombine.low %v959_v41, %v1023_v49  ;;  %v1055_v54 = vcombine.low %v927_v42, %v991_v50 }
 0x138   : > { %v1070_v57 = vrot.slane %v1063_v53, %v3029_v20  ;;  %v1062_v58 = vrot.slane %v1055_v54, %v3029_v20 }
 0x139   : > { %v1483_v12 = vpop.trf.xlu0  ;;  %v1515_v23 = vpop.trf.xlu1 }
 0x13a   : > { %v1087_v62 = vcombine.low %v1062_v58, %v1070_v57  ;;  %v1088_v63 = vcombine.high %v1062_v58, %v1070_v57 }
 0x13c   : > { %v1095_v2 = vrot.slane %v1087_v62, %v3034_v33  ;;  %v1102_v6 = vrot.slane %v1088_v63, %v3034_v33 }
 0x13d   : > { %v1547_v19 = vpop.trf.xlu0  ;;  %v1643_v31 = vpop.trf.xlu1 }
 0x13e   : > { %v1103_v9 = vcombine.low %v1079_v1, %v1095_v2  ;;  %v1104_v10 = vcombine.high %v1079_v1, %v1095_v2  ;;  %v1105_v16 = vcombine.low %v1086_v13, %v1102_v6  ;;  %v1106_v17 = vcombine.high %v1086_v13, %v1102_v6 }
 0x13f   : > { %v1724_v21 = vcombine.high %v1483_v12, %v1547_v19  ;;  %v1723_v22 = vcombine.low %v1483_v12, %v1547_v19  ;;  %v1408_v13 = vand.u32 127, %v327_v11 }
 0x140   : > { %2860 = vmatpush3.msra.mxu0 %v1103_v9  ;;  %2865 = vmatpush3.msra.mxu1 %v1104_v10  ;;  %v1413_v9 = vsub.s32 0, %v3026_v14  ;;  %v2972_v10 = vmov 0  }
 0x141   : > { %2862 = vmatmul.mubr.msk.f32.vlgmr.msra.gmra.mrb[0].mxu0 %vm1107_vm1, %v387_v7  ;;  %2867 = vmatmul.mubr.msk.f32.vlgmr.msra.gmra.mrb[0].mxu1 %vm1107_vm1, %v388_v8  ;;  %v1579_v24 = vpop.trf.xlu0  ;;  %v1738_v25 = vrot.slane %v1724_v21, %v3029_v20  ;;  %v1731_v29 = vrot.slane %v1723_v22, %v3029_v20  ;;  %v1707_v36 = vpop.trf.xlu1  ;;  %v1400_v8 = vld [vmem:[%s280_s5] sm:$0x1]  ;;  %vm1409_vm3 = vcmp.gt.s32.totalorder %v1408_v13, %v3026_v14 }
 0x142   : > { %2869 = vmatprep.subr.mxu0 %v2970_v3  ;;  %2874 = vmatprep.subr.mxu1 %v2970_v3  ;;  %v1739_v26 = vcombine.low %v1515_v23, %v1579_v24  ;;  %v1740_v27 = vcombine.high %v1515_v23, %v1579_v24  ;;  %v1771_v39 = vcombine.low %v1643_v31, %v1707_v36  ;;  %vm1401_vm2 = vcmp.gt.s32.totalorder %v1400_v8, 0 }
 0x143   : > { %2870 = vmatpush3.msra.mxu0 %v1105_v16  ;;  %2875 = vmatpush3.msra.mxu1 %v1106_v17  ;;  %v1772_v40 = vcombine.high %v1643_v31, %v1707_v36  ;;  %v1410_v12 = vsel %vm1401_vm2, 1, %v2972_v10 }
 0x144   : > { %2871 = vmatprep.mubr.msk.f32.mxu0 %vm2971_vm0, %v2970_v3  ;;  %2876 = vmatprep.mubr.msk.f32.mxu1 %vm2971_vm0, %v2970_v3  ;;  %v1754_v28 = vrot.slane %v1740_v27, %v3029_v20  ;;  %v1747_v30 = vrot.slane %v1739_v26, %v3029_v20  ;;  %v1779_v44 = vrot.slane %v1771_v39, %v3029_v20 }
 0x145   : > { %2872 = vmatmul.mubr.msk.f32.vlgmr.msra.gmra.mrb[2].mxu0 %vm1107_vm1, %v389_v15  ;;  %2877 = vmatmul.mubr.msk.f32.vlgmr.msra.gmra.mrb[2].mxu1 %vm1107_vm1, %v390_v18  ;;  %v1611_v32 = vpop.trf.xlu0  ;;  %v1786_v45 = vrot.slane %v1772_v40, %v3029_v20  ;;  %v1414_v15 = vrot.slane %v1410_v12, %v1413_v9 }
 0x146   : > { %2879 = vmatprep.subr.mxu0 %v2970_v3  ;;  %2884 = vmatprep.subr.mxu1 %v2970_v3  ;;  %v1803_v34 = vcombine.low %v1738_v25, %v1754_v28  ;;  %v1804_v35 = vcombine.high %v1738_v25, %v1754_v28  ;;  %v1787_v38 = vcombine.low %v1731_v29, %v1747_v30 }
 0x147   : > { %2881 = vmatprep.mubr.msk.f32.mxu0 %vm2971_vm0, %v2970_v3  ;;  %2886 = vmatprep.mubr.msk.f32.mxu1 %vm2971_vm0, %v2970_v3  ;;  %v1788_v43 = vcombine.high %v1731_v29, %v1747_v30  ;;  %vm1415_vm4 = vcmp.eq.s32.totalorder %v1414_v15, 1 }
 0x148   : > { %v1795_v48 = vrot.slane %v1787_v38, %v3034_v33  ;;  %v1811_v60 = vrot.slane %v1803_v34, %v3034_v33  ;;  %v3111_v62 = vrot.slane %v1804_v35, %v3034_v33  ;;  %vm1416_vm5 = vmor %vm1415_vm4, %vm1409_vm3 }
 0x149   : > { %v1675_v37 = vpop.trf.xlu0  ;;  %v1802_v54 = vrot.slane %v1788_v43, %v3034_v33 }
 0x14a   : > { %v1755_v41 = vcombine.low %v1611_v32, %v1675_v37  ;;  %v1756_v42 = vcombine.high %v1611_v32, %v1675_v37 }
 0x14c   : > { %v1763_v46 = vrot.slane %v1755_v41, %v3029_v20  ;;  %v1770_v47 = vrot.slane %v1756_v42, %v3029_v20 }
 0x14e   : > { %v1835_v49 = vcombine.low %v1770_v47, %v1786_v45  ;;  %v1836_v50 = vcombine.high %v1770_v47, %v1786_v45  ;;  %v1819_v51 = vcombine.low %v1763_v46, %v1779_v44  ;;  %v1820_v52 = vcombine.high %v1763_v46, %v1779_v44 }
 0x150   : > { %v1827_v53 = vrot.slane %v1819_v51, %v3034_v33  ;;  %v1834_v55 = vrot.slane %v1820_v52, %v3034_v33  ;;  %v1843_v61 = vrot.slane %v1835_v49, %v3034_v33  ;;  %v3114_v63 = vrot.slane %v1836_v50, %v3034_v33 }
 0x152   : > { %v1851_v56 = vcombine.low %v1795_v48, %v1827_v53  ;;  %v1852_v57 = vcombine.high %v1795_v48, %v1827_v53  ;;  %v1853_v58 = vcombine.low %v1802_v54, %v1834_v55  ;;  %v1854_v59 = vcombine.high %v1802_v54, %v1834_v55 }
 0x153   : > { %v1855_v0 = vcombine.low %v1811_v60, %v1843_v61  ;;  %v1856_v1 = vcombine.high %v1811_v60, %v1843_v61  ;;  %v1857_v2 = vcombine.low %v3111_v62, %v3114_v63  ;;  %v1858_v4 = vcombine.high %v3111_v62, %v3114_v63 }
 0x154   : > { %1859 = vxpose.xlu0.b32.start.end [1/1] (short) (narrow) %v1851_v56, 8  ;;  %1891 = vxpose.xlu1.b32.start.end [1/1] (short) (narrow) %v1852_v57, 8 }
 0x158   : > { %1923 = vxpose.xlu0.b32.start.end [1/1] (short) (narrow) %v1853_v58, 8 }
 0x15c   : > { %1955 = vxpose.xlu0.b32.start.end [1/1] (short) (narrow) %v1854_v59, 8 }
 0x1d4   : > { %v3120_v5 = vpop.trf.xlu0  ;;  %v1907_v31 = vpop.trf.xlu1 }
 0x1d8   : > { %v3122_v6 = vpop.trf.xlu0 }
 0x1d9   : > { %v2115_v7 = vcombine.low %v3120_v5, %v3122_v6 }
 0x1dc   : > { %v1971_v32 = vpop.trf.xlu0 }
 0x214   : > { %v1177_v16 = vpop.f32.mrb[0].mxu0  ;;  %v1250_v17 = vpop.f32.mrb[0].mxu1 }
 0x215   : > { %v1419_v18 = vsel %vm1416_vm5, -1e+18, %v1177_v16  ;;  %v1420_v19 = vsel %vm1416_vm5, -1e+18, %v1250_v17  ;;  %v2863_v21 = vpop.f32.mrb[1].mxu0  ;;  %v2868_v22 = vpop.f32.mrb[1].mxu1 }
 0x216   : > { %v1426_v23 = vsel %vm1107_vm1, %v1420_v19, -inf  ;;  %v1423_v24 = vsel %vm1107_vm1, %v1419_v18, -inf }
 0x217   : > { %1427 = vmax.xlane.f32.xlu1 %v1426_v23  ;;  %1424 = vmax.xlane.f32.xlu0 %v1423_v24 }
 0x218   : > { %v1323_v25 = vpop.f32.mrb[2].mxu0  ;;  %v1396_v26 = vpop.f32.mrb[2].mxu1 }
 0x219   : > { %v1421_v11 = vsel %vm1416_vm5, -1e+18, %v1323_v25  ;;  %v2873_v27 = vpop.f32.mrb[3].mxu0  ;;  %v1422_v28 = vsel %vm1416_vm5, -1e+18, %v1396_v26  ;;  %v2878_v14 = vpop.f32.mrb[3].mxu1 }
 0x21a   : > { %v1429_v29 = vsel %vm1107_vm1, %v1421_v11, -inf  ;;  %v1432_v30 = vsel %vm1107_vm1, %v1422_v28, -inf }
 0x21b   : > { %1430 = vmax.xlane.f32.xlu1 %v1429_v29 }
 0x21f   : > { %1433 = vmax.xlane.f32.xlu1 %v1432_v30 }
 0x244   : > { %1987 = vxpose.xlu0.b32.start.end [1/1] (short) (narrow) %v1855_v0, 8  ;;  %v2123_v0 = vcombine.low %v1907_v31, %v1971_v32 }
 0x252   : > { %2019 = vxpose.xlu1.b32.start.end [1/1] (short) (narrow) %v1856_v1, 8 }
 0x2a4   : > { %v1428_v34 = vpop.xlane.xlu1 %1427  ;;  %v1425_v35 = vpop.xlane.xlu0 %1424 }
 0x2a5   : > { %v1436_v36 = vsub.f32 %v1420_v19, %v1428_v34  ;;  %v1435_v37 = vsub.f32 %v1419_v18, %v1425_v35 }
 0x2a7   : > { %v1441_v38 = vmul.f32 1.442695, %v1436_v36  ;;  %v1439_v39 = vmul.f32 1.442695, %v1435_v37 }
 0x2a8   : > { %v1431_v40 = vpop.xlane.xlu1 %1430 }
 0x2a9   : > { %2928 = vpow2.f32 %v1441_v38  ;;  %v1437_v41 = vsub.f32 %v1421_v11, %v1431_v40 }
 0x2aa   : > { %2930 = vpow2.f32 %v1439_v39 }
 0x2ab   : > { %v1443_v42 = vmul.f32 1.442695, %v1437_v41 }
 0x2ac   : > { %v1434_v43 = vpop.xlane.xlu1 %1433 }
 0x2ad   : > { %2932 = vpow2.f32 %v1443_v42  ;;  %v1438_v44 = vsub.f32 %v1422_v28, %v1434_v43 }
 0x2af   : > { %v1445_v45 = vmul.f32 1.442695, %v1438_v44 }
 0x2b1   : > { %2934 = vpow2.f32 %v1445_v45 }
 0x2b3   : > { %v2929_v46 = vpop.eup %2928 }
 0x2b4   : > { %v2931_v47 = vpop.eup %2930  ;;  %v1450_v48 = vsel %vm1107_vm1, %v2929_v46, 0.0 }
 0x2b5   : > { %v1447_v49 = vsel %vm1107_vm1, %v2931_v47, 0.0  ;;  %1451 = vadd.xlane.f32.xlu1 %v1450_v48 }
 0x2b6   : > { %1448 = vadd.xlane.f32.xlu0 %v1447_v49 }
 0x2b7   : > { %v2933_v50 = vpop.eup %2932 }
 0x2b8   : > { %v1453_v51 = vsel %vm1107_vm1, %v2933_v50, 0.0 }
 0x2b9   : > { %1454 = vadd.xlane.f32.xlu1 %v1453_v51 }
 0x2bb   : > { %v2935_v52 = vpop.eup %2934 }
 0x2bc   : > { %v1456_v53 = vsel %vm1107_vm1, %v2935_v52, 0.0 }
 0x2bd   : > { %1457 = vadd.xlane.f32.xlu1 %v1456_v53 }
 0x2c4   : > { %v2003_v55 = vpop.trf.xlu0 }
 0x2d2   : > { %v2035_v54 = vpop.trf.xlu1 }
 0x2e3   : > { %2051 = vxpose.xlu0.b32.start.end [1/1] (short) (narrow) %v1857_v2, 8  ;;  %v2122_v2 = vrot.slane %v2115_v7, %v3029_v20 }
 0x2f0   : > { %2083 = vxpose.xlu1.b32.start.end [1/1] (short) (narrow) %v1858_v4, 8  ;;  %v2130_v4 = vrot.slane %v2123_v0, %v3029_v20 }
 0x2f2   : > { %v2147_v12 = vcombine.low %v2122_v2, %v2130_v4  ;;  %v2148_v21 = vcombine.high %v2122_v2, %v2130_v4 }
 0x2f4   : > { %v2155_v22 = vrot.slane %v2147_v12, %v3034_v33  ;;  %v2162_v26 = vrot.slane %v2148_v21, %v3034_v33 }
 0x342   : > { %v1452_v56 = vpop.xlane.xlu1 %1451 }
 0x343   : > { %v1449_v57 = vpop.xlane.xlu0 %1448  ;;  %2936 = vrcp.f32 %v1452_v56 }
 0x344   : > { %2938 = vrcp.f32 %v1449_v57 }
 0x346   : > { %v1455_v62 = vpop.xlane.xlu1 %1454 }
 0x347   : > { %2940 = vrcp.f32 %v1455_v62 }
 0x34a   : > { %v1458_v63 = vpop.xlane.xlu1 %1457 }
 0x34b   : > { %2942 = vrcp.f32 %v1458_v63 }
 0x34d   : > { %v2937_v58 = vpop.eup %2936 }
 0x34e   : > { %v2939_v59 = vpop.eup %2938  ;;  %v1464_v60 = vmul.f32 %v2937_v58, %v2929_v46 }
 0x34f   : > { %v1463_v61 = vmul.f32 %v2939_v59, %v2931_v47 }
 0x350   : > { %2885 = vmatpush3.xpose.msk.msra.mxu1 %vm1107_vm1, %v1464_v60 }
 0x351   : > { %2880 = vmatpush3.xpose.msk.msra.mxu0 %vm1107_vm1, %v1463_v61  ;;  %2894 = vmatprep.subr.mxu1 %v2970_v3  ;;  %v2941_v18 = vpop.eup %2940 }
 0x352   : > { %2889 = vmatprep.subr.mxu0 %v2970_v3  ;;  %v1465_v24 = vmul.f32 %v2941_v18, %v2933_v50 }
 0x355   : > { %v2943_v19 = vpop.eup %2942 }
 0x356   : > { %v1466_v25 = vmul.f32 %v2943_v19, %v2935_v52 }
 0x363   : > { %v2067_v1 = vpop.trf.xlu0 }
 0x364   : > { %v2131_v8 = vcombine.low %v2003_v55, %v2067_v1 }
 0x366   : > { %v2138_v13 = vrot.slane %v2131_v8, %v3029_v20 }
 0x370   : > { %v2099_v9 = vpop.trf.xlu1 }
 0x371   : > { %v2139_v10 = vcombine.low %v2035_v54, %v2099_v9 }
 0x373   : > { %v2146_v15 = vrot.slane %v2139_v10, %v3029_v20 }
 0x375   : > { %v2163_v16 = vcombine.low %v2138_v13, %v2146_v15  ;;  %v2164_v17 = vcombine.high %v2138_v13, %v2146_v15 }
 0x377   : > { %v2171_v5 = vrot.slane %v2163_v16, %v3034_v33  ;;  %v2178_v6 = vrot.slane %v2164_v17, %v3034_v33 }
 0x379   : > { %v2179_v7 = vcombine.low %v2155_v22, %v2171_v5  ;;  %v2180_v23 = vcombine.high %v2155_v22, %v2171_v5  ;;  %v2181_v11 = vcombine.low %v2162_v26, %v2178_v6  ;;  %v2182_v27 = vcombine.high %v2162_v26, %v2178_v6 }
 0x37b   : > { %2882 = vmatmul.mubr.msk.f32.vlgmr.msra.gmra.mrb[4].mxu0 %vm1107_vm1, %v2179_v7  ;;  %2887 = vmatmul.mubr.msk.f32.vlgmr.msra.gmra.mrb[4].mxu1 %vm1107_vm1, %v2180_v23 }
 0x37c   : > { %2890 = vmatpush3.xpose.msk.msra.mxu0 %vm1107_vm1, %v1465_v24  ;;  %2895 = vmatpush3.xpose.msk.msra.mxu1 %vm1107_vm1, %v1466_v25 }
 0x37d   : > { %2891 = vmatprep.mubr.msk.f32.mxu0 %vm2971_vm0, %v2970_v3  ;;  %2896 = vmatprep.mubr.msk.f32.mxu1 %vm2971_vm0, %v2970_v3 }
 0x37f   : > { %2892 = vmatmul.mubr.msk.f32.vlgmr.msra.gmra.mrb[6].mxu0 %vm1107_vm1, %v2181_v11  ;;  %2897 = vmatmul.mubr.msk.f32.vlgmr.msra.gmra.mrb[6].mxu1 %vm1107_vm1, %v2182_v27 }
 0x44e   : > { %v2255_v28 = vpop.f32.mrb[4].mxu0  ;;  %v2331_v14 = vpop.f32.mrb[4].mxu1 }
 0x44f   : > { %2519 = vxpose.xlu1.b32.start.end [1/1] (short) (narrow) %v2331_v14, 8  ;;  %v2888_v29 = vpop.f32.mrb[5].mxu1  ;;  %2487 = vxpose.xlu0.b32.start.end [1/1] (short) (narrow) %v2255_v28, 8  ;;  %v2883_v30 = vpop.f32.mrb[5].mxu0 }
 0x452   : > { %v2407_v31 = vpop.f32.mrb[6].mxu0  ;;  %v2483_v32 = vpop.f32.mrb[6].mxu1 }
 0x453   : > { %2583 = vxpose.xlu1.b32.start.end [1/1] (short) (narrow) %v2483_v32, 8  ;;  %v2898_v34 = vpop.f32.mrb[7].mxu1  ;;  %2551 = vxpose.xlu0.b32.start.end [1/1] (short) (narrow) %v2407_v31, 8  ;;  %v2893_v35 = vpop.f32.mrb[7].mxu0 }
 0x4cf   : > { %v2535_v36 = vpop.trf.xlu1  ;;  %v2503_v37 = vpop.trf.xlu0 }
 0x4d3   : > { %v2599_v38 = vpop.trf.xlu1  ;;  %v2567_v39 = vpop.trf.xlu0 }
 0x4d4   : > { %v2631_v40 = vcombine.low %v2535_v36, %v2599_v38  ;;  %v2632_v41 = vcombine.high %v2535_v36, %v2599_v38  ;;  %v2615_v42 = vcombine.low %v2503_v37, %v2567_v39  ;;  %v2616_v43 = vcombine.high %v2503_v37, %v2567_v39 }
 0x4d6   : > { %v2639_v44 = vrot.slane %v2631_v40, %v3029_v20  ;;  %v2646_v45 = vrot.slane %v2632_v41, %v3029_v20  ;;  %v2623_v46 = vrot.slane %v2615_v42, %v3029_v20  ;;  %v2630_v47 = vrot.slane %v2616_v43, %v3029_v20 }
 0x4d8   : > { %v2647_v48 = vcombine.low %v2623_v46, %v2639_v44  ;;  %v2648_v49 = vcombine.high %v2623_v46, %v2639_v44  ;;  %v2663_v50 = vcombine.low %v2630_v47, %v2646_v45  ;;  %v2664_v51 = vcombine.high %v2630_v47, %v2646_v45 }
 0x4da   : > { %v2655_v52 = vrot.slane %v2647_v48, %v3034_v33  ;;  %v2662_v53 = vrot.slane %v2648_v49, %v3034_v33  ;;  %v2671_v54 = vrot.slane %v2663_v50, %v3034_v33  ;;  %v2678_v55 = vrot.slane %v2664_v51, %v3034_v33 }
 0x4dc   : > { %v2679_v56 = vcombine.high %v2655_v52, %v2970_v3  ;;  %v2680_v20 = vcombine.high %v2662_v53, %v2970_v3  ;;  %v2681_v57 = vcombine.high %v2671_v54, %v2970_v3  ;;  %v2682_v58 = vcombine.high %v2678_v55, %v2970_v3  ;;  %2684 = vst.msk [vmem:[%s289_s8] sm:$0xf] %vm2683_vm6, %v2655_v52 }
 0x4dd   : > { %2686 = vst.msk [vmem:[%s289_s8 + $0x8] sm:$0xf] %vm2683_vm6, %v2662_v53  ;;  %2688 = vst.msk [vmem:[%s289_s8 + $0x10] sm:$0xf] %vm2683_vm6, %v2671_v54 }
 0x4de   : > { %2690 = vst.msk [vmem:[%s289_s8 + $0x18] sm:$0xf] %vm2683_vm6, %v2678_v55  ;;  %2685 = vst.msk [vmem:[%s289_s8 + $0x4] sm:$0xf] %vm2683_vm6, %v2679_v56 }
 0x4df   : > { %2687 = vst.msk [vmem:[%s289_s8 + $0xc] sm:$0xf] %vm2683_vm6, %v2680_v20  ;;  %2689 = vst.msk [vmem:[%s289_s8 + $0x14] sm:$0xf] %vm2683_vm6, %v2681_v57 }
 0x4e0   : > { %2691 = vst.msk [vmem:[%s289_s8 + $0x1c] sm:$0xf] %vm2683_vm6, %v2682_v58 }
 0x4e1 PF: > { %s14_s17 = sadd.s32 1, %s2966_s17   ;;  %s3210_s15 = smov %s2962_s16 }
 0x4e2   : > { %p11_p5 = scmp.ge.s32.totalorder %s14_s17, 4   ;;  %s3211_s16 = smov %s3213_s18 }
 0x4e4   :  { %13 = sbr.rel (!%p11_p5) target bundleno = 2 (0x2), region = 75 }

// kernel: decoder_forward.28
= control target key start
LH: loop header
LB: loop body
LE: loop exit
PB: predicated region body
PF: predicated region fallthrough
CT: control target
= control target key end

     0   :  { %vm22_vm0 = vcmask 261120   ;;  %vm176_vm5 = vcmask 523264   ;;  %s290_s0 = inlined_call_operand.vmem [shape: f32[16,32], index: 0, kind: input, shape index: {}]   ;;  %s291_s3 = inlined_call_operand.vmem [shape: f32[32,64], index: 3, kind: input, shape index: {}]   ;;  %s292_s1 = inlined_call_operand.vmem [shape: f32[1,32], index: 1, kind: input, shape index: {}]   ;;  %s293_s2 = inlined_call_operand.vmem [shape: f32[1,32], index: 2, kind: input, shape index: {}]   ;;  %s294_s4 = inlined_call_operand.vmem [shape: f32[1,64], index: 4, kind: input, shape index: {}]   ;;  %s295_s5 = inlined_call_operand.vmem [shape: f32[16,64], index: 5, kind: output, shape index: {}]  }
   0x1   :  { %v20_v0 = vld [vmem:[%s290_s0] sm:$0xff]  ;;  %v21_v1 = vld [vmem:[%s290_s0 + $0x8] sm:$0xff]  ;;  %v84_v16 = vld [vmem:[%s291_s3 + $0x10] sm:$0xff] }
   0x2   :  { %v23_v2 = vsel %vm22_vm0, %v20_v0, 0.0  ;;  %v26_v3 = vsel %vm22_vm0, %v21_v1, 0.0  ;;  %v82_v14 = vld [vmem:[%s291_s3] sm:$0xff]  ;;  %v83_v15 = vld [vmem:[%s291_s3 + $0x8] sm:$0xff]  ;;  %v85_v18 = vld [vmem:[%s291_s3 + $0x18] sm:$0xff] }
   0x3   :  { %24 = vadd.xlane.f32.xlu0 %v23_v2  ;;  %v205_v17 = vpack.c.bf16 %v83_v15, %v82_v14  ;;  %v209_v19 = vpack.c.bf16 %v85_v18, %v84_v16  ;;  %v183_v36 = vld [vmem:[%s292_s1] ss:$0 sm:$0xff] }
   0x4   :  { %v184_v39 = vld [vmem:[%s293_s2] ss:$0 sm:$0xff] }
   0x5   :  { %206 = vmatprep.subr.bf16.mxu0 %v205_v17  ;;  %v185_v46 = vld [vmem:[%s294_s4] ss:$0 sm:$0xff] }
   0x6   :  { %208 = vmatpush3.bf16.msra.mxu0 %v205_v17 }
   0x7   :  { %27 = vadd.xlane.f32.xlu0 %v26_v3  ;;  %210 = vmatprep.subr.bf16.mxu0 %v209_v19 }
   0xa   :  { %212 = vmatpush3.bf16.msra.mxu0 %v209_v19 }
  0x90   :  { %v25_v4 = vpop.xlane.xlu0 %24 }
  0x91   :  { %v30_v5 = vmul.f32 0.03125, %v25_v4 }
  0x93   :  { %v32_v6 = vsub.f32 %v20_v0, %v30_v5 }
  0x94   :  { %v28_v7 = vpop.xlane.xlu0 %27 }
  0x95   :  { %v31_v8 = vmul.f32 0.03125, %v28_v7  ;;  %v34_v9 = vmul.f32 %v32_v6, %v32_v6  ;;  %v69_v37 = vmul.f32 %v183_v36, %v32_v6 }
  0x97   :  { %v33_v10 = vsub.f32 %v21_v1, %v31_v8  ;;  %v36_v11 = vsel %vm22_vm0, %v34_v9, 0.0 }
  0x98   :  { %37 = vadd.xlane.f32.xlu1 %v36_v11 }
  0x99   :  { %v35_v12 = vmul.f32 %v33_v10, %v33_v10  ;;  %v70_v41 = vmul.f32 %v183_v36, %v33_v10 }
  0x9b   :  { %v39_v13 = vsel %vm22_vm0, %v35_v12, 0.0 }
  0x9c   :  { %40 = vadd.xlane.f32.xlu1 %v39_v13 }
 0x125   :  { %v38_v20 = vpop.xlane.xlu1 %37 }
 0x126   :  { %v42_v21 = vmul.f32 0.032258064, %v38_v20 }
 0x128   :  { %213 = vrsqrt.f32 %v42_v21  ;;  %vm46_vm1 = vcmp.eq.f32.partialorder %v42_v21, inf  ;;  %v49_v26 = vand.u32 2147483648, %v42_v21  ;;  %vm48_vm2 = vcmp.eq.f32.partialorder %v42_v21, 0.0 }
 0x129   :  { %v41_v22 = vpop.xlane.xlu1 %40 }
 0x12a   :  { %v43_v23 = vmul.f32 0.032258064, %v41_v22 }
 0x12c   :  { %215 = vrsqrt.f32 %v43_v23  ;;  %vm53_vm3 = vcmp.eq.f32.partialorder %v43_v23, inf  ;;  %v56_v32 = vand.u32 2147483648, %v43_v23  ;;  %vm55_vm4 = vcmp.eq.f32.partialorder %v43_v23, 0.0 }
 0x132   :  { %v214_v24 = vpop.eup %213 }
 0x133   :  { %v45_v25 = vmul.f32 %v214_v24, %v42_v21 }
 0x135   :  { %v47_v27 = vsel %vm46_vm1, %v42_v21, %v45_v25 }
 0x136   :  { %v216_v28 = vpop.eup %215  ;;  %v50_v29 = vsel %vm48_vm2, %v49_v26, %v47_v27 }
 0x137   :  { %v52_v30 = vmul.f32 %v216_v28, %v43_v23  ;;  %v58_v31 = vadd.f32 1e-06, %v50_v29 }
 0x139   :  { %v54_v33 = vsel %vm53_vm3, %v43_v23, %v52_v30  ;;  %217 = vrcp.f32 %v58_v31 }
 0x13a   :  { %v57_v34 = vsel %vm55_vm4, %v56_v32, %v54_v33 }
 0x13b   :  { %v59_v35 = vadd.f32 1e-06, %v57_v34 }
 0x13d   :  { %219 = vrcp.f32 %v59_v35 }
 0x143   :  { %v218_v38 = vpop.eup %217 }
 0x144   :  { %v71_v40 = vmul.f32 %v218_v38, %v69_v37 }
 0x146   :  { %v80_v42 = vadd.f32 %v184_v39, %v71_v40 }
 0x147   :  { %v220_v43 = vpop.eup %219 }
 0x148   :  { %v72_v44 = vmul.f32 %v220_v43, %v70_v41  ;;  %202 = vmatprep.mubr.msk.f32.mxu0 %vm22_vm0, %v80_v42 }
 0x14a   :  { %v81_v45 = vadd.f32 %v184_v39, %v72_v44 }
 0x14c   :  { %203 = vmatmul.mubr.msk.f32.vlgmr.msra.gmra.mrb[0].mxu0 %vm22_vm0, %v81_v45 }
 0x21f   :  { %v204_v47 = vpop.f32.mrb[0].mxu0 }
 0x220   :  { %v171_v48 = vadd.f32 %v204_v47, %v185_v46  ;;  %v165_v49 = vpop.f32.mrb[1].mxu0 }
 0x221   :  { %v166_v50 = vadd.f32 %v185_v46, %v165_v49 }
 0x222   :  { %v175_v51 = vmax.f32 %v171_v48, 0.0 }
 0x223   :  { %v174_v52 = vmax.f32 %v166_v50, 0.0 }
 0x224   :  { %178 = vst.msk [vmem:[%s295_s5 + $0x8] sm:$0xff] %vm176_vm5, %v175_v51 }
 0x225   :  { %177 = vst.msk [vmem:[%s295_s5] sm:$0xff] %vm176_vm5, %v174_v52 }

// kernel: decoder_forward.26
= control target key start
LH: loop header
LB: loop body
LE: loop exit
PB: predicated region body
PF: predicated region fallthrough
CT: control target
= control target key end

     0   :  { %s2987_s15 = smov 0   ;;  %s2989_s16 = smov 0   ;;  %s3191_s0 = inlined_call_operand.vmem [shape: f32[2,8,4,8], index: 0, kind: input, shape index: {}]   ;;  %s3192_s1 = inlined_call_operand.vmem [shape: f32[2,8,4,8], index: 1, kind: input, shape index: {}]   ;;  %s3193_s2 = inlined_call_operand.vmem [shape: f32[2,8,4,8], index: 2, kind: input, shape index: {}]   ;;  %s3194_s3 = inlined_call_operand.vmem [shape: s32[2,1,8], index: 3, kind: input, shape index: {}]   ;;  %s3195_s4 = inlined_call_operand.vmem [shape: f32[2,8,4,8], index: 4, kind: output, shape index: {}]  }
   0x1   :  { %s2991_s17 = smov 0  }
   0x2 LB: > { %s26_s18 = sadd.s32 1, %s2951_s16  ;;  %p2805_p0 = scmp.ge.s32.totalorder %s2955_s17, 1  ;;  %s2955_s17 = sphi %s2991_s17, %s14_s17   ;;  %s2951_s16 = sphi %s2989_s16, %s3197_s16   ;;  %s2947_s15 = sphi %s2987_s15, %s3196_s15  }
   0x3   : > { %p28_p1 = scmp.ge.s32.totalorder %s26_s18, 2  ;;  %p211_p2 = scmp.lt.s32.totalorder %s2955_s17, 3 }
   0x5   : > { %s3199_s18 = smov (%p28_p1, %s26_s18), 0  ;;  %p212_p3 = pnand %p2805_p0, %p211_p2 }
   0x6   : > { %p259_p4 = scmp.lt.s32.totalorder (!%p212_p3), %s2947_s15, 1  ;;  %v2957_v9 = vmov (!%p212_p3), 1983009808   ;;  %v327_v11 = vlaneseq (!%p212_p3)  ;;  %v2958_v17 = vmov (!%p212_p3), 1934713408   ;;  %vm2960_vm0 = vmmov (!%p212_p3), 0  }
   0x7   : > { %215 = sbr.rel (%p212_p3) target bundleno = 1249 (0x4e1), region = 36  ;;  %v325_v10 = vunpack.c.l.s4 (!%p212_p3), %v2957_v9  ;;  %v358_v18 = vunpack.c.l.s4 (!%p212_p3), %v2958_v17  ;;  %vm1107_vm1 = vcmask (!%p212_p3), 64512   ;;  %vm2672_vm4 = vcmask (!%p212_p3), 60416  }
   0x8   : > { %v3014_v14 = vshrl.u32 (!%p212_p3), %v327_v11, 7 }
   0x9   : > { %v326_v13 = vunpack.c.0.s8 (!%p212_p3), %v325_v10  ;;  %v359_v24 = vunpack.c.0.s8 (!%p212_p3), %v358_v18 }
   0xb   : > { %v3017_v20 = vsub.s32 (!%p212_p3), %v326_v13, %v3014_v14  ;;  %v3022_v33 = vsub.s32 (!%p212_p3), %v359_v24, %v3014_v14 }
   0xe   : > { %s3201_s15 = smov (!%p259_p4, %s2947_s15), 1 }
   0xf   : > { %s3008_s19 = sshll.u32 %s3201_s15, 5  ;;  %s280_s5 = scalar_lea.vmem %s3194_s3, %s3201_s15 }
  0x10   : > { %s272_s22 = scalar_lea.vmem %s3192_s1, %s3008_s19  ;;  %s277_s25 = scalar_lea.vmem %s3193_s2, %s3008_s19 }
  0x11   : > { %v309_v0 = vld [vmem:[%s272_s22 + $0x8] sm:$0xf]  ;;  %v307_v1 = vld [vmem:[%s272_s22] sm:$0xf]  ;;  %v310_v2 = vld [vmem:[%s272_s22 + $0xc] sm:$0xf]  ;;  %s266_s28 = scalar_lea.vmem %s3191_s0, %s3008_s19  ;;  %s289_s8 = scalar_lea.vmem %s3195_s4, %s3008_s19 }
  0x12   : > { %455 = vxpose.xlu1.b32.start.end [1/1] (short) (narrow) %v309_v0, 8  ;;  %391 = vxpose.xlu0.b32.start.end [1/1] (short) (narrow) %v307_v1, 8  ;;  %v308_v3 = vld [vmem:[%s272_s22 + $0x4] sm:$0xf]  ;;  %v312_v4 = vld [vmem:[%s272_s22 + $0x14] sm:$0xf] }
  0x13   : > { %v311_v5 = vld [vmem:[%s272_s22 + $0x10] sm:$0xf]  ;;  %v314_v6 = vld [vmem:[%s272_s22 + $0x1c] sm:$0xf]  ;;  %v313_v7 = vld [vmem:[%s272_s22 + $0x18] sm:$0xf] }
  0x14   : > { %v322_v9 = vld [vmem:[%s277_s25 + $0x1c] sm:$0xf]  ;;  %v321_v10 = vld [vmem:[%s277_s25 + $0x18] sm:$0xf]  ;;  %v291_v11 = vld [vmem:[%s266_s28] sm:$0xf] }
  0x15   : > { %v293_v13 = vld [vmem:[%s266_s28 + $0x8] sm:$0xf]  ;;  %v296_v17 = vld [vmem:[%s266_s28 + $0x14] sm:$0xf]  ;;  %v297_v18 = vld [vmem:[%s266_s28 + $0x18] sm:$0xf] }
  0x16   : > { %487 = vxpose.xlu1.b32.start.end [1/1] (short) (narrow) %v310_v2, 8  ;;  %423 = vxpose.xlu0.b32.start.end [1/1] (short) (narrow) %v308_v3, 8  ;;  %v315_v2 = vld [vmem:[%s277_s25] sm:$0xf]  ;;  %v2959_v3 = vmov 0.0  }
  0x17   : > { %2848 = vmatprep.subr.mxu0 %v2959_v3  ;;  %2853 = vmatprep.subr.mxu1 %v2959_v3 }
  0x18   : > { %2850 = vmatprep.mubr.msk.f32.mxu0 %vm2960_vm0, %v2959_v3  ;;  %2855 = vmatprep.mubr.msk.f32.mxu1 %vm2960_vm0, %v2959_v3 }
  0x1a   : > { %551 = vxpose.xlu1.b32.start.end [1/1] (short) (narrow) %v312_v4, 8  ;;  %519 = vxpose.xlu0.b32.start.end [1/1] (short) (narrow) %v311_v5, 8  ;;  %v317_v4 = vld [vmem:[%s277_s25 + $0x8] sm:$0xf]  ;;  %v316_v5 = vld [vmem:[%s277_s25 + $0x4] sm:$0xf] }
  0x1e   : > { %615 = vxpose.xlu1.b32.start.end [1/1] (short) (narrow) %v314_v6, 8  ;;  %583 = vxpose.xlu0.b32.start.end [1/1] (short) (narrow) %v313_v7, 8  ;;  %v318_v6 = vld [vmem:[%s277_s25 + $0xc] sm:$0xf]  ;;  %v320_v7 = vld [vmem:[%s277_s25 + $0x14] sm:$0xf] }
  0x92   : > { %v471_v8 = vpop.trf.xlu1  ;;  %v407_v12 = vpop.trf.xlu0 }
  0x93   : > { %v647_v21 = vcombine.low %v407_v12, %v471_v8  ;;  %v648_v38 = vcombine.high %v407_v12, %v471_v8  ;;  %v319_v8 = vld [vmem:[%s277_s25 + $0x10] sm:$0xf]  ;;  %v292_v12 = vld [vmem:[%s266_s28 + $0x4] sm:$0xf] }
  0x95   : > { %v655_v26 = vrot.slane %v647_v21, %v3017_v20  ;;  %v662_v47 = vrot.slane %v648_v38, %v3017_v20  ;;  %v299_v21 = vmul.f32 0.35355338, %v291_v11 }
  0x96   : > { %v503_v15 = vpop.trf.xlu1  ;;  %v439_v16 = vpop.trf.xlu0 }
  0x97   : > { %v663_v19 = vcombine.low %v439_v16, %v503_v15  ;;  %v664_v34 = vcombine.high %v439_v16, %v503_v15  ;;  %v294_v15 = vld [vmem:[%s266_s28 + $0xc] sm:$0xf]  ;;  %v295_v16 = vld [vmem:[%s266_s28 + $0x10] sm:$0xf] }
  0x98   : > { %v302_v24 = vmul.f32 0.35355338, %v294_v15 }
  0x99   : > { %v671_v25 = vrot.slane %v663_v19, %v3017_v20  ;;  %v678_v43 = vrot.slane %v664_v34, %v3017_v20  ;;  %v298_v19 = vld [vmem:[%s266_s28 + $0x1c] sm:$0xf] }
  0x9a   : > { %v567_v22 = vpop.trf.xlu1  ;;  %v535_v23 = vpop.trf.xlu0 }
  0x9b   : > { %v711_v37 = vcombine.low %v655_v26, %v671_v25  ;;  %v712_v46 = vcombine.high %v655_v26, %v671_v25  ;;  %v727_v53 = vcombine.low %v662_v47, %v678_v43  ;;  %v728_v59 = vcombine.high %v662_v47, %v678_v43 }
  0x9c   : > { %v303_v25 = vmul.f32 0.35355338, %v295_v16 }
  0x9d   : > { %v719_v44 = vrot.slane %v711_v37, %v3022_v33  ;;  %v726_v52 = vrot.slane %v712_v46, %v3022_v33  ;;  %v735_v58 = vrot.slane %v727_v53, %v3022_v33  ;;  %v742_v63 = vrot.slane %v728_v59, %v3022_v33 }
  0x9e   : > { %v631_v27 = vpop.trf.xlu1  ;;  %v599_v28 = vpop.trf.xlu0 }
  0x9f   : > { %v695_v29 = vcombine.low %v567_v22, %v631_v27  ;;  %v696_v30 = vcombine.high %v567_v22, %v631_v27  ;;  %v679_v31 = vcombine.low %v535_v23, %v599_v28  ;;  %v680_v32 = vcombine.high %v535_v23, %v599_v28 }
  0xa0   : > { %v300_v22 = vmul.f32 0.35355338, %v292_v12  ;;  %v301_v23 = vmul.f32 0.35355338, %v293_v13  ;;  %v304_v28 = vmul.f32 0.35355338, %v296_v17 }
  0xa1   : > { %v703_v35 = vrot.slane %v695_v29, %v3017_v20  ;;  %v687_v36 = vrot.slane %v679_v31, %v3017_v20  ;;  %v710_v39 = vrot.slane %v696_v30, %v3017_v20  ;;  %v694_v40 = vrot.slane %v680_v32, %v3017_v20 }
  0xa2   : > { %v305_v29 = vmul.f32 0.35355338, %v297_v18  ;;  %v306_v30 = vmul.f32 0.35355338, %v298_v19  ;;  %v323_v34 = vcombine.low %v299_v21, %v301_v23 }
  0xa3   : > { %v743_v41 = vcombine.low %v687_v36, %v703_v35  ;;  %v744_v42 = vcombine.high %v687_v36, %v703_v35  ;;  %v759_v51 = vcombine.low %v694_v40, %v710_v39  ;;  %v760_v57 = vcombine.high %v694_v40, %v710_v39 }
  0xa4   : > { %v331_v35 = vcombine.low %v300_v22, %v302_v24  ;;  %v339_v36 = vcombine.low %v303_v25, %v305_v29  ;;  %v347_v37 = vcombine.low %v304_v28, %v306_v30 }
  0xa5   : > { %v751_v45 = vrot.slane %v743_v41, %v3022_v33  ;;  %v758_v50 = vrot.slane %v744_v42, %v3022_v33  ;;  %v767_v56 = vrot.slane %v759_v51, %v3022_v33  ;;  %v774_v62 = vrot.slane %v760_v57, %v3022_v33 }
  0xa6   : > { %v330_v42 = vrot.slane %v323_v34, %v3017_v20  ;;  %v338_v43 = vrot.slane %v331_v35, %v3017_v20 }
  0xa7   : > { %v776_v48 = vcombine.high %v719_v44, %v751_v45  ;;  %v775_v49 = vcombine.low %v719_v44, %v751_v45  ;;  %v778_v54 = vcombine.high %v726_v52, %v758_v50  ;;  %v777_v55 = vcombine.low %v726_v52, %v758_v50 }
  0xa8   : > { %v780_v60 = vcombine.high %v735_v58, %v767_v56  ;;  %v779_v61 = vcombine.low %v735_v58, %v767_v56  ;;  %v782_v0 = vcombine.high %v742_v63, %v774_v62  ;;  %v781_v1 = vcombine.low %v742_v63, %v774_v62 }
  0xa9   : > { %815 = vxpose.xlu1.b32.start.end [1/1] (short) (narrow) %v776_v48, 8  ;;  %783 = vxpose.xlu0.b32.start.end [1/1] (short) (narrow) %v775_v49, 8  ;;  %v346_v44 = vrot.slane %v339_v36, %v3017_v20  ;;  %v354_v45 = vrot.slane %v347_v37, %v3017_v20  ;;  %v355_v50 = vcombine.low %v330_v42, %v338_v43 }
  0xab   : > { %v371_v51 = vcombine.low %v346_v44, %v354_v45  ;;  %v372_v58 = vcombine.high %v346_v44, %v354_v45  ;;  %v363_v59 = vrot.slane %v355_v50, %v3022_v33 }
  0xad   : > { %879 = vxpose.xlu1.b32.start.end [1/1] (short) (narrow) %v778_v54, 8  ;;  %847 = vxpose.xlu0.b32.start.end [1/1] (short) (narrow) %v777_v55, 8  ;;  %v356_v54 = vcombine.high %v330_v42, %v338_v43 }
  0xb1   : > { %943 = vxpose.xlu1.b32.start.end [1/1] (short) (narrow) %v780_v60, 8  ;;  %911 = vxpose.xlu0.b32.start.end [1/1] (short) (narrow) %v779_v61, 8  ;;  %v379_v60 = vrot.slane %v371_v51, %v3022_v33 }
  0xb5   : > { %1007 = vxpose.xlu1.b32.start.end [1/1] (short) (narrow) %v782_v0, 8  ;;  %975 = vxpose.xlu0.b32.start.end [1/1] (short) (narrow) %v781_v1, 8 }
  0xb9   : > { %1456 = vxpose.xlu0.b32.start.end [1/1] (short) (narrow) %v315_v2, 8  ;;  %1488 = vxpose.xlu1.b32.start.end [1/1] (short) (narrow) %v316_v5, 8  ;;  %v370_v2 = vrot.slane %v356_v54, %v3022_v33 }
  0xbd   : > { %1520 = vxpose.xlu0.b32.start.end [1/1] (short) (narrow) %v317_v4, 8  ;;  %1616 = vxpose.xlu1.b32.start.end [1/1] (short) (narrow) %v320_v7, 8  ;;  %v386_v4 = vrot.slane %v372_v58, %v3022_v33  ;;  %v388_v7 = vcombine.high %v363_v59, %v379_v60 }
  0xbf   : > { %v389_v12 = vcombine.low %v370_v2, %v386_v4  ;;  %v390_v16 = vcombine.high %v370_v2, %v386_v4 }
  0xc1   : > { %1552 = vxpose.xlu0.b32.start.end [1/1] (short) (narrow) %v318_v6, 8  ;;  %1680 = vxpose.xlu1.b32.start.end [1/1] (short) (narrow) %v322_v9, 8  ;;  %v387_v6 = vcombine.low %v363_v59, %v379_v60 }
  0xc5   : > { %1584 = vxpose.xlu0.b32.start.end [1/1] (short) (narrow) %v319_v8, 8 }
  0xc9   : > { %1648 = vxpose.xlu0.b32.start.end [1/1] (short) (narrow) %v321_v10, 8 }
 0x129   : > { %v831_v26 = vpop.trf.xlu1  ;;  %v799_v27 = vpop.trf.xlu0 }
 0x12d   : > { %v895_v31 = vpop.trf.xlu1  ;;  %v863_v32 = vpop.trf.xlu0 }
 0x12e   : > { %v1047_v38 = vcombine.low %v831_v26, %v895_v31  ;;  %v1039_v39 = vcombine.low %v799_v27, %v863_v32 }
 0x130   : > { %v1054_v46 = vrot.slane %v1047_v38, %v3017_v20  ;;  %v1046_v47 = vrot.slane %v1039_v39, %v3017_v20 }
 0x131   : > { %v959_v40 = vpop.trf.xlu1  ;;  %v927_v41 = vpop.trf.xlu0 }
 0x132   : > { %v1071_v55 = vcombine.low %v1046_v47, %v1054_v46  ;;  %v1072_v63 = vcombine.high %v1046_v47, %v1054_v46 }
 0x134   : > { %v1079_v0 = vrot.slane %v1071_v55, %v3022_v33  ;;  %v1086_v11 = vrot.slane %v1072_v63, %v3022_v33 }
 0x135   : > { %v1023_v48 = vpop.trf.xlu1  ;;  %v991_v49 = vpop.trf.xlu0 }
 0x136   : > { %v1063_v52 = vcombine.low %v959_v40, %v1023_v48  ;;  %v1055_v53 = vcombine.low %v927_v41, %v991_v49 }
 0x138   : > { %v1070_v56 = vrot.slane %v1063_v52, %v3017_v20  ;;  %v1062_v57 = vrot.slane %v1055_v53, %v3017_v20 }
 0x139   : > { %v1472_v10 = vpop.trf.xlu0  ;;  %v1504_v21 = vpop.trf.xlu1 }
 0x13a   : > { %v1087_v61 = vcombine.low %v1062_v57, %v1070_v56  ;;  %v1088_v62 = vcombine.high %v1062_v57, %v1070_v56 }
 0x13c   : > { %v1095_v1 = vrot.slane %v1087_v61, %v3022_v33  ;;  %v1102_v5 = vrot.slane %v1088_v62, %v3022_v33 }
 0x13d   : > { %v1536_v17 = vpop.trf.xlu0  ;;  %v1632_v29 = vpop.trf.xlu1 }
 0x13e   : > { %v1103_v8 = vcombine.low %v1079_v0, %v1095_v1  ;;  %v1104_v9 = vcombine.high %v1079_v0, %v1095_v1  ;;  %v1105_v13 = vcombine.low %v1086_v11, %v1102_v5  ;;  %v1106_v15 = vcombine.high %v1086_v11, %v1102_v5 }
 0x13f   : > { %v1713_v18 = vcombine.high %v1472_v10, %v1536_v17  ;;  %v1712_v19 = vcombine.low %v1472_v10, %v1536_v17 }
 0x140   : > { %2849 = vmatpush3.msra.mxu0 %v1103_v8  ;;  %2854 = vmatpush3.msra.mxu1 %v1104_v9  ;;  %v2961_v8 = vmov 0  }
 0x141   : > { %2851 = vmatmul.mubr.msk.f32.vlgmr.msra.gmra.mrb[0].mxu0 %vm1107_vm1, %v387_v6  ;;  %2856 = vmatmul.mubr.msk.f32.vlgmr.msra.gmra.mrb[0].mxu1 %vm1107_vm1, %v388_v7  ;;  %v1568_v22 = vpop.trf.xlu0  ;;  %v1727_v23 = vrot.slane %v1713_v18, %v3017_v20  ;;  %v1720_v27 = vrot.slane %v1712_v19, %v3017_v20  ;;  %v1696_v34 = vpop.trf.xlu1  ;;  %v1400_v6 = vld [vmem:[%s280_s5] sm:$0x1]  ;;  %v1405_v7 = vsub.s32 0, %v3014_v14 }
 0x142   : > { %2858 = vmatprep.subr.mxu0 %v2959_v3  ;;  %2863 = vmatprep.subr.mxu1 %v2959_v3  ;;  %v1728_v24 = vcombine.low %v1504_v21, %v1568_v22  ;;  %v1729_v25 = vcombine.high %v1504_v21, %v1568_v22  ;;  %v1760_v37 = vcombine.low %v1632_v29, %v1696_v34  ;;  %vm1401_vm2 = vcmp.gt.s32.totalorder %v1400_v6, 0 }
 0x143   : > { %2859 = vmatpush3.msra.mxu0 %v1105_v13  ;;  %2864 = vmatpush3.msra.mxu1 %v1106_v15  ;;  %v1761_v38 = vcombine.high %v1632_v29, %v1696_v34  ;;  %v1402_v9 = vsel %vm1401_vm2, 1, %v2961_v8 }
 0x144   : > { %2860 = vmatprep.mubr.msk.f32.mxu0 %vm2960_vm0, %v2959_v3  ;;  %2865 = vmatprep.mubr.msk.f32.mxu1 %vm2960_vm0, %v2959_v3  ;;  %v1743_v26 = vrot.slane %v1729_v25, %v3017_v20  ;;  %v1736_v28 = vrot.slane %v1728_v24, %v3017_v20  ;;  %v1768_v42 = vrot.slane %v1760_v37, %v3017_v20 }
 0x145   : > { %2861 = vmatmul.mubr.msk.f32.vlgmr.msra.gmra.mrb[2].mxu0 %vm1107_vm1, %v389_v12  ;;  %2866 = vmatmul.mubr.msk.f32.vlgmr.msra.gmra.mrb[2].mxu1 %vm1107_vm1, %v390_v16  ;;  %v1600_v30 = vpop.trf.xlu0  ;;  %v1775_v43 = vrot.slane %v1761_v38, %v3017_v20  ;;  %v1406_v10 = vrot.slane %v1402_v9, %v1405_v7 }
 0x146   : > { %2868 = vmatprep.subr.mxu0 %v2959_v3  ;;  %2873 = vmatprep.subr.mxu1 %v2959_v3  ;;  %v1792_v31 = vcombine.low %v1727_v23, %v1743_v26  ;;  %v1793_v32 = vcombine.high %v1727_v23, %v1743_v26  ;;  %v1776_v36 = vcombine.low %v1720_v27, %v1736_v28 }
 0x147   : > { %2870 = vmatprep.mubr.msk.f32.mxu0 %vm2960_vm0, %v2959_v3  ;;  %2875 = vmatprep.mubr.msk.f32.mxu1 %vm2960_vm0, %v2959_v3  ;;  %v1777_v41 = vcombine.high %v1720_v27, %v1736_v28  ;;  %vm1407_vm3 = vcmp.eq.s32.totalorder %v1406_v10, 1 }
 0x148   : > { %v1784_v46 = vrot.slane %v1776_v36, %v3022_v33  ;;  %v1800_v58 = vrot.slane %v1792_v31, %v3022_v33  ;;  %v3099_v60 = vrot.slane %v1793_v32, %v3022_v33 }
 0x149   : > { %v1664_v35 = vpop.trf.xlu0  ;;  %v1791_v52 = vrot.slane %v1777_v41, %v3022_v33 }
 0x14a   : > { %v1744_v39 = vcombine.low %v1600_v30, %v1664_v35  ;;  %v1745_v40 = vcombine.high %v1600_v30, %v1664_v35 }
 0x14c   : > { %v1752_v44 = vrot.slane %v1744_v39, %v3017_v20  ;;  %v1759_v45 = vrot.slane %v1745_v40, %v3017_v20 }
 0x14e   : > { %v1824_v47 = vcombine.low %v1759_v45, %v1775_v43  ;;  %v1825_v48 = vcombine.high %v1759_v45, %v1775_v43  ;;  %v1808_v49 = vcombine.low %v1752_v44, %v1768_v42  ;;  %v1809_v50 = vcombine.high %v1752_v44, %v1768_v42 }
 0x150   : > { %v1816_v51 = vrot.slane %v1808_v49, %v3022_v33  ;;  %v1823_v53 = vrot.slane %v1809_v50, %v3022_v33  ;;  %v1832_v59 = vrot.slane %v1824_v47, %v3022_v33  ;;  %v3102_v61 = vrot.slane %v1825_v48, %v3022_v33 }
 0x152   : > { %v1840_v54 = vcombine.low %v1784_v46, %v1816_v51  ;;  %v1841_v55 = vcombine.high %v1784_v46, %v1816_v51  ;;  %v1842_v56 = vcombine.low %v1791_v52, %v1823_v53  ;;  %v1843_v57 = vcombine.high %v1791_v52, %v1823_v53 }
 0x153   : > { %v1844_v62 = vcombine.low %v1800_v58, %v1832_v59  ;;  %v1845_v63 = vcombine.high %v1800_v58, %v1832_v59  ;;  %v1846_v0 = vcombine.low %v3099_v60, %v3102_v61  ;;  %v1847_v1 = vcombine.high %v3099_v60, %v3102_v61 }
 0x154   : > { %1848 = vxpose.xlu0.b32.start.end [1/1] (short) (narrow) %v1840_v54, 8  ;;  %1880 = vxpose.xlu1.b32.start.end [1/1] (short) (narrow) %v1841_v55, 8 }
 0x158   : > { %1912 = vxpose.xlu0.b32.start.end [1/1] (short) (narrow) %v1842_v56, 8 }
 0x15c   : > { %1944 = vxpose.xlu0.b32.start.end [1/1] (short) (narrow) %v1843_v57, 8 }
 0x1d4   : > { %v3108_v2 = vpop.trf.xlu0  ;;  %v1896_v28 = vpop.trf.xlu1 }
 0x1d8   : > { %v3110_v4 = vpop.trf.xlu0 }
 0x1d9   : > { %v2104_v5 = vcombine.low %v3108_v2, %v3110_v4 }
 0x1dc   : > { %v1960_v29 = vpop.trf.xlu0 }
 0x1dd   : > { %v2112_v61 = vcombine.low %v1896_v28, %v1960_v29 }
 0x214   : > { %v1177_v11 = vpop.f32.mrb[0].mxu0  ;;  %v1250_v12 = vpop.f32.mrb[0].mxu1 }
 0x215   : > { %v1408_v13 = vsel %vm1407_vm3, -1e+18, %v1177_v11  ;;  %v1409_v15 = vsel %vm1407_vm3, -1e+18, %v1250_v12  ;;  %v2852_v16 = vpop.f32.mrb[1].mxu0  ;;  %v2857_v17 = vpop.f32.mrb[1].mxu1 }
 0x216   : > { %v1415_v18 = vsel %vm1107_vm1, %v1409_v15, -inf  ;;  %v1412_v19 = vsel %vm1107_vm1, %v1408_v13, -inf }
 0x217   : > { %1416 = vmax.xlane.f32.xlu1 %v1415_v18  ;;  %1413 = vmax.xlane.f32.xlu0 %v1412_v19 }
 0x218   : > { %v1323_v21 = vpop.f32.mrb[2].mxu0  ;;  %v1396_v22 = vpop.f32.mrb[2].mxu1 }
 0x219   : > { %v1410_v23 = vsel %vm1407_vm3, -1e+18, %v1323_v21  ;;  %v2862_v14 = vpop.f32.mrb[3].mxu0  ;;  %v1411_v24 = vsel %vm1407_vm3, -1e+18, %v1396_v22  ;;  %v2867_v25 = vpop.f32.mrb[3].mxu1 }
 0x21a   : > { %v1418_v26 = vsel %vm1107_vm1, %v1410_v23, -inf  ;;  %v1421_v27 = vsel %vm1107_vm1, %v1411_v24, -inf }
 0x21b   : > { %1419 = vmax.xlane.f32.xlu1 %v1418_v26 }
 0x21f   : > { %1422 = vmax.xlane.f32.xlu1 %v1421_v27 }
 0x244   : > { %1976 = vxpose.xlu0.b32.start.end [1/1] (short) (narrow) %v1844_v62, 8 }
 0x252   : > { %2008 = vxpose.xlu1.b32.start.end [1/1] (short) (narrow) %v1845_v63, 8  ;;  %v2111_v63 = vrot.slane %v2104_v5, %v3017_v20 }
 0x2a4   : > { %v1417_v30 = vpop.xlane.xlu1 %1416  ;;  %v1414_v31 = vpop.xlane.xlu0 %1413 }
 0x2a5   : > { %v1425_v32 = vsub.f32 %v1409_v15, %v1417_v30  ;;  %v1424_v34 = vsub.f32 %v1408_v13, %v1414_v31 }
 0x2a7   : > { %v1430_v35 = vmul.f32 1.442695, %v1425_v32  ;;  %v1428_v36 = vmul.f32 1.442695, %v1424_v34 }
 0x2a8   : > { %v1420_v37 = vpop.xlane.xlu1 %1419 }
 0x2a9   : > { %2917 = vpow2.f32 %v1430_v35  ;;  %v1426_v38 = vsub.f32 %v1410_v23, %v1420_v37 }
 0x2aa   : > { %2919 = vpow2.f32 %v1428_v36 }
 0x2ab   : > { %v1432_v39 = vmul.f32 1.442695, %v1426_v38 }
 0x2ac   : > { %v1423_v40 = vpop.xlane.xlu1 %1422 }
 0x2ad   : > { %2921 = vpow2.f32 %v1432_v39  ;;  %v1427_v41 = vsub.f32 %v1411_v24, %v1423_v40 }
 0x2af   : > { %v1434_v42 = vmul.f32 1.442695, %v1427_v41 }
 0x2b1   : > { %2923 = vpow2.f32 %v1434_v42 }
 0x2b3   : > { %v2918_v43 = vpop.eup %2917 }
 0x2b4   : > { %v2920_v44 = vpop.eup %2919  ;;  %v1439_v45 = vsel %vm1107_vm1, %v2918_v43, 0.0 }
 0x2b5   : > { %v1436_v46 = vsel %vm1107_vm1, %v2920_v44, 0.0  ;;  %1440 = vadd.xlane.f32.xlu1 %v1439_v45 }
 0x2b6   : > { %1437 = vadd.xlane.f32.xlu0 %v1436_v46 }
 0x2b7   : > { %v2922_v47 = vpop.eup %2921 }
 0x2b8   : > { %v1442_v48 = vsel %vm1107_vm1, %v2922_v47, 0.0 }
 0x2b9   : > { %1443 = vadd.xlane.f32.xlu1 %v1442_v48 }
 0x2bb   : > { %v2924_v49 = vpop.eup %2923 }
 0x2bc   : > { %v1445_v50 = vsel %vm1107_vm1, %v2924_v49, 0.0 }
 0x2bd   : > { %1446 = vadd.xlane.f32.xlu1 %v1445_v50 }
 0x2c4   : > { %v1992_v52 = vpop.trf.xlu0 }
 0x2d2   : > { %v2024_v51 = vpop.trf.xlu1 }
 0x2e3   : > { %2040 = vxpose.xlu0.b32.start.end [1/1] (short) (narrow) %v1846_v0, 8  ;;  %v2119_v0 = vrot.slane %v2112_v61, %v3017_v20 }
 0x2e5   : > { %v2136_v8 = vcombine.low %v2111_v63, %v2119_v0  ;;  %v2137_v16 = vcombine.high %v2111_v63, %v2119_v0 }
 0x2e7   : > { %v2144_v17 = vrot.slane %v2136_v8, %v3022_v33  ;;  %v2151_v22 = vrot.slane %v2137_v16, %v3022_v33 }
 0x2f0   : > { %2072 = vxpose.xlu1.b32.start.end [1/1] (short) (narrow) %v1847_v1, 8 }
 0x342   : > { %v1441_v53 = vpop.xlane.xlu1 %1440 }
 0x343   : > { %v1438_v54 = vpop.xlane.xlu0 %1437  ;;  %2925 = vrcp.f32 %v1441_v53 }
 0x344   : > { %2927 = vrcp.f32 %v1438_v54 }
 0x346   : > { %v1444_v59 = vpop.xlane.xlu1 %1443 }
 0x347   : > { %2929 = vrcp.f32 %v1444_v59 }
 0x34a   : > { %v1447_v60 = vpop.xlane.xlu1 %1446 }
 0x34b   : > { %2931 = vrcp.f32 %v1447_v60 }
 0x34d   : > { %v2926_v55 = vpop.eup %2925 }
 0x34e   : > { %v2928_v56 = vpop.eup %2927  ;;  %v1453_v57 = vmul.f32 %v2926_v55, %v2918_v43 }
 0x34f   : > { %v1452_v58 = vmul.f32 %v2928_v56, %v2920_v44 }
 0x350   : > { %2874 = vmatpush3.xpose.msk.msra.mxu1 %vm1107_vm1, %v1453_v57 }
 0x351   : > { %2869 = vmatpush3.xpose.msk.msra.mxu0 %vm1107_vm1, %v1452_v58  ;;  %2883 = vmatprep.subr.mxu1 %v2959_v3  ;;  %v2930_v13 = vpop.eup %2929 }
 0x352   : > { %2878 = vmatprep.subr.mxu0 %v2959_v3  ;;  %v1454_v19 = vmul.f32 %v2930_v13, %v2922_v47 }
 0x355   : > { %v2932_v15 = vpop.eup %2931 }
 0x356   : > { %v1455_v21 = vmul.f32 %v2932_v15, %v2924_v49 }
 0x363   : > { %v2056_v62 = vpop.trf.xlu0 }
 0x364   : > { %v2120_v1 = vcombine.low %v1992_v52, %v2056_v62 }
 0x366   : > { %v2127_v9 = vrot.slane %v2120_v1, %v3017_v20 }
 0x370   : > { %v2088_v6 = vpop.trf.xlu1 }
 0x371   : > { %v2128_v7 = vcombine.low %v2024_v51, %v2088_v6 }
 0x373   : > { %v2135_v10 = vrot.slane %v2128_v7, %v3017_v20 }
 0x375   : > { %v2152_v11 = vcombine.low %v2127_v9, %v2135_v10  ;;  %v2153_v12 = vcombine.high %v2127_v9, %v2135_v10 }
 0x377   : > { %v2160_v2 = vrot.slane %v2152_v11, %v3022_v33  ;;  %v2167_v4 = vrot.slane %v2153_v12, %v3022_v33 }
 0x379   : > { %v2168_v5 = vcombine.low %v2144_v17, %v2160_v2  ;;  %v2169_v18 = vcombine.high %v2144_v17, %v2160_v2  ;;  %v2170_v23 = vcombine.low %v2151_v22, %v2167_v4  ;;  %v2171_v14 = vcombine.high %v2151_v22, %v2167_v4 }
 0x37b   : > { %2871 = vmatmul.mubr.msk.f32.vlgmr.msra.gmra.mrb[4].mxu0 %vm1107_vm1, %v2168_v5  ;;  %2876 = vmatmul.mubr.msk.f32.vlgmr.msra.gmra.mrb[4].mxu1 %vm1107_vm1, %v2169_v18 }
 0x37c   : > { %2879 = vmatpush3.xpose.msk.msra.mxu0 %vm1107_vm1, %v1454_v19  ;;  %2884 = vmatpush3.xpose.msk.msra.mxu1 %vm1107_vm1, %v1455_v21 }
 0x37d   : > { %2880 = vmatprep.mubr.msk.f32.mxu0 %vm2960_vm0, %v2959_v3  ;;  %2885 = vmatprep.mubr.msk.f32.mxu1 %vm2960_vm0, %v2959_v3 }
 0x37f   : > { %2881 = vmatmul.mubr.msk.f32.vlgmr.msra.gmra.mrb[6].mxu0 %vm1107_vm1, %v2170_v23  ;;  %2886 = vmatmul.mubr.msk.f32.vlgmr.msra.gmra.mrb[6].mxu1 %vm1107_vm1, %v2171_v14 }
 0x44e   : > { %v2244_v24 = vpop.f32.mrb[4].mxu0  ;;  %v2320_v25 = vpop.f32.mrb[4].mxu1 }
 0x44f   : > { %2508 = vxpose.xlu1.b32.start.end [1/1] (short) (narrow) %v2320_v25, 8  ;;  %v2877_v26 = vpop.f32.mrb[5].mxu1  ;;  %2476 = vxpose.xlu0.b32.start.end [1/1] (short) (narrow) %v2244_v24, 8  ;;  %v2872_v27 = vpop.f32.mrb[5].mxu0 }
 0x452   : > { %v2396_v28 = vpop.f32.mrb[6].mxu0  ;;  %v2472_v29 = vpop.f32.mrb[6].mxu1 }
 0x453   : > { %2572 = vxpose.xlu1.b32.start.end [1/1] (short) (narrow) %v2472_v29, 8  ;;  %v2887_v30 = vpop.f32.mrb[7].mxu1  ;;  %2540 = vxpose.xlu0.b32.start.end [1/1] (short) (narrow) %v2396_v28, 8  ;;  %v2882_v31 = vpop.f32.mrb[7].mxu0 }
 0x4cf   : > { %v2524_v32 = vpop.trf.xlu1  ;;  %v2492_v34 = vpop.trf.xlu0 }
 0x4d3   : > { %v2588_v35 = vpop.trf.xlu1  ;;  %v2556_v36 = vpop.trf.xlu0 }
 0x4d4   : > { %v2620_v37 = vcombine.low %v2524_v32, %v2588_v35  ;;  %v2621_v38 = vcombine.high %v2524_v32, %v2588_v35  ;;  %v2604_v39 = vcombine.low %v2492_v34, %v2556_v36  ;;  %v2605_v40 = vcombine.high %v2492_v34, %v2556_v36 }
 0x4d6   : > { %v2628_v41 = vrot.slane %v2620_v37, %v3017_v20  ;;  %v2635_v42 = vrot.slane %v2621_v38, %v3017_v20  ;;  %v2612_v43 = vrot.slane %v2604_v39, %v3017_v20  ;;  %v2619_v44 = vrot.slane %v2605_v40, %v3017_v20 }
 0x4d8   : > { %v2636_v45 = vcombine.low %v2612_v43, %v2628_v41  ;;  %v2637_v46 = vcombine.high %v2612_v43, %v2628_v41  ;;  %v2652_v47 = vcombine.low %v2619_v44, %v2635_v42  ;;  %v2653_v48 = vcombine.high %v2619_v44, %v2635_v42 }
 0x4da   : > { %v2644_v49 = vrot.slane %v2636_v45, %v3022_v33  ;;  %v2651_v50 = vrot.slane %v2637_v46, %v3022_v33  ;;  %v2660_v51 = vrot.slane %v2652_v47, %v3022_v33  ;;  %v2667_v52 = vrot.slane %v2653_v48, %v3022_v33 }
 0x4dc   : > { %v2668_v53 = vcombine.high %v2644_v49, %v2959_v3  ;;  %v2669_v20 = vcombine.high %v2651_v50, %v2959_v3  ;;  %v2670_v54 = vcombine.high %v2660_v51, %v2959_v3  ;;  %v2671_v55 = vcombine.high %v2667_v52, %v2959_v3  ;;  %2673 = vst.msk [vmem:[%s289_s8] sm:$0xf] %vm2672_vm4, %v2644_v49 }
 0x4dd   : > { %2675 = vst.msk [vmem:[%s289_s8 + $0x8] sm:$0xf] %vm2672_vm4, %v2651_v50  ;;  %2677 = vst.msk [vmem:[%s289_s8 + $0x10] sm:$0xf] %vm2672_vm4, %v2660_v51 }
 0x4de   : > { %2679 = vst.msk [vmem:[%s289_s8 + $0x18] sm:$0xf] %vm2672_vm4, %v2667_v52  ;;  %2674 = vst.msk [vmem:[%s289_s8 + $0x4] sm:$0xf] %vm2672_vm4, %v2668_v53 }
 0x4df   : > { %2676 = vst.msk [vmem:[%s289_s8 + $0xc] sm:$0xf] %vm2672_vm4, %v2669_v20  ;;  %2678 = vst.msk [vmem:[%s289_s8 + $0x14] sm:$0xf] %vm2672_vm4, %v2670_v54 }
 0x4e0   : > { %2680 = vst.msk [vmem:[%s289_s8 + $0x1c] sm:$0xf] %vm2672_vm4, %v2671_v55 }
 0x4e1 PF: > { %s14_s17 = sadd.s32 1, %s2955_s17   ;;  %s3196_s15 = smov %s2951_s16 }
 0x4e2   : > { %p11_p5 = scmp.ge.s32.totalorder %s14_s17, 4   ;;  %s3197_s16 = smov %s3199_s18 }
 0x4e4   :  { %13 = sbr.rel (!%p11_p5) target bundleno = 2 (0x2), region = 75 }

// kernel: decoder_forward.29
= control target key start
LH: loop header
LB: loop body
LE: loop exit
PB: predicated region body
PF: predicated region fallthrough
CT: control target
= control target key end

     0   :  { %vm34_vm0 = vcmask 523264   ;;  %vm120_vm1 = vcmask 261120   ;;  %s247_s1 = inlined_call_operand.vmem [shape: f32[64,32], index: 1, kind: input, shape index: {}]   ;;  %s248_s0 = inlined_call_operand.vmem [shape: f32[16,64], index: 0, kind: input, shape index: {}]   ;;  %s249_s2 = inlined_call_operand.vmem [shape: f32[1,32], index: 2, kind: input, shape index: {}]   ;;  %s250_s3 = inlined_call_operand.vmem [shape: f32[16,32], index: 3, kind: input, shape index: {}]   ;;  %s251_s4 = inlined_call_operand.vmem [shape: f32[16,32], index: 4, kind: output, shape index: {}]  }
   0x1   :  { %v19_v0 = vld [vmem:[%s247_s1] sm:$0xff]  ;;  %v20_v1 = vld [vmem:[%s247_s1 + $0x8] sm:$0xff]  ;;  %v21_v2 = vld [vmem:[%s247_s1 + $0x10] sm:$0xff] }
   0x2   :  { %v159_v3 = vpack.c.bf16 %v20_v1, %v19_v0  ;;  %v22_v4 = vld [vmem:[%s247_s1 + $0x18] sm:$0xff]  ;;  %v23_v6 = vld [vmem:[%s247_s1 + $0x20] sm:$0xff]  ;;  %v24_v7 = vld [vmem:[%s247_s1 + $0x28] sm:$0xff] }
   0x3   :  { %v163_v5 = vpack.c.bf16 %v22_v4, %v21_v2  ;;  %v17_v8 = vld [vmem:[%s248_s0] sm:$0xff]  ;;  %v167_v9 = vpack.c.bf16 %v24_v7, %v23_v6  ;;  %v25_v10 = vld [vmem:[%s247_s1 + $0x30] sm:$0xff]  ;;  %v26_v11 = vld [vmem:[%s247_s1 + $0x38] sm:$0xff] }
   0x4   :  { %160 = vmatprep.subr.bf16.mxu0 %v159_v3  ;;  %156 = vmatprep.mubr.msk.f32.mxu0 %vm34_vm0, %v17_v8  ;;  %v171_v12 = vpack.c.bf16 %v26_v11, %v25_v10  ;;  %v18_v13 = vld [vmem:[%s248_s0 + $0x8] sm:$0xff]  ;;  %v127_v14 = vld [vmem:[%s249_s2] ss:$0 sm:$0xff] }
   0x5   :  { %162 = vmatpush3.bf16.msra.mxu0 %v159_v3  ;;  %v117_v16 = vld [vmem:[%s250_s3 + $0x8] sm:$0xff]  ;;  %v116_v19 = vld [vmem:[%s250_s3] sm:$0xff] }
   0x6   :  { %164 = vmatprep.subr.bf16.mxu0 %v163_v5 }
   0x9   :  { %166 = vmatpush3.bf16.msra.mxu0 %v163_v5 }
   0xa   :  { %168 = vmatprep.subr.bf16.mxu0 %v167_v9 }
   0xd   :  { %170 = vmatpush3.bf16.msra.mxu0 %v167_v9 }
   0xe   :  { %172 = vmatprep.subr.bf16.mxu0 %v171_v12 }
  0x11   :  { %174 = vmatpush3.bf16.msra.mxu0 %v171_v12 }
  0x14   :  { %157 = vmatmul.mubr.msk.f32.vlgmr.msra.gmra.mrb[0].mxu0 %vm34_vm0, %v18_v13 }
  0xe7   :  { %v158_v15 = vpop.f32.mrb[0].mxu0 }
  0xe8   :  { %v113_v17 = vadd.f32 %v158_v15, %v127_v14  ;;  %v107_v18 = vpop.f32.mrb[1].mxu0 }
  0xe9   :  { %v108_v20 = vadd.f32 %v127_v14, %v107_v18 }
  0xea   :  { %v119_v21 = vadd.f32 %v117_v16, %v113_v17 }
  0xeb   :  { %v118_v22 = vadd.f32 %v116_v19, %v108_v20 }
  0xec   :  { %122 = vst.msk [vmem:[%s251_s4 + $0x8] sm:$0xff] %vm120_vm1, %v119_v21 }
  0xed   :  { %121 = vst.msk [vmem:[%s251_s4] sm:$0xff] %vm120_vm1, %v118_v22 }

// kernel: decoder_forward.39
= control target key start
LH: loop header
LB: loop body
LE: loop exit
PB: predicated region body
PF: predicated region fallthrough
CT: control target
= control target key end

     0   :  { %vm17_vm0 = vcmask 261120   ;;  %s185_s0 = inlined_call_operand.vmem [shape: f32[16,32], index: 0, kind: input, shape index: {}]   ;;  %s186_s1 = inlined_call_operand.vmem [shape: f32[1,32], index: 1, kind: input, shape index: {}]   ;;  %s187_s2 = inlined_call_operand.vmem [shape: f32[1,32], index: 2, kind: input, shape index: {}]   ;;  %s188_s3 = inlined_call_operand.hbm [shape: f32[16,32], index: 3, kind: output, shape index: {}]  }
   0x1   :  { %v15_v0 = vld [vmem:[%s185_s0] sm:$0xff]  ;;  %v16_v1 = vld [vmem:[%s185_s0 + $0x8] sm:$0xff] }
   0x2   :  { %v18_v2 = vsel %vm17_vm0, %v15_v0, 0.0 }
   0x3   :  { %8 = vsyncpa [#allocation3], 0  ;;  %19 = vadd.xlane.f32.xlu0 %v18_v2  ;;  %v21_v3 = vsel %vm17_vm0, %v16_v1, 0.0  ;;  %v95_v30 = vld [vmem:[%s186_s1] ss:$0 sm:$0xff]  ;;  %s132_s19 = smov [#allocation2]  }
   0x4   :  { %v96_v33 = vld [vmem:[%s187_s2] ss:$0 sm:$0xff]  ;;  %s84_s20 = sshll.u32 %s132_s19, 4  ;;  %s85_s20 = int_to_ptr.vmem [resolvable:$true] %s84_s20 }
   0x5   :  { %s108_s1 = scalar_lea.vmem %s85_s20, 256  ;;  %p113_p1 = scmp.lt.s32.totalorder %s85_s20, %s85_s20 }
   0x6   :  { %p109_p0 = scmp.ne.s32.totalorder %s85_s20, %s108_s1  ;;  %p114_p2 = scmp.lt.s32.totalorder %s108_s1, %s108_s1 }
   0x7   :  { %22 = vadd.xlane.f32.xlu0 %v21_v3 }
   0x8   :  { %p115_p3 = por %p114_p2, %p113_p1 }
   0xa   :  { %p116_p4 = pnand %p115_p3, %p109_p0 }
  0x90   :  { %v20_v4 = vpop.xlane.xlu0 %19 }
  0x91   :  { %v25_v5 = vmul.f32 0.03125, %v20_v4 }
  0x93   :  { %v27_v6 = vsub.f32 %v15_v0, %v25_v5 }
  0x94   :  { %v23_v7 = vpop.xlane.xlu0 %22 }
  0x95   :  { %v26_v8 = vmul.f32 0.03125, %v23_v7  ;;  %v29_v9 = vmul.f32 %v27_v6, %v27_v6  ;;  %v64_v31 = vmul.f32 %v95_v30, %v27_v6 }
  0x97   :  { %v28_v10 = vsub.f32 %v16_v1, %v26_v8  ;;  %v31_v11 = vsel %vm17_vm0, %v29_v9, 0.0 }
  0x98   :  { %32 = vadd.xlane.f32.xlu1 %v31_v11 }
  0x99   :  { %v30_v12 = vmul.f32 %v28_v10, %v28_v10  ;;  %v65_v35 = vmul.f32 %v95_v30, %v28_v10 }
  0x9b   :  { %v34_v13 = vsel %vm17_vm0, %v30_v12, 0.0 }
  0x9c   :  { %35 = vadd.xlane.f32.xlu1 %v34_v13 }
 0x125   :  { %v33_v14 = vpop.xlane.xlu1 %32 }
 0x126   :  { %v37_v15 = vmul.f32 0.032258064, %v33_v14 }
 0x128   :  { %100 = vrsqrt.f32 %v37_v15  ;;  %vm41_vm1 = vcmp.eq.f32.partialorder %v37_v15, inf  ;;  %v44_v20 = vand.u32 2147483648, %v37_v15  ;;  %vm43_vm2 = vcmp.eq.f32.partialorder %v37_v15, 0.0 }
 0x129   :  { %v36_v16 = vpop.xlane.xlu1 %35 }
 0x12a   :  { %v38_v17 = vmul.f32 0.032258064, %v36_v16 }
 0x12c   :  { %102 = vrsqrt.f32 %v38_v17  ;;  %vm48_vm3 = vcmp.eq.f32.partialorder %v38_v17, inf  ;;  %v51_v26 = vand.u32 2147483648, %v38_v17  ;;  %vm50_vm4 = vcmp.eq.f32.partialorder %v38_v17, 0.0 }
 0x132   :  { %v101_v18 = vpop.eup %100 }
 0x133   :  { %v40_v19 = vmul.f32 %v101_v18, %v37_v15 }
 0x135   :  { %v42_v21 = vsel %vm41_vm1, %v37_v15, %v40_v19 }
 0x136   :  { %v103_v22 = vpop.eup %102  ;;  %v45_v23 = vsel %vm43_vm2, %v44_v20, %v42_v21 }
 0x137   :  { %v53_v24 = vadd.f32 1e-06, %v45_v23  ;;  %v47_v25 = vmul.f32 %v103_v22, %v38_v17 }
 0x139   :  { %104 = vrcp.f32 %v53_v24  ;;  %v49_v27 = vsel %vm48_vm3, %v38_v17, %v47_v25 }
 0x13a   :  { %v52_v28 = vsel %vm50_vm4, %v51_v26, %v49_v27 }
 0x13b   :  { %v54_v29 = vadd.f32 1e-06, %v52_v28 }
 0x13d   :  { %106 = vrcp.f32 %v54_v29 }
 0x143   :  { %v105_v32 = vpop.eup %104 }
 0x144   :  { %v66_v34 = vmul.f32 %v105_v32, %v64_v31 }
 0x146   :  { %v75_v36 = vadd.f32 %v96_v33, %v66_v34 }
 0x147   :  { %v107_v37 = vpop.eup %106 }
 0x148   :  { %v67_v38 = vmul.f32 %v107_v37, %v65_v35  ;;  %77 = vst.msk [vmem:[#allocation2] sm:$0xff] %vm17_vm0, %v75_v36 }
 0x14a   :  { %v76_v39 = vadd.f32 %v96_v33, %v67_v38 }
 0x14c   :  { %78 = vst.msk [vmem:[#allocation2 + $0x8] sm:$0xff] %vm17_vm0, %v76_v39 }
 0x14d   :  { %119 = shalt.err (!%p116_p4)
}
 0x14e   :  { %s120_s22 = scalar_lea.hbm %s188_s3, 256 }
 0x14f   :  { %p121_p5 = scmp.ne.s32.totalorder %s188_s3, %s120_s22  ;;  %p124_p6 = scmp.lt.u32.totalorder %s120_s22, %s188_s3 }
 0x151   :  { %p126_p7 = pnand %p124_p6, %p121_p5 }
 0x153   :  { %129 = shalt.err (!%p126_p7)
}
 0x154   :  { %s133_s27 = smov 128   ;;  %s134_s28 = smov 8  }
 0x155   :  { %90 = dma.vmem_to_hbm [thread:$0]  %s85_s20, 256, %s188_s3, [#allocation3], %s133_s27, %s133_s27, %s134_s28  }
 0x156   :  { %130 = dma.done.wait [#allocation3], 256  }
 0x157   :  { %131 = vsyncadd [#allocation3], 4294967040 }
 0x158   :  { %94 = vsyncpa [#allocation3], 1 }

// kernel: decoder_forward.35
= control target key start
LH: loop header
LB: loop body
LE: loop exit
PB: predicated region body
PF: predicated region fallthrough
CT: control target
= control target key end

     0   :  { %11 = vsyncpa [#allocation3], 0  ;;  %s3484_s0 = inlined_call_operand.vmem [shape: f32[2,8,4,8], index: 0, kind: input, shape index: {}]   ;;  %s3485_s1 = inlined_call_operand.vmem [shape: f32[2,8,4,8], index: 1, kind: input, shape index: {}]   ;;  %s3486_s2 = inlined_call_operand.vmem [shape: f32[2,8,4,8], index: 2, kind: input, shape index: {}]   ;;  %s3487_s3 = inlined_call_operand.vmem [shape: s32[2,1,8], index: 3, kind: input, shape index: {}]   ;;  %s3488_s4 = inlined_call_operand.vmem [shape: f32[2,8,4,8], index: 4, kind: output, shape index: {0}]   ;;  %s3489_s5 = inlined_call_operand.hbm [shape: f32[2,8,8], index: 5, kind: output, shape index: {1}]  }
   0x1   :  { %13 = vsyncpa [#allocation3 + $0x1], 0  ;;  %s3184_s18 = smov 0   ;;  %s3186_s19 = smov 0  }
   0x2   :  { %s3188_s20 = smov 0   ;;  %s3190_s21 = smov 0  }
   0x3   :  { %s3192_s22 = smov 0   ;;  %s3194_s23 = smov 0  }
   0x4 LB: > { %s2902_s24 = sadd.s32 4294967295, %s3146_s23   ;;  %s2903_s25 = sadd.s32 4294967294, %s3146_s23   ;;  %s3146_s23 = sphi %s3194_s23, %s19_s23   ;;  %s3142_s22 = sphi %s3192_s22, %s3496_s22   ;;  %s3138_s21 = sphi %s3190_s21, %s3495_s21   ;;  %s3134_s20 = sphi %s3188_s20, %s3494_s20   ;;  %s3130_s19 = sphi %s3186_s19, %s3493_s19   ;;  %s3126_s18 = sphi %s3184_s18, %s3492_s18  }
   0x5   : > { %s31_s26 = sadd.s32 1, %s3142_s22  ;;  %s174_s27 = sadd.s32 1, %s3134_s20 }
   0x6   : > { %p33_p0 = scmp.ge.s32.totalorder %s31_s26, 2  ;;  %p184_p1 = scmp.ne.s32.totalorder %s3134_s20, %s3130_s19 }
   0x7   : > { %p185_p2 = scmp.eq.s32.totalorder %s2902_s24, 1  ;;  %p190_p3 = scmp.ne.s32.totalorder %s3130_s19, %s3126_s18 }
   0x8   : > { %s3498_s26 = smov (%p33_p0, %s31_s26), 0  ;;  %p191_p5 = scmp.eq.s32.totalorder %s2903_s25, 1 }
   0x9   : > { %p3224_p4 = por %p185_p2, %p184_p1  ;;  %s169_s29 = ssub.s32 %s3142_s22, %s3498_s26 }
   0xa   : > { %p2906_p6 = scmp.ge.s32.totalorder %s3146_s23, 1  ;;  %p172_p7 = scmp.eq.s32.totalorder %s169_s29, 0 }
   0xb   : > { %p3231_p8 = por %p191_p5, %p190_p3  ;;  %p244_p9 = scmp.lt.s32.totalorder %s3146_s23, 3 }
   0xc   : > { %s3237_s6 = scalar_select %p172_p7, %s3134_s20, %s174_s27  }
   0xd   : > { %p245_p10 = pnand %p2906_p6, %p244_p9 }
   0xe   : > { %p299_p11 = scmp.lt.s32.totalorder (!%p245_p10), %s3138_s21, 1  ;;  %v3148_v9 = vmov (!%p245_p10), 1983009808   ;;  %v367_v11 = vlaneseq (!%p245_p10)  ;;  %v3149_v17 = vmov (!%p245_p10), 1934713408   ;;  %vm3151_vm0 = vmmov (!%p245_p10), 0  }
   0xf   : > { %248 = sbr.rel (%p245_p10) target bundleno = 1258 (0x4ea), region = 36  ;;  %v365_v10 = vunpack.c.l.s4 (!%p245_p10), %v3148_v9  ;;  %v398_v18 = vunpack.c.l.s4 (!%p245_p10), %v3149_v17  ;;  %vm1147_vm1 = vcmask (!%p245_p10), 64512   ;;  %s295_s29 = sand.u32 (!%p245_p10), 1, %s3130_s19  }
  0x10   : > { %v3250_v14 = vshrl.u32 (!%p245_p10), %v367_v11, 7  ;;  %s2929_s10 = sshll.u32 (!%p245_p10), %s3138_s21, 7  ;;  %s2740_s15 = scalar_lea.sflag (!%p245_p10), [#allocation3], %s295_s29 }
  0x11   : > { %v366_v13 = vunpack.c.0.s8 (!%p245_p10), %v365_v10  ;;  %v399_v24 = vunpack.c.0.s8 (!%p245_p10), %v398_v18 }
  0x13   : > { %v3253_v20 = vsub.s32 (!%p245_p10), %v366_v13, %v3250_v14  ;;  %v3258_v33 = vsub.s32 (!%p245_p10), %v399_v24, %v3250_v14 }
  0x16   : > { %s3241_s7 = scalar_select %p299_p11, %s3138_s21, 1 }
  0x18   : > { %s3244_s8 = sshll.u32 %s3241_s7, 5  ;;  %s320_s27 = scalar_lea.vmem %s3487_s3, %s3241_s7 }
  0x19   : > { %s312_s11 = scalar_lea.vmem %s3485_s1, %s3244_s8  ;;  %s317_s14 = scalar_lea.vmem %s3486_s2, %s3244_s8 }
  0x1a   : > { %v349_v0 = vld [vmem:[%s312_s11 + $0x8] sm:$0xf]  ;;  %v347_v1 = vld [vmem:[%s312_s11] sm:$0xf]  ;;  %v350_v2 = vld [vmem:[%s312_s11 + $0xc] sm:$0xf]  ;;  %s306_s17 = scalar_lea.vmem %s3484_s0, %s3244_s8 }
  0x1b   : > { %495 = vxpose.xlu1.b32.start.end [1/1] (short) (narrow) %v349_v0, 8  ;;  %431 = vxpose.xlu0.b32.start.end [1/1] (short) (narrow) %v347_v1, 8  ;;  %v348_v3 = vld [vmem:[%s312_s11 + $0x4] sm:$0xf]  ;;  %v352_v4 = vld [vmem:[%s312_s11 + $0x14] sm:$0xf] }
  0x1c   : > { %v351_v5 = vld [vmem:[%s312_s11 + $0x10] sm:$0xf]  ;;  %v354_v6 = vld [vmem:[%s312_s11 + $0x1c] sm:$0xf]  ;;  %v353_v7 = vld [vmem:[%s312_s11 + $0x18] sm:$0xf] }
  0x1d   : > { %v362_v9 = vld [vmem:[%s317_s14 + $0x1c] sm:$0xf]  ;;  %v361_v10 = vld [vmem:[%s317_s14 + $0x18] sm:$0xf]  ;;  %v331_v11 = vld [vmem:[%s306_s17] sm:$0xf] }
  0x1e   : > { %v333_v13 = vld [vmem:[%s306_s17 + $0x8] sm:$0xf]  ;;  %v336_v17 = vld [vmem:[%s306_s17 + $0x14] sm:$0xf]  ;;  %v337_v18 = vld [vmem:[%s306_s17 + $0x18] sm:$0xf] }
  0x1f   : > { %527 = vxpose.xlu1.b32.start.end [1/1] (short) (narrow) %v350_v2, 8  ;;  %463 = vxpose.xlu0.b32.start.end [1/1] (short) (narrow) %v348_v3, 8  ;;  %v355_v2 = vld [vmem:[%s317_s14] sm:$0xf]  ;;  %v3150_v3 = vmov 0.0   ;;  %s3369_s7 = sshll.u32 %s295_s29, 3 }
  0x20   : > { %2952 = vmatprep.subr.mxu0 %v3150_v3  ;;  %2957 = vmatprep.subr.mxu1 %v3150_v3  ;;  %s297_s9 = scalar_lea.vmem [#allocation2], %s3369_s7 }
  0x21   : > { %2954 = vmatprep.mubr.msk.f32.mxu0 %vm3151_vm0, %v3150_v3  ;;  %2959 = vmatprep.mubr.msk.f32.mxu1 %vm3151_vm0, %v3150_v3  ;;  %s2758_s11 = sshll.u32 %s297_s9, 4  ;;  %s2759_s11 = int_to_ptr.vmem [resolvable:$true] %s2758_s11 }
  0x22   : > { %s3068_s16 = scalar_lea.vmem %s2759_s11, 128 }
  0x23   : > { %591 = vxpose.xlu1.b32.start.end [1/1] (short) (narrow) %v352_v4, 8  ;;  %559 = vxpose.xlu0.b32.start.end [1/1] (short) (narrow) %v351_v5, 8  ;;  %v357_v4 = vld [vmem:[%s317_s14 + $0x8] sm:$0xf]  ;;  %v356_v5 = vld [vmem:[%s317_s14 + $0x4] sm:$0xf]  ;;  %p3069_p12 = scmp.ne.s32.totalorder %s2759_s11, %s3068_s16 }
  0x25   : > { %p3070_p13 = pnand %p3069_p12, %p3224_p4 }
  0x27   : > { %655 = vxpose.xlu1.b32.start.end [1/1] (short) (narrow) %v354_v6, 8  ;;  %623 = vxpose.xlu0.b32.start.end [1/1] (short) (narrow) %v353_v7, 8  ;;  %v358_v6 = vld [vmem:[%s317_s14 + $0xc] sm:$0xf]  ;;  %v360_v7 = vld [vmem:[%s317_s14 + $0x14] sm:$0xf]  ;;  %p3071_p0 = pneg %p3070_p13 }
  0x9b   : > { %v511_v8 = vpop.trf.xlu1  ;;  %v447_v12 = vpop.trf.xlu0 }
  0x9c   : > { %v687_v21 = vcombine.low %v447_v12, %v511_v8  ;;  %v688_v38 = vcombine.high %v447_v12, %v511_v8  ;;  %v359_v8 = vld [vmem:[%s317_s14 + $0x10] sm:$0xf]  ;;  %v332_v12 = vld [vmem:[%s306_s17 + $0x4] sm:$0xf]  ;;  %s3417_s14 = scalar_lea.hbm %s3489_s5, %s2929_s10 }
  0x9e   : > { %v695_v26 = vrot.slane %v687_v21, %v3253_v20  ;;  %v702_v47 = vrot.slane %v688_v38, %v3253_v20  ;;  %v339_v21 = vmul.f32 0.35355338, %v331_v11 }
  0x9f   : > { %v543_v15 = vpop.trf.xlu1  ;;  %v479_v16 = vpop.trf.xlu0 }
  0xa0   : > { %v703_v19 = vcombine.low %v479_v16, %v543_v15  ;;  %v704_v34 = vcombine.high %v479_v16, %v543_v15  ;;  %v334_v15 = vld [vmem:[%s306_s17 + $0xc] sm:$0xf]  ;;  %v335_v16 = vld [vmem:[%s306_s17 + $0x10] sm:$0xf] }
  0xa1   : > { %v342_v24 = vmul.f32 0.35355338, %v334_v15 }
  0xa2   : > { %v711_v25 = vrot.slane %v703_v19, %v3253_v20  ;;  %v718_v43 = vrot.slane %v704_v34, %v3253_v20  ;;  %v338_v19 = vld [vmem:[%s306_s17 + $0x1c] sm:$0xf]  ;;  %s3153_s17 = smov [#allocation2]  }
  0xa3   : > { %v607_v22 = vpop.trf.xlu1  ;;  %v575_v23 = vpop.trf.xlu0  ;;  %s3072_s24 = sshll.u32 %s3153_s17, 4  ;;  %s3073_s24 = int_to_ptr.vmem [resolvable:$false] %s3072_s24 }
  0xa4   : > { %v751_v37 = vcombine.low %v695_v26, %v711_v25  ;;  %v752_v46 = vcombine.high %v695_v26, %v711_v25  ;;  %v767_v53 = vcombine.low %v702_v47, %v718_v43  ;;  %v768_v59 = vcombine.high %v702_v47, %v718_v43  ;;  %s3074_s25 = scalar_lea.vmem %s3073_s24, 256  ;;  %p3075_p1 = scmp.lt.s32.totalorder %s2759_s11, %s3073_s24 }
  0xa5   : > { %v343_v25 = vmul.f32 0.35355338, %v335_v16  ;;  %p3076_p2 = scmp.lt.s32.totalorder %s3074_s25, %s3068_s16 }
  0xa6   : > { %v759_v44 = vrot.slane %v751_v37, %v3258_v33  ;;  %v766_v52 = vrot.slane %v752_v46, %v3258_v33  ;;  %v775_v58 = vrot.slane %v767_v53, %v3258_v33  ;;  %v782_v63 = vrot.slane %v768_v59, %v3258_v33 }
  0xa7   : > { %v671_v27 = vpop.trf.xlu1  ;;  %v639_v28 = vpop.trf.xlu0  ;;  %p3077_p3 = por %p3076_p2, %p3075_p1 }
  0xa8   : > { %v735_v29 = vcombine.low %v607_v22, %v671_v27  ;;  %v736_v30 = vcombine.high %v607_v22, %v671_v27  ;;  %v719_v31 = vcombine.low %v575_v23, %v639_v28  ;;  %v720_v32 = vcombine.high %v575_v23, %v639_v28 }
  0xa9   : > { %v340_v22 = vmul.f32 0.35355338, %v332_v12  ;;  %v341_v23 = vmul.f32 0.35355338, %v333_v13  ;;  %v344_v28 = vmul.f32 0.35355338, %v336_v17  ;;  %p3078_p5 = pnand %p3077_p3, %p3071_p0 }
  0xaa   : > { %v743_v35 = vrot.slane %v735_v29, %v3253_v20  ;;  %v727_v36 = vrot.slane %v719_v31, %v3253_v20  ;;  %v750_v39 = vrot.slane %v736_v30, %v3253_v20  ;;  %v734_v40 = vrot.slane %v720_v32, %v3253_v20 }
  0xab   : > { %v345_v29 = vmul.f32 0.35355338, %v337_v18  ;;  %v346_v30 = vmul.f32 0.35355338, %v338_v19  ;;  %v363_v34 = vcombine.low %v339_v21, %v341_v23 }
  0xac   : > { %v783_v41 = vcombine.low %v727_v36, %v743_v35  ;;  %v784_v42 = vcombine.high %v727_v36, %v743_v35  ;;  %v799_v51 = vcombine.low %v734_v40, %v750_v39  ;;  %v800_v57 = vcombine.high %v734_v40, %v750_v39 }
  0xad   : > { %v371_v35 = vcombine.low %v340_v22, %v342_v24  ;;  %v379_v36 = vcombine.low %v343_v25, %v345_v29  ;;  %v387_v37 = vcombine.low %v344_v28, %v346_v30 }
  0xae   : > { %v791_v45 = vrot.slane %v783_v41, %v3258_v33  ;;  %v798_v50 = vrot.slane %v784_v42, %v3258_v33  ;;  %v807_v56 = vrot.slane %v799_v51, %v3258_v33  ;;  %v814_v62 = vrot.slane %v800_v57, %v3258_v33 }
  0xaf   : > { %v370_v42 = vrot.slane %v363_v34, %v3253_v20  ;;  %v378_v43 = vrot.slane %v371_v35, %v3253_v20 }
  0xb0   : > { %v816_v48 = vcombine.high %v759_v44, %v791_v45  ;;  %v815_v49 = vcombine.low %v759_v44, %v791_v45  ;;  %v818_v54 = vcombine.high %v766_v52, %v798_v50  ;;  %v817_v55 = vcombine.low %v766_v52, %v798_v50 }
  0xb1   : > { %v820_v60 = vcombine.high %v775_v58, %v807_v56  ;;  %v819_v61 = vcombine.low %v775_v58, %v807_v56  ;;  %v822_v0 = vcombine.high %v782_v63, %v814_v62  ;;  %v821_v1 = vcombine.low %v782_v63, %v814_v62 }
  0xb2   : > { %855 = vxpose.xlu1.b32.start.end [1/1] (short) (narrow) %v816_v48, 8  ;;  %823 = vxpose.xlu0.b32.start.end [1/1] (short) (narrow) %v815_v49, 8  ;;  %v386_v44 = vrot.slane %v379_v36, %v3253_v20  ;;  %v394_v45 = vrot.slane %v387_v37, %v3253_v20  ;;  %v395_v50 = vcombine.low %v370_v42, %v378_v43 }
  0xb4   : > { %v411_v51 = vcombine.low %v386_v44, %v394_v45  ;;  %v412_v58 = vcombine.high %v386_v44, %v394_v45  ;;  %v403_v59 = vrot.slane %v395_v50, %v3258_v33 }
  0xb6   : > { %919 = vxpose.xlu1.b32.start.end [1/1] (short) (narrow) %v818_v54, 8  ;;  %887 = vxpose.xlu0.b32.start.end [1/1] (short) (narrow) %v817_v55, 8  ;;  %v396_v54 = vcombine.high %v370_v42, %v378_v43 }
  0xba   : > { %983 = vxpose.xlu1.b32.start.end [1/1] (short) (narrow) %v820_v60, 8  ;;  %951 = vxpose.xlu0.b32.start.end [1/1] (short) (narrow) %v819_v61, 8  ;;  %v419_v60 = vrot.slane %v411_v51, %v3258_v33 }
  0xbe   : > { %1047 = vxpose.xlu1.b32.start.end [1/1] (short) (narrow) %v822_v0, 8  ;;  %1015 = vxpose.xlu0.b32.start.end [1/1] (short) (narrow) %v821_v1, 8 }
  0xc2   : > { %1505 = vxpose.xlu0.b32.start.end [1/1] (short) (narrow) %v355_v2, 8  ;;  %1537 = vxpose.xlu1.b32.start.end [1/1] (short) (narrow) %v356_v5, 8  ;;  %v410_v2 = vrot.slane %v396_v54, %v3258_v33 }
  0xc6   : > { %1569 = vxpose.xlu0.b32.start.end [1/1] (short) (narrow) %v357_v4, 8  ;;  %1665 = vxpose.xlu1.b32.start.end [1/1] (short) (narrow) %v360_v7, 8  ;;  %v426_v4 = vrot.slane %v412_v58, %v3258_v33  ;;  %v428_v7 = vcombine.high %v403_v59, %v419_v60 }
  0xc8   : > { %v429_v12 = vcombine.low %v410_v2, %v426_v4  ;;  %v430_v16 = vcombine.high %v410_v2, %v426_v4 }
  0xca   : > { %1601 = vxpose.xlu0.b32.start.end [1/1] (short) (narrow) %v358_v6, 8  ;;  %1729 = vxpose.xlu1.b32.start.end [1/1] (short) (narrow) %v362_v9, 8  ;;  %v427_v6 = vcombine.low %v403_v59, %v419_v60 }
  0xce   : > { %1633 = vxpose.xlu0.b32.start.end [1/1] (short) (narrow) %v359_v8, 8 }
  0xd2   : > { %1697 = vxpose.xlu0.b32.start.end [1/1] (short) (narrow) %v361_v10, 8 }
 0x132   : > { %v871_v26 = vpop.trf.xlu1  ;;  %v839_v27 = vpop.trf.xlu0 }
 0x136   : > { %v935_v31 = vpop.trf.xlu1  ;;  %v903_v32 = vpop.trf.xlu0 }
 0x137   : > { %v1087_v38 = vcombine.low %v871_v26, %v935_v31  ;;  %v1079_v39 = vcombine.low %v839_v27, %v903_v32 }
 0x139   : > { %v1094_v46 = vrot.slane %v1087_v38, %v3253_v20  ;;  %v1086_v47 = vrot.slane %v1079_v39, %v3253_v20 }
 0x13a   : > { %v999_v40 = vpop.trf.xlu1  ;;  %v967_v41 = vpop.trf.xlu0 }
 0x13b   : > { %v1111_v55 = vcombine.low %v1086_v47, %v1094_v46  ;;  %v1112_v63 = vcombine.high %v1086_v47, %v1094_v46 }
 0x13d   : > { %v1119_v0 = vrot.slane %v1111_v55, %v3258_v33  ;;  %v1126_v11 = vrot.slane %v1112_v63, %v3258_v33 }
 0x13e   : > { %v1063_v48 = vpop.trf.xlu1  ;;  %v1031_v49 = vpop.trf.xlu0 }
 0x13f   : > { %v1103_v52 = vcombine.low %v999_v40, %v1063_v48  ;;  %v1095_v53 = vcombine.low %v967_v41, %v1031_v49 }
 0x141   : > { %v1110_v56 = vrot.slane %v1103_v52, %v3253_v20  ;;  %v1102_v57 = vrot.slane %v1095_v53, %v3253_v20 }
 0x142   : > { %v1521_v10 = vpop.trf.xlu0  ;;  %v1553_v21 = vpop.trf.xlu1 }
 0x143   : > { %v1127_v61 = vcombine.low %v1102_v57, %v1110_v56  ;;  %v1128_v62 = vcombine.high %v1102_v57, %v1110_v56 }
 0x145   : > { %v1135_v1 = vrot.slane %v1127_v61, %v3258_v33  ;;  %v1142_v5 = vrot.slane %v1128_v62, %v3258_v33 }
 0x146   : > { %v1585_v17 = vpop.trf.xlu0  ;;  %v1681_v29 = vpop.trf.xlu1 }
 0x147   : > { %v1143_v8 = vcombine.low %v1119_v0, %v1135_v1  ;;  %v1144_v9 = vcombine.high %v1119_v0, %v1135_v1  ;;  %v1145_v13 = vcombine.low %v1126_v11, %v1142_v5  ;;  %v1146_v15 = vcombine.high %v1126_v11, %v1142_v5 }
 0x148   : > { %v1762_v18 = vcombine.high %v1521_v10, %v1585_v17  ;;  %v1761_v19 = vcombine.low %v1521_v10, %v1585_v17 }
 0x149   : > { %2953 = vmatpush3.msra.mxu0 %v1143_v8  ;;  %2958 = vmatpush3.msra.mxu1 %v1144_v9  ;;  %v3152_v8 = vmov 0  }
 0x14a   : > { %2955 = vmatmul.mubr.msk.f32.vlgmr.msra.gmra.mrb[0].mxu0 %vm1147_vm1, %v427_v6  ;;  %2960 = vmatmul.mubr.msk.f32.vlgmr.msra.gmra.mrb[0].mxu1 %vm1147_vm1, %v428_v7  ;;  %v1617_v22 = vpop.trf.xlu0  ;;  %v1776_v23 = vrot.slane %v1762_v18, %v3253_v20  ;;  %v1769_v27 = vrot.slane %v1761_v19, %v3253_v20  ;;  %v1745_v34 = vpop.trf.xlu1  ;;  %v1440_v6 = vld [vmem:[%s320_s27] sm:$0x1]  ;;  %v1445_v7 = vsub.s32 0, %v3250_v14 }
 0x14b   : > { %2962 = vmatprep.subr.mxu0 %v3150_v3  ;;  %2967 = vmatprep.subr.mxu1 %v3150_v3  ;;  %v1777_v24 = vcombine.low %v1553_v21, %v1617_v22  ;;  %v1778_v25 = vcombine.high %v1553_v21, %v1617_v22  ;;  %v1809_v37 = vcombine.low %v1681_v29, %v1745_v34  ;;  %vm1441_vm2 = vcmp.gt.s32.totalorder %v1440_v6, 0 }
 0x14c   : > { %2963 = vmatpush3.msra.mxu0 %v1145_v13  ;;  %2968 = vmatpush3.msra.mxu1 %v1146_v15  ;;  %v1810_v38 = vcombine.high %v1681_v29, %v1745_v34  ;;  %v1442_v9 = vsel %vm1441_vm2, 1, %v3152_v8 }
 0x14d   : > { %2964 = vmatprep.mubr.msk.f32.mxu0 %vm3151_vm0, %v3150_v3  ;;  %2969 = vmatprep.mubr.msk.f32.mxu1 %vm3151_vm0, %v3150_v3  ;;  %v1792_v26 = vrot.slane %v1778_v25, %v3253_v20  ;;  %v1785_v28 = vrot.slane %v1777_v24, %v3253_v20  ;;  %v1817_v42 = vrot.slane %v1809_v37, %v3253_v20 }
 0x14e   : > { %2965 = vmatmul.mubr.msk.f32.vlgmr.msra.gmra.mrb[2].mxu0 %vm1147_vm1, %v429_v12  ;;  %2970 = vmatmul.mubr.msk.f32.vlgmr.msra.gmra.mrb[2].mxu1 %vm1147_vm1, %v430_v16  ;;  %v1649_v30 = vpop.trf.xlu0  ;;  %v1824_v43 = vrot.slane %v1810_v38, %v3253_v20  ;;  %v1446_v10 = vrot.slane %v1442_v9, %v1445_v7 }
 0x14f   : > { %2972 = vmatprep.subr.mxu0 %v3150_v3  ;;  %2977 = vmatprep.subr.mxu1 %v3150_v3  ;;  %v1841_v31 = vcombine.low %v1776_v23, %v1792_v26  ;;  %v1842_v32 = vcombine.high %v1776_v23, %v1792_v26  ;;  %v1825_v36 = vcombine.low %v1769_v27, %v1785_v28 }
 0x150   : > { %2974 = vmatprep.mubr.msk.f32.mxu0 %vm3151_vm0, %v3150_v3  ;;  %2979 = vmatprep.mubr.msk.f32.mxu1 %vm3151_vm0, %v3150_v3  ;;  %v1826_v41 = vcombine.high %v1769_v27, %v1785_v28  ;;  %vm1447_vm3 = vcmp.eq.s32.totalorder %v1446_v10, 1 }
 0x151   : > { %v1833_v46 = vrot.slane %v1825_v36, %v3258_v33  ;;  %v1849_v58 = vrot.slane %v1841_v31, %v3258_v33  ;;  %v3335_v60 = vrot.slane %v1842_v32, %v3258_v33 }
 0x152   : > { %v1713_v35 = vpop.trf.xlu0  ;;  %v1840_v52 = vrot.slane %v1826_v41, %v3258_v33 }
 0x153   : > { %v1793_v39 = vcombine.low %v1649_v30, %v1713_v35  ;;  %v1794_v40 = vcombine.high %v1649_v30, %v1713_v35 }
 0x155   : > { %v1801_v44 = vrot.slane %v1793_v39, %v3253_v20  ;;  %v1808_v45 = vrot.slane %v1794_v40, %v3253_v20 }
 0x157   : > { %v1873_v47 = vcombine.low %v1808_v45, %v1824_v43  ;;  %v1874_v48 = vcombine.high %v1808_v45, %v1824_v43  ;;  %v1857_v49 = vcombine.low %v1801_v44, %v1817_v42  ;;  %v1858_v50 = vcombine.high %v1801_v44, %v1817_v42 }
 0x159   : > { %v1865_v51 = vrot.slane %v1857_v49, %v3258_v33  ;;  %v1872_v53 = vrot.slane %v1858_v50, %v3258_v33  ;;  %v1881_v59 = vrot.slane %v1873_v47, %v3258_v33  ;;  %v3338_v61 = vrot.slane %v1874_v48, %v3258_v33 }
 0x15b   : > { %v1889_v54 = vcombine.low %v1833_v46, %v1865_v51  ;;  %v1890_v55 = vcombine.high %v1833_v46, %v1865_v51  ;;  %v1891_v56 = vcombine.low %v1840_v52, %v1872_v53  ;;  %v1892_v57 = vcombine.high %v1840_v52, %v1872_v53 }
 0x15c   : > { %v1893_v62 = vcombine.low %v1849_v58, %v1881_v59  ;;  %v1894_v63 = vcombine.high %v1849_v58, %v1881_v59  ;;  %v1895_v0 = vcombine.low %v3335_v60, %v3338_v61  ;;  %v1896_v1 = vcombine.high %v3335_v60, %v3338_v61 }
 0x15d   : > { %1897 = vxpose.xlu0.b32.start.end [1/1] (short) (narrow) %v1889_v54, 8  ;;  %1929 = vxpose.xlu1.b32.start.end [1/1] (short) (narrow) %v1890_v55, 8 }
 0x161   : > { %1961 = vxpose.xlu0.b32.start.end [1/1] (short) (narrow) %v1891_v56, 8 }
 0x165   : > { %1993 = vxpose.xlu0.b32.start.end [1/1] (short) (narrow) %v1892_v57, 8 }
 0x1dd   : > { %v3344_v2 = vpop.trf.xlu0  ;;  %v1945_v37 = vpop.trf.xlu1 }
 0x1e1   : > { %v3346_v4 = vpop.trf.xlu0 }
 0x1e2   : > { %v2153_v5 = vcombine.low %v3344_v2, %v3346_v4 }
 0x1e5   : > { %v2009_v38 = vpop.trf.xlu0 }
 0x21d   : > { %v1217_v11 = vpop.f32.mrb[0].mxu0  ;;  %v1290_v12 = vpop.f32.mrb[0].mxu1 }
 0x21e   : > { %v1448_v13 = vsel %vm1447_vm3, -1e+18, %v1217_v11  ;;  %v1449_v15 = vsel %vm1447_vm3, -1e+18, %v1290_v12  ;;  %v2956_v16 = vpop.f32.mrb[1].mxu0  ;;  %v2961_v17 = vpop.f32.mrb[1].mxu1  ;;  %v2160_v11 = vrot.slane %v2153_v5, %v3253_v20 }
 0x21f   : > { %v1452_v18 = vsel %vm1147_vm1, %v1448_v13, 0.0  ;;  %v1453_v19 = vsel %vm1147_vm1, %v1449_v15, 0.0  ;;  %v1464_v21 = vsel %vm1147_vm1, %v1449_v15, -inf  ;;  %v1461_v14 = vsel %vm1147_vm1, %v1448_v13, -inf }
 0x220   : > { %1465 = vmax.xlane.f32.xlu1 %v1464_v21  ;;  %1462 = vmax.xlane.f32.xlu0 %v1461_v14  ;;  %v1454_v24 = vadd.f32 %v1453_v19, %v1452_v18 }
 0x221   : > { %v1363_v22 = vpop.f32.mrb[2].mxu0  ;;  %v1436_v23 = vpop.f32.mrb[2].mxu1 }
 0x222   : > { %v1450_v25 = vsel %vm1447_vm3, -1e+18, %v1363_v22  ;;  %v2966_v26 = vpop.f32.mrb[3].mxu0  ;;  %v1451_v27 = vsel %vm1447_vm3, -1e+18, %v1436_v23  ;;  %v2971_v28 = vpop.f32.mrb[3].mxu1 }
 0x223   : > { %v1455_v29 = vsel %vm1147_vm1, %v1450_v25, 0.0  ;;  %v1457_v30 = vsel %vm1147_vm1, %v1451_v27, 0.0  ;;  %v1467_v31 = vsel %vm1147_vm1, %v1450_v25, -inf  ;;  %v1470_v34 = vsel %vm1147_vm1, %v1451_v27, -inf }
 0x224   : > { %v1456_v32 = vadd.f32 %v1455_v29, %v1454_v24  ;;  %1468 = vmax.xlane.f32.xlu1 %v1467_v31 }
 0x226   : > { %v1458_v35 = vadd.f32 %v1457_v30, %v1456_v32 }
 0x228   : > { %v1459_v36 = vmul.f32 0.25, %v1458_v35  ;;  %1471 = vmax.xlane.f32.xlu1 %v1470_v34 }
 0x22a   : > { %1460 = vst.msk [vmem:[%s297_s9] sm:$0xff] %vm1147_vm1, %v1459_v36 }
 0x24d   : > { %2025 = vxpose.xlu0.b32.start.end [1/1] (short) (narrow) %v1893_v62, 8 }
 0x25b   : > { %2057 = vxpose.xlu1.b32.start.end [1/1] (short) (narrow) %v1894_v63, 8 }
 0x2ad   : > { %v1466_v39 = vpop.xlane.xlu1 %1465  ;;  %v1463_v40 = vpop.xlane.xlu0 %1462 }
 0x2ae   : > { %v1474_v41 = vsub.f32 %v1449_v15, %v1466_v39  ;;  %v1473_v42 = vsub.f32 %v1448_v13, %v1463_v40 }
 0x2b0   : > { %v1479_v43 = vmul.f32 1.442695, %v1474_v41  ;;  %v1477_v44 = vmul.f32 1.442695, %v1473_v42 }
 0x2b1   : > { %v1469_v45 = vpop.xlane.xlu1 %1468 }
 0x2b2   : > { %3052 = vpow2.f32 %v1479_v43  ;;  %v1475_v46 = vsub.f32 %v1450_v25, %v1469_v45 }
 0x2b3   : > { %3054 = vpow2.f32 %v1477_v44 }
 0x2b4   : > { %v1481_v47 = vmul.f32 1.442695, %v1475_v46 }
 0x2b5   : > { %v1472_v48 = vpop.xlane.xlu1 %1471 }
 0x2b6   : > { %3056 = vpow2.f32 %v1481_v47  ;;  %v1476_v49 = vsub.f32 %v1451_v27, %v1472_v48 }
 0x2b8   : > { %v1483_v50 = vmul.f32 1.442695, %v1476_v49 }
 0x2ba   : > { %3058 = vpow2.f32 %v1483_v50 }
 0x2bc   : > { %v3053_v51 = vpop.eup %3052 }
 0x2bd   : > { %v3055_v52 = vpop.eup %3054  ;;  %v1488_v53 = vsel %vm1147_vm1, %v3053_v51, 0.0 }
 0x2be   : > { %v1485_v54 = vsel %vm1147_vm1, %v3055_v52, 0.0  ;;  %1489 = vadd.xlane.f32.xlu1 %v1488_v53 }
 0x2bf   : > { %1486 = vadd.xlane.f32.xlu0 %v1485_v54 }
 0x2c0   : > { %v3057_v55 = vpop.eup %3056 }
 0x2c1   : > { %v1491_v56 = vsel %vm1147_vm1, %v3057_v55, 0.0 }
 0x2c2   : > { %1492 = vadd.xlane.f32.xlu1 %v1491_v56 }
 0x2c4   : > { %v3059_v57 = vpop.eup %3058 }
 0x2c5   : > { %v1494_v58 = vsel %vm1147_vm1, %v3059_v57, 0.0 }
 0x2c6   : > { %1495 = vadd.xlane.f32.xlu1 %v1494_v58 }
 0x2cd   : > { %v2041_v62 = vpop.trf.xlu0 }
 0x2db   : > { %v2073_v59 = vpop.trf.xlu1 }
 0x2ec   : > { %2089 = vxpose.xlu0.b32.start.end [1/1] (short) (narrow) %v1895_v0, 8  ;;  %v2161_v0 = vcombine.low %v1945_v37, %v2009_v38 }
 0x2ee   : > { %v2168_v12 = vrot.slane %v2161_v0, %v3253_v20 }
 0x2f0   : > { %v2185_v17 = vcombine.low %v2160_v11, %v2168_v12  ;;  %v2186_v24 = vcombine.high %v2160_v11, %v2168_v12 }
 0x2f2   : > { %v2193_v25 = vrot.slane %v2185_v17, %v3258_v33  ;;  %v2200_v29 = vrot.slane %v2186_v24, %v3258_v33 }
 0x2f9   : > { %2121 = vxpose.xlu1.b32.start.end [1/1] (short) (narrow) %v1896_v1, 8 }
 0x34b   : > { %v1490_v63 = vpop.xlane.xlu1 %1489 }
 0x34c   : > { %v1487_v6 = vpop.xlane.xlu0 %1486  ;;  %3060 = vrcp.f32 %v1490_v63 }
 0x34d   : > { %3062 = vrcp.f32 %v1487_v6 }
 0x34f   : > { %v1493_v60 = vpop.xlane.xlu1 %1492 }
 0x350   : > { %3064 = vrcp.f32 %v1493_v60 }
 0x353   : > { %v1496_v61 = vpop.xlane.xlu1 %1495 }
 0x354   : > { %3066 = vrcp.f32 %v1496_v61 }
 0x356   : > { %v3061_v7 = vpop.eup %3060 }
 0x357   : > { %v3063_v8 = vpop.eup %3062  ;;  %v1502_v9 = vmul.f32 %v3061_v7, %v3053_v51 }
 0x358   : > { %v1501_v10 = vmul.f32 %v3063_v8, %v3055_v52 }
 0x359   : > { %2978 = vmatpush3.xpose.msk.msra.mxu1 %vm1147_vm1, %v1502_v9 }
 0x35a   : > { %2973 = vmatpush3.xpose.msk.msra.mxu0 %vm1147_vm1, %v1501_v10  ;;  %2987 = vmatprep.subr.mxu1 %v3150_v3  ;;  %v3065_v22 = vpop.eup %3064 }
 0x35b   : > { %2982 = vmatprep.subr.mxu0 %v3150_v3  ;;  %v1503_v27 = vmul.f32 %v3065_v22, %v3057_v55 }
 0x35e   : > { %v3067_v23 = vpop.eup %3066 }
 0x35f   : > { %v1504_v28 = vmul.f32 %v3067_v23, %v3059_v57 }
 0x36c   : > { %v2105_v1 = vpop.trf.xlu0 }
 0x36d   : > { %v2169_v13 = vcombine.low %v2041_v62, %v2105_v1 }
 0x36f   : > { %v2176_v18 = vrot.slane %v2169_v13, %v3253_v20 }
 0x379   : > { %v2137_v15 = vpop.trf.xlu1 }
 0x37a   : > { %v2177_v16 = vcombine.low %v2073_v59, %v2137_v15 }
 0x37c   : > { %v2184_v19 = vrot.slane %v2177_v16, %v3253_v20 }
 0x37e   : > { %v2201_v21 = vcombine.low %v2176_v18, %v2184_v19  ;;  %v2202_v14 = vcombine.high %v2176_v18, %v2184_v19 }
 0x380   : > { %v2209_v2 = vrot.slane %v2201_v21, %v3258_v33  ;;  %v2216_v4 = vrot.slane %v2202_v14, %v3258_v33 }
 0x382   : > { %v2217_v5 = vcombine.low %v2193_v25, %v2209_v2  ;;  %v2218_v26 = vcombine.high %v2193_v25, %v2209_v2  ;;  %v2219_v30 = vcombine.low %v2200_v29, %v2216_v4  ;;  %v2220_v31 = vcombine.high %v2200_v29, %v2216_v4 }
 0x384   : > { %2975 = vmatmul.mubr.msk.f32.vlgmr.msra.gmra.mrb[4].mxu0 %vm1147_vm1, %v2217_v5  ;;  %2980 = vmatmul.mubr.msk.f32.vlgmr.msra.gmra.mrb[4].mxu1 %vm1147_vm1, %v2218_v26 }
 0x385   : > { %2983 = vmatpush3.xpose.msk.msra.mxu0 %vm1147_vm1, %v1503_v27  ;;  %2988 = vmatpush3.xpose.msk.msra.mxu1 %vm1147_vm1, %v1504_v28 }
 0x386   : > { %2984 = vmatprep.mubr.msk.f32.mxu0 %vm3151_vm0, %v3150_v3  ;;  %2989 = vmatprep.mubr.msk.f32.mxu1 %vm3151_vm0, %v3150_v3 }
 0x388   : > { %2985 = vmatmul.mubr.msk.f32.vlgmr.msra.gmra.mrb[6].mxu0 %vm1147_vm1, %v2219_v30  ;;  %2990 = vmatmul.mubr.msk.f32.vlgmr.msra.gmra.mrb[6].mxu1 %vm1147_vm1, %v2220_v31 }
 0x457   : > { %v2293_v32 = vpop.f32.mrb[4].mxu0  ;;  %v2369_v34 = vpop.f32.mrb[4].mxu1 }
 0x458   : > { %2557 = vxpose.xlu1.b32.start.end [1/1] (short) (narrow) %v2369_v34, 8  ;;  %v2981_v35 = vpop.f32.mrb[5].mxu1  ;;  %2525 = vxpose.xlu0.b32.start.end [1/1] (short) (narrow) %v2293_v32, 8  ;;  %v2976_v36 = vpop.f32.mrb[5].mxu0 }
 0x45b   : > { %v2445_v37 = vpop.f32.mrb[6].mxu0  ;;  %v2521_v38 = vpop.f32.mrb[6].mxu1 }
 0x45c   : > { %2621 = vxpose.xlu1.b32.start.end [1/1] (short) (narrow) %v2521_v38, 8  ;;  %v2991_v39 = vpop.f32.mrb[7].mxu1  ;;  %2589 = vxpose.xlu0.b32.start.end [1/1] (short) (narrow) %v2445_v37, 8  ;;  %v2986_v40 = vpop.f32.mrb[7].mxu0 }
 0x45d   : > { %3081 = shalt.err (!%p3078_p5)
}
 0x45e   : > { %s3082_s21 = scalar_lea.hbm %s3417_s14, 128  ;;  %s3086_s7 = scalar_lea.hbm %s3489_s5, 256 }
 0x45f   : > { %p3083_p6 = scmp.ne.s32.totalorder %s3417_s14, %s3082_s21  ;;  %p3087_p10 = scmp.lt.u32.totalorder %s3417_s14, %s3489_s5 }
 0x460   : > { %p3088_p11 = scmp.lt.u32.totalorder %s3086_s7, %s3082_s21  ;;  %p3090_p13 = scmp.lt.u32.totalorder %s3082_s21, %s3417_s14 }
 0x461   : > { %p3084_p7 = pnand %p3083_p6, %p3224_p4 }
 0x462   : > { %p3089_p12 = por %p3088_p11, %p3087_p10 }
 0x463   : > { %p3085_p9 = pneg %p3084_p7 }
 0x464   : > { %p3091_p0 = por %p3090_p13, %p3089_p12 }
 0x466   : > { %p3092_p1 = pnand %p3091_p0, %p3085_p9 }
 0x468   : > { %3095 = shalt.err (!%p3092_p1)
}
 0x469   : > { %2992 = dma.vmem_to_hbm [thread:$0]  (%p3224_p4), %s2759_s11, 128, %s3417_s14, %s2740_s15   ;;  %vm2721_vm4 = vcmask 60416  }
 0x46a   : > { %s329_s12 = scalar_lea.vmem %s3488_s4, %s3244_s8 }
 0x4d8   : > { %v2573_v41 = vpop.trf.xlu1  ;;  %v2541_v42 = vpop.trf.xlu0 }
 0x4dc   : > { %v2637_v43 = vpop.trf.xlu1  ;;  %v2605_v44 = vpop.trf.xlu0 }
 0x4dd   : > { %v2669_v45 = vcombine.low %v2573_v41, %v2637_v43  ;;  %v2670_v46 = vcombine.high %v2573_v41, %v2637_v43  ;;  %v2653_v47 = vcombine.low %v2541_v42, %v2605_v44  ;;  %v2654_v48 = vcombine.high %v2541_v42, %v2605_v44 }
 0x4df   : > { %v2677_v49 = vrot.slane %v2669_v45, %v3253_v20  ;;  %v2684_v50 = vrot.slane %v2670_v46, %v3253_v20  ;;  %v2661_v51 = vrot.slane %v2653_v47, %v3253_v20  ;;  %v2668_v52 = vrot.slane %v2654_v48, %v3253_v20 }
 0x4e1   : > { %v2685_v53 = vcombine.low %v2661_v51, %v2677_v49  ;;  %v2686_v54 = vcombine.high %v2661_v51, %v2677_v49  ;;  %v2701_v55 = vcombine.low %v2668_v52, %v2684_v50  ;;  %v2702_v56 = vcombine.high %v2668_v52, %v2684_v50 }
 0x4e3   : > { %v2693_v57 = vrot.slane %v2685_v53, %v3258_v33  ;;  %v2700_v58 = vrot.slane %v2686_v54, %v3258_v33  ;;  %v2709_v59 = vrot.slane %v2701_v55, %v3258_v33  ;;  %v2716_v62 = vrot.slane %v2702_v56, %v3258_v33 }
 0x4e5   : > { %v2717_v63 = vcombine.high %v2693_v57, %v3150_v3  ;;  %v2718_v20 = vcombine.high %v2700_v58, %v3150_v3  ;;  %v2719_v6 = vcombine.high %v2709_v59, %v3150_v3  ;;  %v2720_v7 = vcombine.high %v2716_v62, %v3150_v3  ;;  %2722 = vst.msk [vmem:[%s329_s12] sm:$0xf] %vm2721_vm4, %v2693_v57 }
 0x4e6   : > { %2724 = vst.msk [vmem:[%s329_s12 + $0x8] sm:$0xf] %vm2721_vm4, %v2700_v58  ;;  %2726 = vst.msk [vmem:[%s329_s12 + $0x10] sm:$0xf] %vm2721_vm4, %v2709_v59 }
 0x4e7   : > { %2728 = vst.msk [vmem:[%s329_s12 + $0x18] sm:$0xf] %vm2721_vm4, %v2716_v62  ;;  %2723 = vst.msk [vmem:[%s329_s12 + $0x4] sm:$0xf] %vm2721_vm4, %v2717_v63 }
 0x4e8   : > { %2725 = vst.msk [vmem:[%s329_s12 + $0xc] sm:$0xf] %vm2721_vm4, %v2718_v20  ;;  %2727 = vst.msk [vmem:[%s329_s12 + $0x14] sm:$0xf] %vm2721_vm4, %v2719_v6 }
 0x4e9   : > { %2729 = vst.msk [vmem:[%s329_s12 + $0x1c] sm:$0xf] %vm2721_vm4, %v2720_v7 }
 0x4ea PF: > { %p2998_p4 = scmp.ge.s32.totalorder %s3146_s23, 2  ;;  %s2782_s8 = sand.u32 1, %s3126_s18  }
 0x4eb   : > { %s2783_s13 = scalar_lea.sflag [#allocation3], %s2782_s8 }
 0x4ec   : > { %p2995_p2 = pnand %p2998_p4, %p3231_p8 }
 0x4ee   : > { %3121 = dma.done.wait (!%p2995_p2), %s2783_s13, 128  }
 0x4ef   : > { %3123 = vsyncadd (!%p2995_p2), %s2783_s13, 4294967168  ;;  %s19_s23 = sadd.s32 1, %s3146_s23   ;;  %s3492_s18 = smov %s3130_s19 }
 0x4f0   : > { %p16_p3 = scmp.ge.s32.totalorder %s19_s23, 4   ;;  %s3493_s19 = smov %s3134_s20 }
 0x4f1   : > { %s3494_s20 = smov %s3237_s6  ;;  %s3495_s21 = smov %s3142_s22 }
 0x4f2   : > { %s3496_s22 = smov %s3498_s26  ;;  %18 = sbr.rel (!%p16_p3) target bundleno = 4 (0x4), region = 92 }
 0x4f9   :  { %2788 = vsyncpa [#allocation3], 1 }
 0x4fa   :  { %2790 = vsyncpa [#allocation3 + $0x1], 1 }

</bundles_post_ra>
